<compile_context>
chip_gen: v6e
topology: v6e:2x2x1
jax: 0.10.0
libtpu: 0.0.40
codegen_flags: <defaults>
</compile_context>

<pallas_src>
import functools
import math

import numpy as np
import jax
import jax.numpy as jnp
from jax.experimental import pallas as pl
from jax.experimental.pallas import tpu as pltpu


# ----------------------------- tiling helpers -----------------------------

def _pick_k(K, target):
    """K-axis tile must divide K exactly (no padded garbage in the reduction)."""
    if K <= target:
        return K
    t = (target // 128) * 128
    while t >= 128:
        if K % t == 0:
            return t
        t -= 128
    # Fallback: un-tiled reduction.  Fine at CLIP sizes (K in {768,1024,3072,4096});
    # irregular huge K would need padding instead.
    return K


def _heads_per_group(heads, hd):
    """Smallest divisor of `heads` whose lane footprint (hpg*hd) is 128-aligned.
    Falls back to all heads, in which case the per-group block spans the full 3C
    lane dim and is still (8,128)-legal as a full-extent block."""
    for hpg in range(1, heads):
        if heads % hpg == 0 and (hpg * hd) % 128 == 0:
            return hpg
    return heads


# ----------------------------- Pallas kernels -----------------------------

def _mm_tiled_kernel(*refs, nk, has_bias, has_res, act):
    """K-tiled matmul with f32 VMEM accumulator; epilogue fused on the last K step."""
    x_ref, w_ref = refs[0], refs[1]
    idx = 2
    b_ref = r_ref = None
    if has_bias:
        b_ref = refs[idx]; idx += 1
    if has_res:
        r_ref = refs[idx]; idx += 1
    o_ref, acc_ref = refs[idx], refs[idx + 1]

    @pl.when(pl.program_id(2) == 0)
    def _():
        acc_ref[...] = jnp.zeros_like(acc_ref)

    acc_ref[...] += jnp.dot(x_ref[...], w_ref[...],
                            preferred_element_type=jnp.float32)

    @pl.when(pl.program_id(2) == nk - 1)
    def _():
        y = acc_ref[...]
        if has_bias:
            y = y + b_ref[...].astype(jnp.float32)
        if act == "quick_gelu":                       # x * sigmoid(1.702 x)
            y = y * jax.nn.sigmoid(1.702 * y)
        if has_res:
            y = y + r_ref[...].astype(jnp.float32)
        o_ref[...] = y.astype(o_ref.dtype)


def _mm_single_kernel(*refs, has_bias, has_res, act):
    """Single-K-step matmul: no accumulator scratch, no init/finalize pl.when."""
    x_ref, w_ref = refs[0], refs[1]
    idx = 2
    b_ref = r_ref = None
    if has_bias:
        b_ref = refs[idx]; idx += 1
    if has_res:
        r_ref = refs[idx]; idx += 1
    o_ref = refs[idx]

    y = jnp.dot(x_ref[...], w_ref[...], preferred_element_type=jnp.float32)
    if has_bias:
        y = y + b_ref[...].astype(jnp.float32)
    if act == "quick_gelu":
        y = y * jax.nn.sigmoid(1.702 * y)
    if has_res:
        y = y + r_ref[...].astype(jnp.float32)
    o_ref[...] = y.astype(o_ref.dtype)


def matmul_bias(x, w, b=None, residual=None, act="none", tm=512, tn=512, tk=512):
    """x:(M,K) @ w:(K,N) [+b] [QuickGELU] [+residual] -> (M,N), tiled + pipelined.
    For K <= 1024 the K grid axis is dropped entirely (feedback: no f32
    accumulator read-modify-write, no extra pipeline dimension)."""
    M, K = x.shape
    K2, N = w.shape
    assert K == K2
    tm, tn = min(tm, M), min(tn, N)
    tk_eff = K if K <= 1024 else _pick_k(K, tk)
    nk = K // tk_eff

    if nk == 1:
        grid = (pl.cdiv(M, tm), pl.cdiv(N, tn))
        in_specs = [pl.BlockSpec((tm, K), lambda i, j: (i, 0)),
                    pl.BlockSpec((K, tn), lambda i, j: (0, j))]
        args = [x, w]
        if b is not None:
            in_specs.append(pl.BlockSpec((1, tn), lambda i, j: (0, j)))
            args.append(b.reshape(1, N))
        if residual is not None:
            in_specs.append(pl.BlockSpec((tm, tn), lambda i, j: (i, j)))
            args.append(residual)
        return pl.pallas_call(
            functools.partial(_mm_single_kernel, has_bias=b is not None,
                              has_res=residual is not None, act=act),
            out_shape=jax.ShapeDtypeStruct((M, N), x.dtype),
            grid=grid,
            in_specs=in_specs,
            out_specs=pl.BlockSpec((tm, tn), lambda i, j: (i, j)),
            compiler_params=pltpu.CompilerParams(
                dimension_semantics=("parallel", "parallel")),
        )(*args)

    grid = (pl.cdiv(M, tm), pl.cdiv(N, tn), nk)
    in_specs = [pl.BlockSpec((tm, tk_eff), lambda i, j, k: (i, k)),
                pl.BlockSpec((tk_eff, tn), lambda i, j, k: (k, j))]
    args = [x, w]
    if b is not None:
        in_specs.append(pl.BlockSpec((1, tn), lambda i, j, k: (0, j)))
        args.append(b.reshape(1, N))
    if residual is not None:
        in_specs.append(pl.BlockSpec((tm, tn), lambda i, j, k: (i, j)))
        args.append(residual)

    return pl.pallas_call(
        functools.partial(_mm_tiled_kernel, nk=nk, has_bias=b is not None,
                          has_res=residual is not None, act=act),
        out_shape=jax.ShapeDtypeStruct((M, N), x.dtype),
        grid=grid,
        in_specs=in_specs,
        out_specs=pl.BlockSpec((tm, tn), lambda i, j, k: (i, j)),
        scratch_shapes=[pltpu.VMEM((tm, tn), jnp.float32)],
        compiler_params=pltpu.CompilerParams(
            dimension_semantics=("parallel", "parallel", "arbitrary")),
    )(*args)


def _ln_mm_kernel(x_ref, g_ref, bln_ref, w_ref, *refs, has_bias, act, eps):
    """LayerNorm(x) @ w [+b] [QuickGELU].  The normalized row tile is computed once
    per row block (at j == 0) into a VMEM scratch and reused for all N tiles."""
    if has_bias:
        b_ref, o_ref, xn_ref = refs
    else:
        b_ref = None
        o_ref, xn_ref = refs

    @pl.when(pl.program_id(1) == 0)
    def _():
        x = x_ref[...].astype(jnp.float32)
        mu = jnp.mean(x, axis=-1, keepdims=True)
        var = jnp.mean(jnp.square(x - mu), axis=-1, keepdims=True)
        y = (x - mu) * jax.lax.rsqrt(var + eps)
        y = y * g_ref[...].astype(jnp.float32) + bln_ref[...].astype(jnp.float32)
        xn_ref[...] = y.astype(xn_ref.dtype)          # storage dtype -> feed MXU

    acc = jnp.dot(xn_ref[...], w_ref[...], preferred_element_type=jnp.float32)
    if has_bias:
        acc = acc + b_ref[...].astype(jnp.float32)
    if act == "quick_gelu":
        acc = acc * jax.nn.sigmoid(1.702 * acc)
    o_ref[...] = acc.astype(o_ref.dtype)


def ln_matmul(x, g, bln, w, b=None, act="none", eps=1e-5, tm=512, tn=512):
    M, C = x.shape
    C2, N = w.shape
    assert C == C2
    tm, tn = min(tm, M), min(tn, N)
    grid = (pl.cdiv(M, tm), pl.cdiv(N, tn))

    # x / gamma / beta block indices do not depend on j -> stay VMEM-resident
    # across the whole j sweep (fetched once per row block).
    in_specs = [pl.BlockSpec((tm, C), lambda i, j: (i, 0)),
                pl.BlockSpec((1, C), lambda i, j: (0, 0)),
                pl.BlockSpec((1, C), lambda i, j: (0, 0)),
                pl.BlockSpec((C, tn), lambda i, j: (0, j))]
    args = [x, g.reshape(1, C), bln.reshape(1, C), w]
    if b is not None:
        in_specs.append(pl.BlockSpec((1, tn), lambda i, j: (0, j)))
        args.append(b.reshape(1, N))

    return pl.pallas_call(
        functools.partial(_ln_mm_kernel, has_bias=b is not None, act=act, eps=eps),
        out_shape=jax.ShapeDtypeStruct((M, N), x.dtype),
        grid=grid,
        in_specs=in_specs,
        out_specs=pl.BlockSpec((tm, tn), lambda i, j: (i, j)),
        scratch_shapes=[pltpu.VMEM((tm, C), w.dtype)],   # cached LN(x) tile
        compiler_params=pltpu.CompilerParams(
            dimension_semantics=("parallel", "arbitrary")),
    )(*args)


def _ln_kernel(x_ref, g_ref, b_ref, o_ref, *, eps):
    x = x_ref[...].astype(jnp.float32)
    mu = jnp.mean(x, axis=-1, keepdims=True)
    var = jnp.mean(jnp.square(x - mu), axis=-1, keepdims=True)
    y = (x - mu) * jax.lax.rsqrt(var + eps)
    o_ref[...] = (y * g_ref[...].astype(jnp.float32)
                  + b_ref[...].astype(jnp.float32)).astype(o_ref.dtype)


def layernorm(x, g, b, eps=1e-5, tm=256):
    """Row-tiled standalone LayerNorm over the last dim of (M, C)."""
    M, C = x.shape
    tm = min(tm, M)
    return pl.pallas_call(
        functools.partial(_ln_kernel, eps=eps),
        out_shape=jax.ShapeDtypeStruct((M, C), x.dtype),
        grid=(pl.cdiv(M, tm),),
        in_specs=[pl.BlockSpec((tm, C), lambda i: (i, 0)),
                  pl.BlockSpec((1, C), lambda i: (0, 0)),
                  pl.BlockSpec((1, C), lambda i: (0, 0))],
        out_specs=pl.BlockSpec((tm, C), lambda i: (i, 0)),
        compiler_params=pltpu.CompilerParams(dimension_semantics=("parallel",)),
    )(x, g.reshape(1, C), b.reshape(1, C))


def _attn_outproj_kernel(qkv_ref, res_ref, wout_ref, bout_ref, o_ref,
                         acc_ref, hbuf_ref, *, hpg, hd, ngroups):
    """One (batch, head-group) per grid step.  Attention scale is pre-folded into
    the QKV weights, per-head outputs are stored incrementally into a small VMEM
    scratch (no concat / no big live list), and the out_proj partial product for
    this group is accumulated into an f32 scratch across the group axis.  Bias and
    residual are added on the last group step (out_proj + residual fused here)."""
    g = pl.program_id(1)

    @pl.when(g == 0)
    def _():
        acc_ref[...] = jnp.zeros_like(acc_ref)

    gd = hpg * hd
    for hh in range(hpg):                     # tiny static loop (1-2 heads per group at CLIP sizes)
        q = qkv_ref[0, :, hh * hd:(hh + 1) * hd]
        k = qkv_ref[0, :, gd + hh * hd: gd + (hh + 1) * hd]
        v = qkv_ref[0, :, 2 * gd + hh * hd: 2 * gd + (hh + 1) * hd]
        s = jax.lax.dot_general(q, k, (((1,), (1,)), ((), ())),
                                preferred_element_type=jnp.float32)
        s = s - jnp.max(s, axis=-1, keepdims=True)
        p = jnp.exp(s)
        p = p * pl.reciprocal(jnp.sum(p, axis=-1, keepdims=True), approx=True)
        hbuf_ref[:, hh * hd:(hh + 1) * hd] = jnp.dot(
            p.astype(v.dtype), v, preferred_element_type=jnp.float32
        ).astype(hbuf_ref.dtype)

    # Partial out_proj for this head group (contraction = gd, 128-aligned at CLIP sizes).
    acc_ref[...] += jnp.dot(hbuf_ref[...], wout_ref[...],
                            preferred_element_type=jnp.float32)

    @pl.when(g == ngroups - 1)
    def _():
        y = (acc_ref[...] + bout_ref[...].astype(jnp.float32)
             + res_ref[0].astype(jnp.float32))
        o_ref[0] = y.astype(o_ref.dtype)


def attention_outproj(qkv, res, wout, bout, heads, hpg):
    """qkv: (B, L, 3C) in head-group-major [q_g|k_g|v_g] column order.
    Returns res + (softmax(qk)v) @ wout + bout, shape (B, L, C)."""
    B, L, C3 = qkv.shape
    C = C3 // 3
    hd = C // heads
    gd = hpg * hd
    ngroups = heads // hpg
    return pl.pallas_call(
        functools.partial(_attn_outproj_kernel, hpg=hpg, hd=hd, ngroups=ngroups),
        out_shape=jax.ShapeDtypeStruct((B, L, C), qkv.dtype),
        grid=(B, ngroups),
        in_specs=[
            pl.BlockSpec((1, L, 3 * gd), lambda b, g: (b, 0, g)),   # this group's [q|k|v] slab
            pl.BlockSpec((1, L, C), lambda b, g: (b, 0, 0)),        # residual, resident across g
            pl.BlockSpec((gd, C), lambda b, g: (g, 0)),             # out_proj rows for group g
            pl.BlockSpec((1, C), lambda b, g: (0, 0)),              # out_proj bias, resident
        ],
        out_specs=pl.BlockSpec((1, L, C), lambda b, g: (b, 0, 0)),  # resident accumulator target
        scratch_shapes=[pltpu.VMEM((L, C), jnp.float32),            # f32 out_proj accumulator
                        pltpu.VMEM((L, gd), qkv.dtype)],            # per-group head outputs
        compiler_params=pltpu.CompilerParams(
            dimension_semantics=("parallel", "arbitrary")),
    )(qkv, res, wout, bout.reshape(1, C))


# ----------------------------- Model pieces -----------------------------

def resblock(x, p, heads, hpg):
    """CLIP ResidualAttentionBlock on (B, L, C) tokens."""
    B, L, C = x.shape
    xf = x.reshape(B * L, C)

    # ln_1 fused into QKV projection (head-group-major columns, scale pre-folded)
    qkv = ln_matmul(xf, p["ln1_g"], p["ln1_b"], p["in_proj_w"], p["in_proj_b"])
    # attention + out_proj(+bias) + residual fused in one kernel
    x = attention_outproj(qkv.reshape(B, L, 3 * C), x,
                          p["out_proj_w"], p["out_proj_b"], heads, hpg)
    xf = x.reshape(B * L, C)

    # ln_2 fused into fc (+ QuickGELU); residual fused into proj
    h = ln_matmul(xf, p["ln2_g"], p["ln2_b"], p["fc_w"], p["fc_b"],
                  act="quick_gelu")
    xf = matmul_bias(h, p["proj_w"], p["proj_b"], residual=xf)
    return xf.reshape(B, L, C)


def _prep_qkv(w, b, heads, hpg, scale):
    """Offline weight prep: fold the 1/sqrt(hd) attention scale into the Q columns
    and permute the QKV output columns to head-group-major [q_g | k_g | v_g] order
    so the attention kernel slices per-group slabs through BlockSpec (128-lane
    aligned at CLIP sizes).  out_proj rows need no permutation because groups
    contain consecutive heads."""
    C = w.shape[0]
    hd = C // heads
    gd = hpg * hd
    G = heads // hpg
    sv = jnp.concatenate([jnp.full((C,), scale, w.dtype),
                          jnp.ones((2 * C,), w.dtype)])
    w = w * sv[None, :]
    b = b * sv.astype(b.dtype)
    perm = np.concatenate([np.arange(part * C + g * gd, part * C + (g + 1) * gd)
                           for g in range(G) for part in range(3)])
    return w[:, perm], b[perm]


def init_params(key, cfg, dtype=jnp.float32):
    """All linear weights are stored pre-transposed in (K, N) layout."""
    C = cfg["width"]
    ps = cfg["patch_size"]
    heads = cfg["heads"]
    hd = C // heads
    hpg = _heads_per_group(heads, hd)
    keys = iter(jax.random.split(key, 256))

    def nrm(shape, s=0.02):
        return s * jax.random.normal(next(keys), shape, jnp.float32)

    scale = C ** -0.5
    p = {}
    p["conv1_w"] = nrm((3 * ps * ps, C))                 # flattened patch-embed weight
    p["class_embedding"] = scale * jax.random.normal(next(keys), (C,), jnp.float32)
    npos = (cfg["input_resolution"] // ps) ** 2 + 1
    p["positional_embedding"] = scale * jax.random.normal(next(keys), (npos, C), jnp.float32)
    p["ln_pre_g"], p["ln_pre_b"] = jnp.ones((C,)), jnp.zeros((C,))

    blocks = []
    for _ in range(cfg["layers"]):
        wq, bq = _prep_qkv(nrm((C, 3 * C)), jnp.zeros((3 * C,)),
                           heads, hpg, hd ** -0.5)
        blocks.append(dict(
            ln1_g=jnp.ones((C,)), ln1_b=jnp.zeros((C,)),
            in_proj_w=wq, in_proj_b=bq,
            out_proj_w=nrm((C, C)), out_proj_b=jnp.zeros((C,)),
            ln2_g=jnp.ones((C,)), ln2_b=jnp.zeros((C,)),
            fc_w=nrm((C, 4 * C)), fc_b=jnp.zeros((4 * C,)),
            proj_w=nrm((4 * C, C)), proj_b=jnp.zeros((C,)),
        ))
    p["resblocks"] = blocks

    p["ln_post_g"], p["ln_post_b"] = jnp.ones((C,)), jnp.zeros((C,))
    p["proj"] = scale * jax.random.normal(next(keys), (C, cfg["output_dim"]), jnp.float32)

    nt, pd = cfg["num_tokens"], cfg["prompt_dim"]
    val = math.sqrt(6.0 / float(3 * ps * ps + pd))
    td = max(abs(cfg["total_d_layer"]), 1)
    p["prompt_embeddings"] = jax.random.uniform(
        next(keys), (1, nt, pd), jnp.float32, minval=-val, maxval=val)
    p["deep_prompt_embeddings"] = jax.random.uniform(
        next(keys), (td, nt, pd), jnp.float32, minval=-val, maxval=val)
    p["prompt_proj_w"] = nrm((pd, pd))
    p["prompt_proj_b"] = jnp.zeros((pd,))
    p["prompt_norm_g"], p["prompt_norm_b"] = jnp.ones((pd,)), jnp.zeros((pd,))

    return jax.tree_util.tree_map(lambda a: a.astype(dtype), p)


def vpt_clip_vit_forward(x, params, cfg):
    B, Cin, Himg, Wimg = x.shape                 # NCHW, like the PyTorch Conv2d input
    ps, C = cfg["patch_size"], cfg["width"]
    H, W = Himg // ps, Wimg // ps
    HW = H * W
    nt = cfg["num_tokens"]
    heads = cfg["heads"]
    hpg = _heads_per_group(heads, C // heads)
    dtype = params["class_embedding"].dtype
    x = x.astype(dtype)

    # conv1 (stride == kernel, no bias) == patch extraction + tiled matmul
    patches = (x.reshape(B, Cin, H, ps, W, ps)
                 .transpose(0, 2, 4, 1, 3, 5)
                 .reshape(B * HW, Cin * ps * ps))
    xt = matmul_bias(patches, params["conv1_w"]).reshape(B, HW, C)

    # class token + positional embedding (bilinear resize is identity: same size)
    cls = jnp.broadcast_to(params["class_embedding"][None, None, :], (B, 1, C))
    xt = jnp.concatenate([cls, xt], axis=1)                      # (B, 1+HW, C)
    pos = params["positional_embedding"]
    cls_pos = pos[0] + params["class_embedding"]                 # reference quirk preserved
    pos_full = jnp.concatenate([cls_pos[None, :], pos[1:]], axis=0)[None]
    xt = xt + pos_full
    xt = layernorm(xt.reshape(B * (1 + HW), C),
                   params["ln_pre_g"], params["ln_pre_b"], 1e-5).reshape(B, 1 + HW, C)

    # shallow visual prompts (dropout = identity in eval)
    pr = matmul_bias(params["prompt_embeddings"][0],
                     params["prompt_proj_w"], params["prompt_proj_b"])   # (nt, C)
    pr = jnp.broadcast_to(pr[None], (B, nt, C))
    h = jnp.concatenate([xt[:, :1], pr, xt[:, 1:]], axis=1)              # (B, 1+nt+HW, C)

    td = cfg["total_d_layer"]
    if td > 0:   # project all deep prompts once, reuse per layer
        dp_all = matmul_bias(params["deep_prompt_embeddings"].reshape(td * nt, C),
                             params["prompt_proj_w"], params["prompt_proj_b"]
                             ).reshape(td, nt, C)

    features = []
    for i in range(cfg["layers"]):                # forward_deep_prompt (td > 0)
        if i == 0:
            h = resblock(h, params["resblocks"][i], heads, hpg)
        elif i <= td:
            dp = jnp.broadcast_to(dp_all[i - 1][None], (B, nt, C))
            # TODO(synk): fold this prompt-row overwrite into the first ln_matmul of
            # the block to avoid the per-layer (B,L,C) dynamic-update-slice copy.
            h = h.at[:, 1:1 + nt, :].set(dp)
            h = resblock(h, params["resblocks"][i], heads, hpg)
        else:
            h = jnp.concatenate([h[:, :1], h[:, -HW:]], axis=1)
            h = resblock(h, params["resblocks"][i], heads, hpg)
        if len(cfg["out_indices"]) > 1 and i in cfg["out_indices"]:
            xp = h[:, -HW:, :].transpose(0, 2, 1).reshape(B, C, H, W)
            features.append(xp)

    L = h.shape[1]
    encoded = layernorm(h.reshape(B * L, C), params["prompt_norm_g"],
                        params["prompt_norm_b"], 1e-6).reshape(B, L, C)

    outs = []
    if cfg["get_embeddings"]:
        # ln_post fused into the final CLIP projection
        xb = ln_matmul(encoded.reshape(B * L, C),
                       params["ln_post_g"], params["ln_post_b"],
                       params["proj"], None, eps=1e-5).reshape(B, L, cfg["output_dim"])
        global_embedding = xb[:, 0]
        visual_embedding = xb[:, -HW:].reshape(B, H, W, -1).transpose(0, 3, 1, 2)
        if len(cfg["out_indices"]) == 1:
            v32 = visual_embedding.astype(jnp.float32)
            visual_embedding = (v32 / jnp.linalg.norm(v32, axis=1, keepdims=True)).astype(dtype)
            features.append(visual_embedding)
        outs.append(tuple(features))
        g32 = global_embedding.astype(jnp.float32)
        global_embedding = (g32 / jnp.linalg.norm(g32, axis=1, keepdims=True)).astype(dtype)
        outs.append(global_embedding)
    return outs


# --------------------------------- main ---------------------------------

if __name__ == "__main__":
    cfg = dict(
        input_resolution=16,
        patch_size=4,
        width=32,
        layers=4,
        heads=4,
        output_dim=16,
        out_indices=(1, 3),
        get_embeddings=True,
        num_tokens=4,
        prompt_dim=32,          # must equal width for prompt concatenation
        total_d_layer=2,        # exercises both the prompt-replace and prompt-drop branches
    )
    key = jax.random.PRNGKey(0)
    pkey, xkey = jax.random.split(key)

    # bf16 storage -> native MXU feed; all accumulation / LN / softmax math in f32.
    dtype = jnp.bfloat16
    params = init_params(pkey, cfg, dtype=dtype)
    x = jax.random.normal(xkey, (2, 3, 16, 16), jnp.float32)   # NCHW input

    fwd = jax.jit(lambda xx, pp: vpt_clip_vit_forward(xx, pp, cfg))
    outs = fwd(x, params)
    jax.block_until_ready(outs)

    feats, glob = outs
    assert len(feats) == 2
    assert feats[0].shape == (2, 32, 4, 4) and feats[1].shape == (2, 32, 4, 4)
    assert glob.shape == (2, 16)
    assert not bool(jnp.any(jnp.isnan(glob.astype(jnp.float32))))
    print("KERNEL_OK")
</pallas_src>

<mosaic_0001>
module attributes {stable_mosaic.version = 11 : i64} {
  func.func @_mm_single_kernel(%arg0: i32, %arg1: i32, %arg2: memref<32x48xbf16, #tpu.memory_space<vmem>>, %arg3: memref<48x32xbf16, #tpu.memory_space<vmem>>, %arg4: memref<32x32xbf16, #tpu.memory_space<vmem>>) attributes {dimension_semantics = [#tpu.dimension_semantics<parallel>, #tpu.dimension_semantics<parallel>], iteration_bounds = array<i64: 1, 1>, scalar_prefetch = 0 : i64, scratch_operands = 0 : i64, tpu.core_type = #tpu.core_type<tc>, window_params = [{transform_indices = @transform_0, window_bounds = array<i64: 32, 48>}, {transform_indices = @transform_1, window_bounds = array<i64: 48, 32>}, {transform_indices = @transform_2, window_bounds = array<i64: 32, 32>}]} {
    %c0 = arith.constant 0 : index
    %c0_0 = arith.constant 0 : index
    %0 = vector.load %arg2[%c0, %c0_0] : memref<32x48xbf16, #tpu.memory_space<vmem>>, vector<32x48xbf16>
    %c0_1 = arith.constant 0 : index
    %c0_2 = arith.constant 0 : index
    %1 = vector.load %arg3[%c0_1, %c0_2] : memref<48x32xbf16, #tpu.memory_space<vmem>>, vector<48x32xbf16>
    %cst = arith.constant dense<0.000000e+00> : vector<32x32xf32>
    %2 = tpu.matmul %0, %1, %cst {dimension_numbers = #tpu.dot_dimension_numbers<[1], [0], [0], [1], [0, 0, 1, 1], [], []>} : vector<32x48xbf16>, vector<48x32xbf16>, vector<32x32xf32> -> vector<32x32xf32>
    %3 = arith.truncf %2 : vector<32x32xf32> to vector<32x32xbf16>
    %c0_3 = arith.constant 0 : index
    %c0_4 = arith.constant 0 : index
    %4 = vector.load %arg4[%c0_3, %c0_4] : memref<32x32xbf16, #tpu.memory_space<vmem>>, vector<32x32xbf16>
    tpu.vector_store %arg4[%c0_3, %c0_4], %3 {strides = array<i32>} : memref<32x32xbf16, #tpu.memory_space<vmem>>, vector<32x32xbf16>,
    return
  }
  func.func @transform_0(%arg0: i32, %arg1: i32) -> (i32, i32) {
    %c0_i32 = arith.constant 0 : i32
    %c0_i32_0 = arith.constant 0 : i32
    return %arg0, %c0_i32 : i32, i32
  }
  func.func @transform_1(%arg0: i32, %arg1: i32) -> (i32, i32) {
    %c0_i32 = arith.constant 0 : i32
    %c0_i32_0 = arith.constant 0 : i32
    return %c0_i32, %arg1 : i32, i32
  }
  func.func @transform_2(%arg0: i32, %arg1: i32) -> (i32, i32) {
    %c0_i32 = arith.constant 0 : i32
    return %arg0, %arg1 : i32, i32
  }
}

module attributes {stable_mosaic.version = 11 : i64} {
  func.func @_ln_kernel(%arg0: i32, %arg1: memref<34x32xbf16, #tpu.memory_space<vmem>>, %arg2: memref<1x32xbf16, #tpu.memory_space<vmem>>, %arg3: memref<1x32xbf16, #tpu.memory_space<vmem>>, %arg4: memref<34x32xbf16, #tpu.memory_space<vmem>>) attributes {dimension_semantics = [#tpu.dimension_semantics<parallel>], iteration_bounds = array<i64: 1>, scalar_prefetch = 0 : i64, scratch_operands = 0 : i64, tpu.core_type = #tpu.core_type<tc>, window_params = [{transform_indices = @transform_0, window_bounds = array<i64: 34, 32>}, {pipeline_mode = #tpu.pipeline_mode<synchronous>, transform_indices = @transform_1, window_bounds = array<i64: 1, 32>}, {pipeline_mode = #tpu.pipeline_mode<synchronous>, transform_indices = @transform_2, window_bounds = array<i64: 1, 32>}, {transform_indices = @transform_3, window_bounds = array<i64: 34, 32>}]} {
    %c0 = arith.constant 0 : index
    %c0_0 = arith.constant 0 : index
    %0 = vector.load %arg1[%c0, %c0_0] : memref<34x32xbf16, #tpu.memory_space<vmem>>, vector<34x32xbf16>
    %1 = arith.extf %0 : vector<34x32xbf16> to vector<34x32xf32>
    %cst = arith.constant dense<0.000000e+00> : vector<34xf32>
    %2 = vector.multi_reduction <add>, %1, %cst [1] : vector<34x32xf32> to vector<34xf32>
    %3 = vector.shape_cast %2 : vector<34xf32> to vector<34x1xf32>
    %cst_1 = arith.constant 3.200000e+01 : f32
    %4 = vector.broadcast %cst_1 : f32 to vector<34x1xf32>
    %5 = arith.divf %3, %4 : vector<34x1xf32>
    %6 = vector.broadcast %5 : vector<34x1xf32> to vector<34x32xf32>
    %7 = arith.subf %1, %6 : vector<34x32xf32>
    %8 = arith.mulf %7, %7 : vector<34x32xf32>
    %cst_2 = arith.constant dense<0.000000e+00> : vector<34xf32>
    %9 = vector.multi_reduction <add>, %8, %cst_2 [1] : vector<34x32xf32> to vector<34xf32>
    %10 = vector.shape_cast %9 : vector<34xf32> to vector<34x1xf32>
    %cst_3 = arith.constant 3.200000e+01 : f32
    %11 = vector.broadcast %cst_3 : f32 to vector<34x1xf32>
    %12 = arith.divf %10, %11 : vector<34x1xf32>
    %13 = vector.broadcast %5 : vector<34x1xf32> to vector<34x32xf32>
    %14 = arith.subf %1, %13 : vector<34x32xf32>
    %cst_4 = arith.constant 9.99999974E-6 : f32
    %15 = vector.broadcast %cst_4 : f32 to vector<34x1xf32>
    %16 = arith.addf %12, %15 : vector<34x1xf32>
    %17 = math.rsqrt %16 : vector<34x1xf32>
    %18 = vector.broadcast %17 : vector<34x1xf32> to vector<34x32xf32>
    %19 = arith.mulf %14, %18 : vector<34x32xf32>
    %c0_5 = arith.constant 0 : index
    %c0_6 = arith.constant 0 : index
    %20 = vector.load %arg2[%c0_5, %c0_6] : memref<1x32xbf16, #tpu.memory_space<vmem>>, vector<1x32xbf16>
    %21 = arith.extf %20 : vector<1x32xbf16> to vector<1x32xf32>
    %22 = vector.broadcast %21 : vector<1x32xf32> to vector<34x32xf32>
    %23 = arith.mulf %19, %22 : vector<34x32xf32>
    %c0_7 = arith.constant 0 : index
    %c0_8 = arith.constant 0 : index
    %24 = vector.load %arg3[%c0_7, %c0_8] : memref<1x32xbf16, #tpu.memory_space<vmem>>, vector<1x32xbf16>
    %25 = arith.extf %24 : vector<1x32xbf16> to vector<1x32xf32>
    %26 = vector.broadcast %25 : vector<1x32xf32> to vector<34x32xf32>
    %27 = arith.addf %23, %26 : vector<34x32xf32>
    %28 = arith.truncf %27 : vector<34x32xf32> to vector<34x32xbf16>
    %c0_9 = arith.constant 0 : index
    %c0_10 = arith.constant 0 : index
    %29 = vector.load %arg4[%c0_9, %c0_10] : memref<34x32xbf16, #tpu.memory_space<vmem>>, vector<34x32xbf16>
    tpu.vector_store %arg4[%c0_9, %c0_10], %28 {strides = array<i32>} : memref<34x32xbf16, #tpu.memory_space<vmem>>, vector<34x32xbf16>,
    return
  }
  func.func @transform_0(%arg0: i32) -> (i32, i32) {
    %c0_i32 = arith.constant 0 : i32
    %c0_i32_0 = arith.constant 0 : i32
    return %arg0, %c0_i32 : i32, i32
  }
  func.func @transform_1(%arg0: i32) -> (i32, i32) {
    %c0_i32 = arith.constant 0 : i32
    %c0_i32_0 = arith.constant 0 : i32
    %c0_i32_1 = arith.constant 0 : i32
    return %c0_i32, %c0_i32_0 : i32, i32
  }
  func.func @transform_2(%arg0: i32) -> (i32, i32) {
    %c0_i32 = arith.constant 0 : i32
    %c0_i32_0 = arith.constant 0 : i32
    %c0_i32_1 = arith.constant 0 : i32
    return %c0_i32, %c0_i32_0 : i32, i32
  }
  func.func @transform_3(%arg0: i32) -> (i32, i32) {
    %c0_i32 = arith.constant 0 : i32
    %c0_i32_0 = arith.constant 0 : i32
    return %arg0, %c0_i32 : i32, i32
  }
}

module attributes {stable_mosaic.version = 11 : i64} {
  func.func @_mm_single_kernel(%arg0: i32, %arg1: i32, %arg2: memref<4x32xbf16, #tpu.memory_space<vmem>>, %arg3: memref<32x32xbf16, #tpu.memory_space<vmem>>, %arg4: memref<1x32xbf16, #tpu.memory_space<vmem>>, %arg5: memref<4x32xbf16, #tpu.memory_space<vmem>>) attributes {dimension_semantics = [#tpu.dimension_semantics<parallel>, #tpu.dimension_semantics<parallel>], iteration_bounds = array<i64: 1, 1>, scalar_prefetch = 0 : i64, scratch_operands = 0 : i64, tpu.core_type = #tpu.core_type<tc>, window_params = [{transform_indices = @transform_0, window_bounds = array<i64: 4, 32>}, {transform_indices = @transform_1, window_bounds = array<i64: 32, 32>}, {transform_indices = @transform_2, window_bounds = array<i64: 1, 32>}, {transform_indices = @transform_3, window_bounds = array<i64: 4, 32>}]} {
    %c0 = arith.constant 0 : index
    %c0_0 = arith.constant 0 : index
    %0 = vector.load %arg2[%c0, %c0_0] : memref<4x32xbf16, #tpu.memory_space<vmem>>, vector<4x32xbf16>
    %c0_1 = arith.constant 0 : index
    %c0_2 = arith.constant 0 : index
    %1 = vector.load %arg3[%c0_1, %c0_2] : memref<32x32xbf16, #tpu.memory_space<vmem>>, vector<32x32xbf16>
    %cst = arith.constant dense<0.000000e+00> : vector<4x32xf32>
    %2 = tpu.matmul %0, %1, %cst {dimension_numbers = #tpu.dot_dimension_numbers<[1], [0], [0], [1], [0, 0, 1, 1], [], []>} : vector<4x32xbf16>, vector<32x32xbf16>, vector<4x32xf32> -> vector<4x32xf32>
    %c0_3 = arith.constant 0 : index
    %c0_4 = arith.constant 0 : index
    %3 = vector.load %arg4[%c0_3, %c0_4] : memref<1x32xbf16, #tpu.memory_space<vmem>>, vector<1x32xbf16>
    %4 = arith.extf %3 : vector<1x32xbf16> to vector<1x32xf32>
    %5 = vector.broadcast %4 : vector<1x32xf32> to vector<4x32xf32>
    %6 = arith.addf %2, %5 : vector<4x32xf32>
    %7 = arith.truncf %6 : vector<4x32xf32> to vector<4x32xbf16>
    %c0_5 = arith.constant 0 : index
    %c0_6 = arith.constant 0 : index
    %8 = vector.load %arg5[%c0_5, %c0_6] : memref<4x32xbf16, #tpu.memory_space<vmem>>, vector<4x32xbf16>
    tpu.vector_store %arg5[%c0_5, %c0_6], %7 {strides = array<i32>} : memref<4x32xbf16, #tpu.memory_space<vmem>>, vector<4x32xbf16>,
    return
  }
  func.func @transform_0(%arg0: i32, %arg1: i32) -> (i32, i32) {
    %c0_i32 = arith.constant 0 : i32
    %c0_i32_0 = arith.constant 0 : i32
    return %arg0, %c0_i32 : i32, i32
  }
  func.func @transform_1(%arg0: i32, %arg1: i32) -> (i32, i32) {
    %c0_i32 = arith.constant 0 : i32
    %c0_i32_0 = arith.constant 0 : i32
    return %c0_i32, %arg1 : i32, i32
  }
  func.func @transform_2(%arg0: i32, %arg1: i32) -> (i32, i32) {
    %c0_i32 = arith.constant 0 : i32
    %c0_i32_0 = arith.constant 0 : i32
    return %c0_i32, %arg1 : i32, i32
  }
  func.func @transform_3(%arg0: i32, %arg1: i32) -> (i32, i32) {
    %c0_i32 = arith.constant 0 : i32
    return %arg0, %arg1 : i32, i32
  }
}

module attributes {stable_mosaic.version = 11 : i64} {
  func.func @_ln_mm_kernel(%arg0: i32, %arg1: i32, %arg2: memref<42x32xbf16, #tpu.memory_space<vmem>>, %arg3: memref<1x32xbf16, #tpu.memory_space<vmem>>, %arg4: memref<1x32xbf16, #tpu.memory_space<vmem>>, %arg5: memref<32x96xbf16, #tpu.memory_space<vmem>>, %arg6: memref<1x96xbf16, #tpu.memory_space<vmem>>, %arg7: memref<42x96xbf16, #tpu.memory_space<vmem>>, %arg8: memref<42x32xbf16, #tpu.memory_space<vmem>>) attributes {dimension_semantics = [#tpu.dimension_semantics<parallel>, #tpu.dimension_semantics<arbitrary>], iteration_bounds = array<i64: 1, 1>, scalar_prefetch = 0 : i64, scratch_operands = 1 : i64, tpu.core_type = #tpu.core_type<tc>, window_params = [{transform_indices = @transform_0, window_bounds = array<i64: 42, 32>}, {pipeline_mode = #tpu.pipeline_mode<synchronous>, transform_indices = @transform_1, window_bounds = array<i64: 1, 32>}, {pipeline_mode = #tpu.pipeline_mode<synchronous>, transform_indices = @transform_2, window_bounds = array<i64: 1, 32>}, {transform_indices = @transform_3, window_bounds = array<i64: 32, 96>}, {transform_indices = @transform_4, window_bounds = array<i64: 1, 96>}, {transform_indices = @transform_5, window_bounds = array<i64: 42, 96>}]} {
    %c0_i32 = arith.constant 0 : i32
    %0 = arith.cmpi eq, %arg1, %c0_i32 : i32
    %1 = arith.extui %0 : i1 to i32
    %c0_i32_0 = arith.constant 0 : i32
    %2 = arith.cmpi ne, %1, %c0_i32_0 : i32
    scf.if %2 {
      %c0_8 = arith.constant 0 : index
      %c0_9 = arith.constant 0 : index
      %12 = vector.load %arg2[%c0_8, %c0_9] : memref<42x32xbf16, #tpu.memory_space<vmem>>, vector<42x32xbf16>
      %13 = arith.extf %12 : vector<42x32xbf16> to vector<42x32xf32>
      %cst_10 = arith.constant dense<0.000000e+00> : vector<42xf32>
      %14 = vector.multi_reduction <add>, %13, %cst_10 [1] : vector<42x32xf32> to vector<42xf32>
      %15 = vector.shape_cast %14 : vector<42xf32> to vector<42x1xf32>
      %cst_11 = arith.constant 3.200000e+01 : f32
      %16 = vector.broadcast %cst_11 : f32 to vector<42x1xf32>
      %17 = arith.divf %15, %16 : vector<42x1xf32>
      %18 = vector.broadcast %17 : vector<42x1xf32> to vector<42x32xf32>
      %19 = arith.subf %13, %18 : vector<42x32xf32>
      %20 = arith.mulf %19, %19 : vector<42x32xf32>
      %cst_12 = arith.constant dense<0.000000e+00> : vector<42xf32>
      %21 = vector.multi_reduction <add>, %20, %cst_12 [1] : vector<42x32xf32> to vector<42xf32>
      %22 = vector.shape_cast %21 : vector<42xf32> to vector<42x1xf32>
      %cst_13 = arith.constant 3.200000e+01 : f32
      %23 = vector.broadcast %cst_13 : f32 to vector<42x1xf32>
      %24 = arith.divf %22, %23 : vector<42x1xf32>
      %25 = vector.broadcast %17 : vector<42x1xf32> to vector<42x32xf32>
      %26 = arith.subf %13, %25 : vector<42x32xf32>
      %cst_14 = arith.constant 9.99999974E-6 : f32
      %27 = vector.broadcast %cst_14 : f32 to vector<42x1xf32>
      %28 = arith.addf %24, %27 : vector<42x1xf32>
      %29 = math.rsqrt %28 : vector<42x1xf32>
      %30 = vector.broadcast %29 : vector<42x1xf32> to vector<42x32xf32>
      %31 = arith.mulf %26, %30 : vector<42x32xf32>
      %c0_15 = arith.constant 0 : index
      %c0_16 = arith.constant 0 : index
      %32 = vector.load %arg3[%c0_15, %c0_16] : memref<1x32xbf16, #tpu.memory_space<vmem>>, vector<1x32xbf16>
      %33 = arith.extf %32 : vector<1x32xbf16> to vector<1x32xf32>
      %34 = vector.broadcast %33 : vector<1x32xf32> to vector<42x32xf32>
      %35 = arith.mulf %31, %34 : vector<42x32xf32>
      %c0_17 = arith.constant 0 : index
      %c0_18 = arith.constant 0 : index
      %36 = vector.load %arg4[%c0_17, %c0_18] : memref<1x32xbf16, #tpu.memory_space<vmem>>, vector<1x32xbf16>
      %37 = arith.extf %36 : vector<1x32xbf16> to vector<1x32xf32>
      %38 = vector.broadcast %37 : vector<1x32xf32> to vector<42x32xf32>
      %39 = arith.addf %35, %38 : vector<42x32xf32>
      %40 = arith.truncf %39 : vector<42x32xf32> to vector<42x32xbf16>
      %c0_19 = arith.constant 0 : index
      %c0_20 = arith.constant 0 : index
      %41 = vector.load %arg8[%c0_19, %c0_20] : memref<42x32xbf16, #tpu.memory_space<vmem>>, vector<42x32xbf16>
      tpu.vector_store %arg8[%c0_19, %c0_20], %40 {strides = array<i32>} : memref<42x32xbf16, #tpu.memory_space<vmem>>, vector<42x32xbf16>,
    } else {
    }
    %c0 = arith.constant 0 : index
    %c0_1 = arith.constant 0 : index
    %3 = vector.load %arg8[%c0, %c0_1] : memref<42x32xbf16, #tpu.memory_space<vmem>>, vector<42x32xbf16>
    %c0_2 = arith.constant 0 : index
    %c0_3 = arith.constant 0 : index
    %4 = vector.load %arg5[%c0_2, %c0_3] : memref<32x96xbf16, #tpu.memory_space<vmem>>, vector<32x96xbf16>
    %cst = arith.constant dense<0.000000e+00> : vector<42x96xf32>
    %5 = tpu.matmul %3, %4, %cst {dimension_numbers = #tpu.dot_dimension_numbers<[1], [0], [0], [1], [0, 0, 1, 1], [], []>} : vector<42x32xbf16>, vector<32x96xbf16>, vector<42x96xf32> -> vector<42x96xf32>
    %c0_4 = arith.constant 0 : index
    %c0_5 = arith.constant 0 : index
    %6 = vector.load %arg6[%c0_4, %c0_5] : memref<1x96xbf16, #tpu.memory_space<vmem>>, vector<1x96xbf16>
    %7 = arith.extf %6 : vector<1x96xbf16> to vector<1x96xf32>
    %8 = vector.broadcast %7 : vector<1x96xf32> to vector<42x96xf32>
    %9 = arith.addf %5, %8 : vector<42x96xf32>
    %10 = arith.truncf %9 : vector<42x96xf32> to vector<42x96xbf16>
    %c0_6 = arith.constant 0 : index
    %c0_7 = arith.constant 0 : index
    %11 = vector.load %arg7[%c0_6, %c0_7] : memref<42x96xbf16, #tpu.memory_space<vmem>>, vector<42x96xbf16>
    tpu.vector_store %arg7[%c0_6, %c0_7], %10 {strides = array<i32>} : memref<42x96xbf16, #tpu.memory_space<vmem>>, vector<42x96xbf16>,
    return
  }
  func.func @transform_0(%arg0: i32, %arg1: i32) -> (i32, i32) {
    %c0_i32 = arith.constant 0 : i32
    %c0_i32_0 = arith.constant 0 : i32
    return %arg0, %c0_i32 : i32, i32
  }
  func.func @transform_1(%arg0: i32, %arg1: i32) -> (i32, i32) {
    %c0_i32 = arith.constant 0 : i32
    %c0_i32_0 = arith.constant 0 : i32
    %c0_i32_1 = arith.constant 0 : i32
    return %c0_i32, %c0_i32_0 : i32, i32
  }
  func.func @transform_2(%arg0: i32, %arg1: i32) -> (i32, i32) {
    %c0_i32 = arith.constant 0 : i32
    %c0_i32_0 = arith.constant 0 : i32
    %c0_i32_1 = arith.constant 0 : i32
    return %c0_i32, %c0_i32_0 : i32, i32
  }
  func.func @transform_3(%arg0: i32, %arg1: i32) -> (i32, i32) {
    %c0_i32 = arith.constant 0 : i32
    %c0_i32_0 = arith.constant 0 : i32
    return %c0_i32, %arg1 : i32, i32
  }
  func.func @transform_4(%arg0: i32, %arg1: i32) -> (i32, i32) {
    %c0_i32 = arith.constant 0 : i32
    %c0_i32_0 = arith.constant 0 : i32
    return %c0_i32, %arg1 : i32, i32
  }
  func.func @transform_5(%arg0: i32, %arg1: i32) -> (i32, i32) {
    %c0_i32 = arith.constant 0 : i32
    return %arg0, %arg1 : i32, i32
  }
}

module attributes {stable_mosaic.version = 11 : i64} {
  func.func @_attn_outproj_kernel(%arg0: i32, %arg1: i32, %arg2: memref<1x21x96xbf16, #tpu.memory_space<vmem>>, %arg3: memref<1x21x32xbf16, #tpu.memory_space<vmem>>, %arg4: memref<32x32xbf16, #tpu.memory_space<vmem>>, %arg5: memref<1x32xbf16, #tpu.memory_space<vmem>>, %arg6: memref<1x21x32xbf16, #tpu.memory_space<vmem>>, %arg7: memref<21x32xf32, #tpu.memory_space<vmem>>, %arg8: memref<21x32xbf16, #tpu.memory_space<vmem>>) attributes {dimension_semantics = [#tpu.dimension_semantics<parallel>, #tpu.dimension_semantics<arbitrary>], iteration_bounds = array<i64: 2, 1>, scalar_prefetch = 0 : i64, scratch_operands = 2 : i64, tpu.core_type = #tpu.core_type<tc>, window_params = [{transform_indices = @transform_0, window_bounds = array<i64: 1, 21, 96>}, {transform_indices = @transform_1, window_bounds = array<i64: 1, 21, 32>}, {transform_indices = @transform_2, window_bounds = array<i64: 32, 32>}, {pipeline_mode = #tpu.pipeline_mode<synchronous>, transform_indices = @transform_3, window_bounds = array<i64: 1, 32>}, {transform_indices = @transform_4, window_bounds = array<i64: 1, 21, 32>}]} {
    %c0_i32 = arith.constant 0 : i32
    %0 = arith.cmpi eq, %arg1, %c0_i32 : i32
    %1 = arith.extui %0 : i1 to i32
    %c0_i32_0 = arith.constant 0 : i32
    %2 = arith.cmpi ne, %1, %c0_i32_0 : i32
    scf.if %2 {
      %cst_59 = arith.constant 0.000000e+00 : f32
      %96 = vector.broadcast %cst_59 : f32 to vector<21x32xf32>
      %c0_60 = arith.constant 0 : index
      %c0_61 = arith.constant 0 : index
      %97 = vector.load %arg7[%c0_60, %c0_61] : memref<21x32xf32, #tpu.memory_space<vmem>>, vector<21x32xf32>
      tpu.vector_store %arg7[%c0_60, %c0_61], %96 {strides = array<i32>} : memref<21x32xf32, #tpu.memory_space<vmem>>, vector<21x32xf32>,
    } else {
    }
    %c0 = arith.constant 0 : index
    %c0_1 = arith.constant 0 : index
    %c0_2 = arith.constant 0 : index
    %3 = vector.load %arg2[%c0, %c0_1, %c0_2] : memref<1x21x96xbf16, #tpu.memory_space<vmem>>, vector<1x21x8xbf16>
    %4 = vector.shape_cast %3 : vector<1x21x8xbf16> to vector<21x8xbf16>
    %c0_3 = arith.constant 0 : index
    %c0_4 = arith.constant 0 : index
    %c32 = arith.constant 32 : index
    %5 = vector.load %arg2[%c0_3, %c0_4, %c32] : memref<1x21x96xbf16, #tpu.memory_space<vmem>>, vector<1x21x8xbf16>
    %6 = vector.shape_cast %5 : vector<1x21x8xbf16> to vector<21x8xbf16>
    %c0_5 = arith.constant 0 : index
    %c0_6 = arith.constant 0 : index
    %c64 = arith.constant 64 : index
    %7 = vector.load %arg2[%c0_5, %c0_6, %c64] : memref<1x21x96xbf16, #tpu.memory_space<vmem>>, vector<1x21x8xbf16>
    %8 = vector.shape_cast %7 : vector<1x21x8xbf16> to vector<21x8xbf16>
    %cst = arith.constant dense<0.000000e+00> : vector<21x21xf32>
    %9 = tpu.matmul %4, %6, %cst {dimension_numbers = #tpu.dot_dimension_numbers<[1], [1], [0], [0], [0, 0, 1, 0], [], []>} : vector<21x8xbf16>, vector<21x8xbf16>, vector<21x21xf32> -> vector<21x21xf32>
    %cst_7 = arith.constant dense<0xFF800000> : vector<21xf32>
    %10 = vector.multi_reduction <maximumf>, %9, %cst_7 [1] : vector<21x21xf32> to vector<21xf32>
    %11 = vector.shape_cast %10 : vector<21xf32> to vector<21x1xf32>
    %12 = vector.broadcast %11 : vector<21x1xf32> to vector<21x21xf32>
    %13 = arith.subf %9, %12 : vector<21x21xf32>
    %14 = math.exp %13 : vector<21x21xf32>
    %cst_8 = arith.constant dense<0.000000e+00> : vector<21xf32>
    %15 = vector.multi_reduction <add>, %14, %cst_8 [1] : vector<21x21xf32> to vector<21xf32>
    %16 = vector.shape_cast %15 : vector<21xf32> to vector<21x1xf32>
    %17 = tpu.reciprocal %16 {approx = true} : vector<21x1xf32> -> vector<21x1xf32>
    %18 = vector.broadcast %17 : vector<21x1xf32> to vector<21x21xf32>
    %19 = arith.mulf %14, %18 : vector<21x21xf32>
    %20 = arith.truncf %19 : vector<21x21xf32> to vector<21x21xbf16>
    %cst_9 = arith.constant dense<0.000000e+00> : vector<21x8xf32>
    %21 = tpu.matmul %20, %8, %cst_9 {dimension_numbers = #tpu.dot_dimension_numbers<[1], [0], [0], [1], [0, 0, 1, 1], [], []>} : vector<21x21xbf16>, vector<21x8xbf16>, vector<21x8xf32> -> vector<21x8xf32>
    %22 = arith.truncf %21 : vector<21x8xf32> to vector<21x8xbf16>
    %c0_10 = arith.constant 0 : index
    %c0_11 = arith.constant 0 : index
    %23 = vector.load %arg8[%c0_10, %c0_11] : memref<21x32xbf16, #tpu.memory_space<vmem>>, vector<21x8xbf16>
    tpu.vector_store %arg8[%c0_10, %c0_11], %22 {strides = array<i32>} : memref<21x32xbf16, #tpu.memory_space<vmem>>, vector<21x8xbf16>,
    %c0_12 = arith.constant 0 : index
    %c0_13 = arith.constant 0 : index
    %c8 = arith.constant 8 : index
    %24 = vector.load %arg2[%c0_12, %c0_13, %c8] : memref<1x21x96xbf16, #tpu.memory_space<vmem>>, vector<1x21x8xbf16>
    %25 = vector.shape_cast %24 : vector<1x21x8xbf16> to vector<21x8xbf16>
    %c0_14 = arith.constant 0 : index
    %c0_15 = arith.constant 0 : index
    %c40 = arith.constant 40 : index
    %26 = vector.load %arg2[%c0_14, %c0_15, %c40] : memref<1x21x96xbf16, #tpu.memory_space<vmem>>, vector<1x21x8xbf16>
    %27 = vector.shape_cast %26 : vector<1x21x8xbf16> to vector<21x8xbf16>
    %c0_16 = arith.constant 0 : index
    %c0_17 = arith.constant 0 : index
    %c72 = arith.constant 72 : index
    %28 = vector.load %arg2[%c0_16, %c0_17, %c72] : memref<1x21x96xbf16, #tpu.memory_space<vmem>>, vector<1x21x8xbf16>
    %29 = vector.shape_cast %28 : vector<1x21x8xbf16> to vector<21x8xbf16>
    %cst_18 = arith.constant dense<0.000000e+00> : vector<21x21xf32>
    %30 = tpu.matmul %25, %27, %cst_18 {dimension_numbers = #tpu.dot_dimension_numbers<[1], [1], [0], [0], [0, 0, 1, 0], [], []>} : vector<21x8xbf16>, vector<21x8xbf16>, vector<21x21xf32> -> vector<21x21xf32>
    %cst_19 = arith.constant dense<0xFF800000> : vector<21xf32>
    %31 = vector.multi_reduction <maximumf>, %30, %cst_19 [1] : vector<21x21xf32> to vector<21xf32>
    %32 = vector.shape_cast %31 : vector<21xf32> to vector<21x1xf32>
    %33 = vector.broadcast %32 : vector<21x1xf32> to vector<21x21xf32>
    %34 = arith.subf %30, %33 : vector<21x21xf32>
    %35 = math.exp %34 : vector<21x21xf32>
    %cst_20 = arith.constant dense<0.000000e+00> : vector<21xf32>
    %36 = vector.multi_reduction <add>, %35, %cst_20 [1] : vector<21x21xf32> to vector<21xf32>
    %37 = vector.shape_cast %36 : vector<21xf32> to vector<21x1xf32>
    %38 = tpu.reciprocal %37 {approx = true} : vector<21x1xf32> -> vector<21x1xf32>
    %39 = vector.broadcast %38 : vector<21x1xf32> to vector<21x21xf32>
    %40 = arith.mulf %35, %39 : vector<21x21xf32>
    %41 = arith.truncf %40 : vector<21x21xf32> to vector<21x21xbf16>
    %cst_21 = arith.constant dense<0.000000e+00> : vector<21x8xf32>
    %42 = tpu.matmul %41, %29, %cst_21 {dimension_numbers = #tpu.dot_dimension_numbers<[1], [0], [0], [1], [0, 0, 1, 1], [], []>} : vector<21x21xbf16>, vector<21x8xbf16>, vector<21x8xf32> -> vector<21x8xf32>
    %43 = arith.truncf %42 : vector<21x8xf32> to vector<21x8xbf16>
    %c0_22 = arith.constant 0 : index
    %c8_23 = arith.constant 8 : index
    %44 = vector.load %arg8[%c0_22, %c8_23] : memref<21x32xbf16, #tpu.memory_space<vmem>>, vector<21x8xbf16>
    tpu.vector_store %arg8[%c0_22, %c8_23], %43 {strides = array<i32>} : memref<21x32xbf16, #tpu.memory_space<vmem>>, vector<21x8xbf16>,
    %c0_24 = arith.constant 0 : index
    %c0_25 = arith.constant 0 : index
    %c16 = arith.constant 16 : index
    %45 = vector.load %arg2[%c0_24, %c0_25, %c16] : memref<1x21x96xbf16, #tpu.memory_space<vmem>>, vector<1x21x8xbf16>
    %46 = vector.shape_cast %45 : vector<1x21x8xbf16> to vector<21x8xbf16>
    %c0_26 = arith.constant 0 : index
    %c0_27 = arith.constant 0 : index
    %c48 = arith.constant 48 : index
    %47 = vector.load %arg2[%c0_26, %c0_27, %c48] : memref<1x21x96xbf16, #tpu.memory_space<vmem>>, vector<1x21x8xbf16>
    %48 = vector.shape_cast %47 : vector<1x21x8xbf16> to vector<21x8xbf16>
    %c0_28 = arith.constant 0 : index
    %c0_29 = arith.constant 0 : index
    %c80 = arith.constant 80 : index
    %49 = vector.load %arg2[%c0_28, %c0_29, %c80] : memref<1x21x96xbf16, #tpu.memory_space<vmem>>, vector<1x21x8xbf16>
    %50 = vector.shape_cast %49 : vector<1x21x8xbf16> to vector<21x8xbf16>
    %cst_30 = arith.constant dense<0.000000e+00> : vector<21x21xf32>
    %51 = tpu.matmul %46, %48, %cst_30 {dimension_numbers = #tpu.dot_dimension_numbers<[1], [1], [0], [0], [0, 0, 1, 0], [], []>} : vector<21x8xbf16>, vector<21x8xbf16>, vector<21x21xf32> -> vector<21x21xf32>
    %cst_31 = arith.constant dense<0xFF800000> : vector<21xf32>
    %52 = vector.multi_reduction <maximumf>, %51, %cst_31 [1] : vector<21x21xf32> to vector<21xf32>
    %53 = vector.shape_cast %52 : vector<21xf32> to vector<21x1xf32>
    %54 = vector.broadcast %53 : vector<21x1xf32> to vector<21x21xf32>
    %55 = arith.subf %51, %54 : vector<21x21xf32>
    %56 = math.exp %55 : vector<21x21xf32>
    %cst_32 = arith.constant dense<0.000000e+00> : vector<21xf32>
    %57 = vector.multi_reduction <add>, %56, %cst_32 [1] : vector<21x21xf32> to vector<21xf32>
    %58 = vector.shape_cast %57 : vector<21xf32> to vector<21x1xf32>
    %59 = tpu.reciprocal %58 {approx = true} : vector<21x1xf32> -> vector<21x1xf32>
    %60 = vector.broadcast %59 : vector<21x1xf32> to vector<21x21xf32>
    %61 = arith.mulf %56, %60 : vector<21x21xf32>
    %62 = arith.truncf %61 : vector<21x21xf32> to vector<21x21xbf16>
    %cst_33 = arith.constant dense<0.000000e+00> : vector<21x8xf32>
    %63 = tpu.matmul %62, %50, %cst_33 {dimension_numbers = #tpu.dot_dimension_numbers<[1], [0], [0], [1], [0, 0, 1, 1], [], []>} : vector<21x21xbf16>, vector<21x8xbf16>, vector<21x8xf32> -> vector<21x8xf32>
    %64 = arith.truncf %63 : vector<21x8xf32> to vector<21x8xbf16>
    %c0_34 = arith.constant 0 : index
    %c16_35 = arith.constant 16 : index
    %65 = vector.load %arg8[%c0_34, %c16_35] : memref<21x32xbf16, #tpu.memory_space<vmem>>, vector<21x8xbf16>
    tpu.vector_store %arg8[%c0_34, %c16_35], %64 {strides = array<i32>} : memref<21x32xbf16, #tpu.memory_space<vmem>>, vector<21x8xbf16>,
    %c0_36 = arith.constant 0 : index
    %c0_37 = arith.constant 0 : index
    %c24 = arith.constant 24 : index
    %66 = vector.load %arg2[%c0_36, %c0_37, %c24] : memref<1x21x96xbf16, #tpu.memory_space<vmem>>, vector<1x21x8xbf16>
    %67 = vector.shape_cast %66 : vector<1x21x8xbf16> to vector<21x8xbf16>
    %c0_38 = arith.constant 0 : index
    %c0_39 = arith.constant 0 : index
    %c56 = arith.constant 56 : index
    %68 = vector.load %arg2[%c0_38, %c0_39, %c56] : memref<1x21x96xbf16, #tpu.memory_space<vmem>>, vector<1x21x8xbf16>
    %69 = vector.shape_cast %68 : vector<1x21x8xbf16> to vector<21x8xbf16>
    %c0_40 = arith.constant 0 : index
    %c0_41 = arith.constant 0 : index
    %c88 = arith.constant 88 : index
    %70 = vector.load %arg2[%c0_40, %c0_41, %c88] : memref<1x21x96xbf16, #tpu.memory_space<vmem>>, vector<1x21x8xbf16>
    %71 = vector.shape_cast %70 : vector<1x21x8xbf16> to vector<21x8xbf16>
    %cst_42 = arith.constant dense<0.000000e+00> : vector<21x21xf32>
    %72 = tpu.matmul %67, %69, %cst_42 {dimension_numbers = #tpu.dot_dimension_numbers<[1], [1], [0], [0], [0, 0, 1, 0], [], []>} : vector<21x8xbf16>, vector<21x8xbf16>, vector<21x21xf32> -> vector<21x21xf32>
    %cst_43 = arith.constant dense<0xFF800000> : vector<21xf32>
    %73 = vector.multi_reduction <maximumf>, %72, %cst_43 [1] : vector<21x21xf32> to vector<21xf32>
    %74 = vector.shape_cast %73 : vector<21xf32> to vector<21x1xf32>
    %75 = vector.broadcast %74 : vector<21x1xf32> to vector<21x21xf32>
    %76 = arith.subf %72, %75 : vector<21x21xf32>
    %77 = math.exp %76 : vector<21x21xf32>
    %cst_44 = arith.constant dense<0.000000e+00> : vector<21xf32>
    %78 = vector.multi_reduction <add>, %77, %cst_44 [1] : vector<21x21xf32> to vector<21xf32>
    %79 = vector.shape_cast %78 : vector<21xf32> to vector<21x1xf32>
    %80 = tpu.reciprocal %79 {approx = true} : vector<21x1xf32> -> vector<21x1xf32>
    %81 = vector.broadcast %80 : vector<21x1xf32> to vector<21x21xf32>
    %82 = arith.mulf %77, %81 : vector<21x21xf32>
    %83 = arith.truncf %82 : vector<21x21xf32> to vector<21x21xbf16>
    %cst_45 = arith.constant dense<0.000000e+00> : vector<21x8xf32>
    %84 = tpu.matmul %83, %71, %cst_45 {dimension_numbers = #tpu.dot_dimension_numbers<[1], [0], [0], [1], [0, 0, 1, 1], [], []>} : vector<21x21xbf16>, vector<21x8xbf16>, vector<21x8xf32> -> vector<21x8xf32>
    %85 = arith.truncf %84 : vector<21x8xf32> to vector<21x8xbf16>
    %c0_46 = arith.constant 0 : index
    %c24_47 = arith.constant 24 : index
    %86 = vector.load %arg8[%c0_46, %c24_47] : memref<21x32xbf16, #tpu.memory_space<vmem>>, vector<21x8xbf16>
    tpu.vector_store %arg8[%c0_46, %c24_47], %85 {strides = array<i32>} : memref<21x32xbf16, #tpu.memory_space<vmem>>, vector<21x8xbf16>,
    %c0_48 = arith.constant 0 : index
    %c0_49 = arith.constant 0 : index
    %87 = vector.load %arg7[%c0_48, %c0_49] : memref<21x32xf32, #tpu.memory_space<vmem>>, vector<21x32xf32>
    %c0_50 = arith.constant 0 : index
    %c0_51 = arith.constant 0 : index
    %88 = vector.load %arg8[%c0_50, %c0_51] : memref<21x32xbf16, #tpu.memory_space<vmem>>, vector<21x32xbf16>
    %c0_52 = arith.constant 0 : index
    %c0_53 = arith.constant 0 : index
    %89 = vector.load %arg4[%c0_52, %c0_53] : memref<32x32xbf16, #tpu.memory_space<vmem>>, vector<32x32xbf16>
    %cst_54 = arith.constant dense<0.000000e+00> : vector<21x32xf32>
    %90 = tpu.matmul %88, %89, %cst_54 {dimension_numbers = #tpu.dot_dimension_numbers<[1], [0], [0], [1], [0, 0, 1, 1], [], []>} : vector<21x32xbf16>, vector<32x32xbf16>, vector<21x32xf32> -> vector<21x32xf32>
    %91 = arith.addf %87, %90 : vector<21x32xf32>
    %c0_55 = arith.constant 0 : index
    %c0_56 = arith.constant 0 : index
    %92 = vector.load %arg7[%c0_55, %c0_56] : memref<21x32xf32, #tpu.memory_space<vmem>>, vector<21x32xf32>
    tpu.vector_store %arg7[%c0_55, %c0_56], %91 {strides = array<i32>} : memref<21x32xf32, #tpu.memory_space<vmem>>, vector<21x32xf32>,
    %c0_i32_57 = arith.constant 0 : i32
    %93 = arith.cmpi eq, %arg1, %c0_i32_57 : i32
    %94 = arith.extui %93 : i1 to i32
    %c0_i32_58 = arith.constant 0 : i32
    %95 = arith.cmpi ne, %94, %c0_i32_58 : i32
    scf.if %95 {
      %c0_59 = arith.constant 0 : index
      %c0_60 = arith.constant 0 : index
      %96 = vector.load %arg7[%c0_59, %c0_60] : memref<21x32xf32, #tpu.memory_space<vmem>>, vector<21x32xf32>
      %c0_61 = arith.constant 0 : index
      %c0_62 = arith.constant 0 : index
      %97 = vector.load %arg5[%c0_61, %c0_62] : memref<1x32xbf16, #tpu.memory_space<vmem>>, vector<1x32xbf16>
      %98 = arith.extf %97 : vector<1x32xbf16> to vector<1x32xf32>
      %99 = vector.broadcast %98 : vector<1x32xf32> to vector<21x32xf32>
      %100 = arith.addf %96, %99 : vector<21x32xf32>
      %c0_63 = arith.constant 0 : index
      %c0_64 = arith.constant 0 : index
      %c0_65 = arith.constant 0 : index
      %101 = vector.load %arg3[%c0_63, %c0_64, %c0_65] : memref<1x21x32xbf16, #tpu.memory_space<vmem>>, vector<1x21x32xbf16>
      %102 = vector.shape_cast %101 : vector<1x21x32xbf16> to vector<21x32xbf16>
      %103 = arith.extf %102 : vector<21x32xbf16> to vector<21x32xf32>
      %104 = arith.addf %100, %103 : vector<21x32xf32>
      %105 = arith.truncf %104 : vector<21x32xf32> to vector<21x32xbf16>
      %c0_66 = arith.constant 0 : index
      %c0_67 = arith.constant 0 : index
      %c0_68 = arith.constant 0 : index
      %106 = vector.load %arg6[%c0_66, %c0_67, %c0_68] : memref<1x21x32xbf16, #tpu.memory_space<vmem>>, vector<1x21x32xbf16>
      %107 = vector.shape_cast %106 : vector<1x21x32xbf16> to vector<21x32xbf16>
      %108 = vector.shape_cast %105 : vector<21x32xbf16> to vector<1x21x32xbf16>
      tpu.vector_store %arg6[%c0_66, %c0_67, %c0_68], %108 {strides = array<i32>} : memref<1x21x32xbf16, #tpu.memory_space<vmem>>, vector<1x21x32xbf16>,
    } else {
    }
    return
  }
  func.func @transform_0(%arg0: i32, %arg1: i32) -> (i32, i32, i32) {
    %c0_i32 = arith.constant 0 : i32
    %c0_i32_0 = arith.constant 0 : i32
    return %arg0, %c0_i32, %arg1 : i32, i32, i32
  }
  func.func @transform_1(%arg0: i32, %arg1: i32) -> (i32, i32, i32) {
    %c0_i32 = arith.constant 0 : i32
    %c0_i32_0 = arith.constant 0 : i32
    %c0_i32_1 = arith.constant 0 : i32
    return %arg0, %c0_i32, %c0_i32_0 : i32, i32, i32
  }
  func.func @transform_2(%arg0: i32, %arg1: i32) -> (i32, i32) {
    %c0_i32 = arith.constant 0 : i32
    %c0_i32_0 = arith.constant 0 : i32
    return %arg1, %c0_i32 : i32, i32
  }
  func.func @transform_3(%arg0: i32, %arg1: i32) -> (i32, i32) {
    %c0_i32 = arith.constant 0 : i32
    %c0_i32_0 = arith.constant 0 : i32
    %c0_i32_1 = arith.constant 0 : i32
    return %c0_i32, %c0_i32_0 : i32, i32
  }
  func.func @transform_4(%arg0: i32, %arg1: i32) -> (i32, i32, i32) {
    %c0_i32 = arith.constant 0 : i32
    %c0_i32_0 = arith.constant 0 : i32
    %c0_i32_1 = arith.constant 0 : i32
    return %arg0, %c0_i32, %c0_i32_0 : i32, i32, i32
  }
}

module attributes {stable_mosaic.version = 11 : i64} {
  func.func @_ln_mm_kernel(%arg0: i32, %arg1: i32, %arg2: memref<42x32xbf16, #tpu.memory_space<vmem>>, %arg3: memref<1x32xbf16, #tpu.memory_space<vmem>>, %arg4: memref<1x32xbf16, #tpu.memory_space<vmem>>, %arg5: memref<32x128xbf16, #tpu.memory_space<vmem>>, %arg6: memref<1x128xbf16, #tpu.memory_space<vmem>>, %arg7: memref<42x128xbf16, #tpu.memory_space<vmem>>, %arg8: memref<42x32xbf16, #tpu.memory_space<vmem>>) attributes {dimension_semantics = [#tpu.dimension_semantics<parallel>, #tpu.dimension_semantics<arbitrary>], iteration_bounds = array<i64: 1, 1>, scalar_prefetch = 0 : i64, scratch_operands = 1 : i64, tpu.core_type = #tpu.core_type<tc>, window_params = [{transform_indices = @transform_0, window_bounds = array<i64: 42, 32>}, {pipeline_mode = #tpu.pipeline_mode<synchronous>, transform_indices = @transform_1, window_bounds = array<i64: 1, 32>}, {pipeline_mode = #tpu.pipeline_mode<synchronous>, transform_indices = @transform_2, window_bounds = array<i64: 1, 32>}, {transform_indices = @transform_3, window_bounds = array<i64: 32, 128>}, {transform_indices = @transform_4, window_bounds = array<i64: 1, 128>}, {transform_indices = @transform_5, window_bounds = array<i64: 42, 128>}]} {
    %c0_i32 = arith.constant 0 : i32
    %0 = arith.cmpi eq, %arg1, %c0_i32 : i32
    %1 = arith.extui %0 : i1 to i32
    %c0_i32_0 = arith.constant 0 : i32
    %2 = arith.cmpi ne, %1, %c0_i32_0 : i32
    scf.if %2 {
      %c0_10 = arith.constant 0 : index
      %c0_11 = arith.constant 0 : index
      %20 = vector.load %arg2[%c0_10, %c0_11] : memref<42x32xbf16, #tpu.memory_space<vmem>>, vector<42x32xbf16>
      %21 = arith.extf %20 : vector<42x32xbf16> to vector<42x32xf32>
      %cst_12 = arith.constant dense<0.000000e+00> : vector<42xf32>
      %22 = vector.multi_reduction <add>, %21, %cst_12 [1] : vector<42x32xf32> to vector<42xf32>
      %23 = vector.shape_cast %22 : vector<42xf32> to vector<42x1xf32>
      %cst_13 = arith.constant 3.200000e+01 : f32
      %24 = vector.broadcast %cst_13 : f32 to vector<42x1xf32>
      %25 = arith.divf %23, %24 : vector<42x1xf32>
      %26 = vector.broadcast %25 : vector<42x1xf32> to vector<42x32xf32>
      %27 = arith.subf %21, %26 : vector<42x32xf32>
      %28 = arith.mulf %27, %27 : vector<42x32xf32>
      %cst_14 = arith.constant dense<0.000000e+00> : vector<42xf32>
      %29 = vector.multi_reduction <add>, %28, %cst_14 [1] : vector<42x32xf32> to vector<42xf32>
      %30 = vector.shape_cast %29 : vector<42xf32> to vector<42x1xf32>
      %cst_15 = arith.constant 3.200000e+01 : f32
      %31 = vector.broadcast %cst_15 : f32 to vector<42x1xf32>
      %32 = arith.divf %30, %31 : vector<42x1xf32>
      %33 = vector.broadcast %25 : vector<42x1xf32> to vector<42x32xf32>
      %34 = arith.subf %21, %33 : vector<42x32xf32>
      %cst_16 = arith.constant 9.99999974E-6 : f32
      %35 = vector.broadcast %cst_16 : f32 to vector<42x1xf32>
      %36 = arith.addf %32, %35 : vector<42x1xf32>
      %37 = math.rsqrt %36 : vector<42x1xf32>
      %38 = vector.broadcast %37 : vector<42x1xf32> to vector<42x32xf32>
      %39 = arith.mulf %34, %38 : vector<42x32xf32>
      %c0_17 = arith.constant 0 : index
      %c0_18 = arith.constant 0 : index
      %40 = vector.load %arg3[%c0_17, %c0_18] : memref<1x32xbf16, #tpu.memory_space<vmem>>, vector<1x32xbf16>
      %41 = arith.extf %40 : vector<1x32xbf16> to vector<1x32xf32>
      %42 = vector.broadcast %41 : vector<1x32xf32> to vector<42x32xf32>
      %43 = arith.mulf %39, %42 : vector<42x32xf32>
      %c0_19 = arith.constant 0 : index
      %c0_20 = arith.constant 0 : index
      %44 = vector.load %arg4[%c0_19, %c0_20] : memref<1x32xbf16, #tpu.memory_space<vmem>>, vector<1x32xbf16>
      %45 = arith.extf %44 : vector<1x32xbf16> to vector<1x32xf32>
      %46 = vector.broadcast %45 : vector<1x32xf32> to vector<42x32xf32>
      %47 = arith.addf %43, %46 : vector<42x32xf32>
      %48 = arith.truncf %47 : vector<42x32xf32> to vector<42x32xbf16>
      %c0_21 = arith.constant 0 : index
      %c0_22 = arith.constant 0 : index
      %49 = vector.load %arg8[%c0_21, %c0_22] : memref<42x32xbf16, #tpu.memory_space<vmem>>, vector<42x32xbf16>
      tpu.vector_store %arg8[%c0_21, %c0_22], %48 {strides = array<i32>} : memref<42x32xbf16, #tpu.memory_space<vmem>>, vector<42x32xbf16>,
    } else {
    }
    %c0 = arith.constant 0 : index
    %c0_1 = arith.constant 0 : index
    %3 = vector.load %arg8[%c0, %c0_1] : memref<42x32xbf16, #tpu.memory_space<vmem>>, vector<42x32xbf16>
    %c0_2 = arith.constant 0 : index
    %c0_3 = arith.constant 0 : index
    %4 = vector.load %arg5[%c0_2, %c0_3] : memref<32x128xbf16, #tpu.memory_space<vmem>>, vector<32x128xbf16>
    %cst = arith.constant dense<0.000000e+00> : vector<42x128xf32>
    %5 = tpu.matmul %3, %4, %cst {dimension_numbers = #tpu.dot_dimension_numbers<[1], [0], [0], [1], [0, 0, 1, 1], [], []>} : vector<42x32xbf16>, vector<32x128xbf16>, vector<42x128xf32> -> vector<42x128xf32>
    %c0_4 = arith.constant 0 : index
    %c0_5 = arith.constant 0 : index
    %6 = vector.load %arg6[%c0_4, %c0_5] : memref<1x128xbf16, #tpu.memory_space<vmem>>, vector<1x128xbf16>
    %7 = arith.extf %6 : vector<1x128xbf16> to vector<1x128xf32>
    %8 = vector.broadcast %7 : vector<1x128xf32> to vector<42x128xf32>
    %9 = arith.addf %5, %8 : vector<42x128xf32>
    %cst_6 = arith.constant 1.702000e+00 : f32
    %10 = vector.broadcast %cst_6 : f32 to vector<42x128xf32>
    %11 = arith.mulf %10, %9 : vector<42x128xf32>
    %12 = arith.negf %11 : vector<42x128xf32>
    %13 = math.exp %12 : vector<42x128xf32>
    %cst_7 = arith.constant 1.000000e+00 : f32
    %14 = vector.broadcast %cst_7 : f32 to vector<42x128xf32>
    %15 = arith.addf %14, %13 : vector<42x128xf32>
    %16 = arith.divf %14, %15 : vector<42x128xf32>
    %17 = arith.mulf %9, %16 : vector<42x128xf32>
    %18 = arith.truncf %17 : vector<42x128xf32> to vector<42x128xbf16>
    %c0_8 = arith.constant 0 : index
    %c0_9 = arith.constant 0 : index
    %19 = vector.load %arg7[%c0_8, %c0_9] : memref<42x128xbf16, #tpu.memory_space<vmem>>, vector<42x128xbf16>
    tpu.vector_store %arg7[%c0_8, %c0_9], %18 {strides = array<i32>} : memref<42x128xbf16, #tpu.memory_space<vmem>>, vector<42x128xbf16>,
    return
  }
  func.func @transform_0(%arg0: i32, %arg1: i32) -> (i32, i32) {
    %c0_i32 = arith.constant 0 : i32
    %c0_i32_0 = arith.constant 0 : i32
    return %arg0, %c0_i32 : i32, i32
  }
  func.func @transform_1(%arg0: i32, %arg1: i32) -> (i32, i32) {
    %c0_i32 = arith.constant 0 : i32
    %c0_i32_0 = arith.constant 0 : i32
    %c0_i32_1 = arith.constant 0 : i32
    return %c0_i32, %c0_i32_0 : i32, i32
  }
  func.func @transform_2(%arg0: i32, %arg1: i32) -> (i32, i32) {
    %c0_i32 = arith.constant 0 : i32
    %c0_i32_0 = arith.constant 0 : i32
    %c0_i32_1 = arith.constant 0 : i32
    return %c0_i32, %c0_i32_0 : i32, i32
  }
  func.func @transform_3(%arg0: i32, %arg1: i32) -> (i32, i32) {
    %c0_i32 = arith.constant 0 : i32
    %c0_i32_0 = arith.constant 0 : i32
    return %c0_i32, %arg1 : i32, i32
  }
  func.func @transform_4(%arg0: i32, %arg1: i32) -> (i32, i32) {
    %c0_i32 = arith.constant 0 : i32
    %c0_i32_0 = arith.constant 0 : i32
    return %c0_i32, %arg1 : i32, i32
  }
  func.func @transform_5(%arg0: i32, %arg1: i32) -> (i32, i32) {
    %c0_i32 = arith.constant 0 : i32
    return %arg0, %arg1 : i32, i32
  }
}

module attributes {stable_mosaic.version = 11 : i64} {
  func.func @_mm_single_kernel(%arg0: i32, %arg1: i32, %arg2: memref<42x128xbf16, #tpu.memory_space<vmem>>, %arg3: memref<128x32xbf16, #tpu.memory_space<vmem>>, %arg4: memref<1x32xbf16, #tpu.memory_space<vmem>>, %arg5: memref<42x32xbf16, #tpu.memory_space<vmem>>, %arg6: memref<42x32xbf16, #tpu.memory_space<vmem>>) attributes {dimension_semantics = [#tpu.dimension_semantics<parallel>, #tpu.dimension_semantics<parallel>], iteration_bounds = array<i64: 1, 1>, scalar_prefetch = 0 : i64, scratch_operands = 0 : i64, tpu.core_type = #tpu.core_type<tc>, window_params = [{transform_indices = @transform_0, window_bounds = array<i64: 42, 128>}, {transform_indices = @transform_1, window_bounds = array<i64: 128, 32>}, {transform_indices = @transform_2, window_bounds = array<i64: 1, 32>}, {transform_indices = @transform_3, window_bounds = array<i64: 42, 32>}, {transform_indices = @transform_4, window_bounds = array<i64: 42, 32>}]} {
    %c0 = arith.constant 0 : index
    %c0_0 = arith.constant 0 : index
    %0 = vector.load %arg2[%c0, %c0_0] : memref<42x128xbf16, #tpu.memory_space<vmem>>, vector<42x128xbf16>
    %c0_1 = arith.constant 0 : index
    %c0_2 = arith.constant 0 : index
    %1 = vector.load %arg3[%c0_1, %c0_2] : memref<128x32xbf16, #tpu.memory_space<vmem>>, vector<128x32xbf16>
    %cst = arith.constant dense<0.000000e+00> : vector<42x32xf32>
    %2 = tpu.matmul %0, %1, %cst {dimension_numbers = #tpu.dot_dimension_numbers<[1], [0], [0], [1], [0, 0, 1, 1], [], []>} : vector<42x128xbf16>, vector<128x32xbf16>, vector<42x32xf32> -> vector<42x32xf32>
    %c0_3 = arith.constant 0 : index
    %c0_4 = arith.constant 0 : index
    %3 = vector.load %arg4[%c0_3, %c0_4] : memref<1x32xbf16, #tpu.memory_space<vmem>>, vector<1x32xbf16>
    %4 = arith.extf %3 : vector<1x32xbf16> to vector<1x32xf32>
    %5 = vector.broadcast %4 : vector<1x32xf32> to vector<42x32xf32>
    %6 = arith.addf %2, %5 : vector<42x32xf32>
    %c0_5 = arith.constant 0 : index
    %c0_6 = arith.constant 0 : index
    %7 = vector.load %arg5[%c0_5, %c0_6] : memref<42x32xbf16, #tpu.memory_space<vmem>>, vector<42x32xbf16>
    %8 = arith.extf %7 : vector<42x32xbf16> to vector<42x32xf32>
    %9 = arith.addf %6, %8 : vector<42x32xf32>
    %10 = arith.truncf %9 : vector<42x32xf32> to vector<42x32xbf16>
    %c0_7 = arith.constant 0 : index
    %c0_8 = arith.constant 0 : index
    %11 = vector.load %arg6[%c0_7, %c0_8] : memref<42x32xbf16, #tpu.memory_space<vmem>>, vector<42x32xbf16>
    tpu.vector_store %arg6[%c0_7, %c0_8], %10 {strides = array<i32>} : memref<42x32xbf16, #tpu.memory_space<vmem>>, vector<42x32xbf16>,
    return
  }
  func.func @transform_0(%arg0: i32, %arg1: i32) -> (i32, i32) {
    %c0_i32 = arith.constant 0 : i32
    %c0_i32_0 = arith.constant 0 : i32
    return %arg0, %c0_i32 : i32, i32
  }
  func.func @transform_1(%arg0: i32, %arg1: i32) -> (i32, i32) {
    %c0_i32 = arith.constant 0 : i32
    %c0_i32_0 = arith.constant 0 : i32
    return %c0_i32, %arg1 : i32, i32
  }
  func.func @transform_2(%arg0: i32, %arg1: i32) -> (i32, i32) {
    %c0_i32 = arith.constant 0 : i32
    %c0_i32_0 = arith.constant 0 : i32
    return %c0_i32, %arg1 : i32, i32
  }
  func.func @transform_3(%arg0: i32, %arg1: i32) -> (i32, i32) {
    %c0_i32 = arith.constant 0 : i32
    return %arg0, %arg1 : i32, i32
  }
  func.func @transform_4(%arg0: i32, %arg1: i32) -> (i32, i32) {
    %c0_i32 = arith.constant 0 : i32
    return %arg0, %arg1 : i32, i32
  }
}

module attributes {stable_mosaic.version = 11 : i64} {
  func.func @_mm_single_kernel(%arg0: i32, %arg1: i32, %arg2: memref<8x32xbf16, #tpu.memory_space<vmem>>, %arg3: memref<32x32xbf16, #tpu.memory_space<vmem>>, %arg4: memref<1x32xbf16, #tpu.memory_space<vmem>>, %arg5: memref<8x32xbf16, #tpu.memory_space<vmem>>) attributes {dimension_semantics = [#tpu.dimension_semantics<parallel>, #tpu.dimension_semantics<parallel>], iteration_bounds = array<i64: 1, 1>, scalar_prefetch = 0 : i64, scratch_operands = 0 : i64, tpu.core_type = #tpu.core_type<tc>, window_params = [{transform_indices = @transform_0, window_bounds = array<i64: 8, 32>}, {transform_indices = @transform_1, window_bounds = array<i64: 32, 32>}, {transform_indices = @transform_2, window_bounds = array<i64: 1, 32>}, {transform_indices = @transform_3, window_bounds = array<i64: 8, 32>}]} {
    %c0 = arith.constant 0 : index
    %c0_0 = arith.constant 0 : index
    %0 = vector.load %arg2[%c0, %c0_0] : memref<8x32xbf16, #tpu.memory_space<vmem>>, vector<8x32xbf16>
    %c0_1 = arith.constant 0 : index
    %c0_2 = arith.constant 0 : index
    %1 = vector.load %arg3[%c0_1, %c0_2] : memref<32x32xbf16, #tpu.memory_space<vmem>>, vector<32x32xbf16>
    %cst = arith.constant dense<0.000000e+00> : vector<8x32xf32>
    %2 = tpu.matmul %0, %1, %cst {dimension_numbers = #tpu.dot_dimension_numbers<[1], [0], [0], [1], [0, 0, 1, 1], [], []>} : vector<8x32xbf16>, vector<32x32xbf16>, vector<8x32xf32> -> vector<8x32xf32>
    %c0_3 = arith.constant 0 : index
    %c0_4 = arith.constant 0 : index
    %3 = vector.load %arg4[%c0_3, %c0_4] : memref<1x32xbf16, #tpu.memory_space<vmem>>, vector<1x32xbf16>
    %4 = arith.extf %3 : vector<1x32xbf16> to vector<1x32xf32>
    %5 = vector.broadcast %4 : vector<1x32xf32> to vector<8x32xf32>
    %6 = arith.addf %2, %5 : vector<8x32xf32>
    %7 = arith.truncf %6 : vector<8x32xf32> to vector<8x32xbf16>
    %c0_5 = arith.constant 0 : index
    %c0_6 = arith.constant 0 : index
    %8 = vector.load %arg5[%c0_5, %c0_6] : memref<8x32xbf16, #tpu.memory_space<vmem>>, vector<8x32xbf16>
    tpu.vector_store %arg5[%c0_5, %c0_6], %7 {strides = array<i32>} : memref<8x32xbf16, #tpu.memory_space<vmem>>, vector<8x32xbf16>,
    return
  }
  func.func @transform_0(%arg0: i32, %arg1: i32) -> (i32, i32) {
    %c0_i32 = arith.constant 0 : i32
    %c0_i32_0 = arith.constant 0 : i32
    return %arg0, %c0_i32 : i32, i32
  }
  func.func @transform_1(%arg0: i32, %arg1: i32) -> (i32, i32) {
    %c0_i32 = arith.constant 0 : i32
    %c0_i32_0 = arith.constant 0 : i32
    return %c0_i32, %arg1 : i32, i32
  }
  func.func @transform_2(%arg0: i32, %arg1: i32) -> (i32, i32) {
    %c0_i32 = arith.constant 0 : i32
    %c0_i32_0 = arith.constant 0 : i32
    return %c0_i32, %arg1 : i32, i32
  }
  func.func @transform_3(%arg0: i32, %arg1: i32) -> (i32, i32) {
    %c0_i32 = arith.constant 0 : i32
    return %arg0, %arg1 : i32, i32
  }
}

module attributes {stable_mosaic.version = 11 : i64} {
  func.func @_ln_mm_kernel(%arg0: i32, %arg1: i32, %arg2: memref<34x32xbf16, #tpu.memory_space<vmem>>, %arg3: memref<1x32xbf16, #tpu.memory_space<vmem>>, %arg4: memref<1x32xbf16, #tpu.memory_space<vmem>>, %arg5: memref<32x96xbf16, #tpu.memory_space<vmem>>, %arg6: memref<1x96xbf16, #tpu.memory_space<vmem>>, %arg7: memref<34x96xbf16, #tpu.memory_space<vmem>>, %arg8: memref<34x32xbf16, #tpu.memory_space<vmem>>) attributes {dimension_semantics = [#tpu.dimension_semantics<parallel>, #tpu.dimension_semantics<arbitrary>], iteration_bounds = array<i64: 1, 1>, scalar_prefetch = 0 : i64, scratch_operands = 1 : i64, tpu.core_type = #tpu.core_type<tc>, window_params = [{transform_indices = @transform_0, window_bounds = array<i64: 34, 32>}, {pipeline_mode = #tpu.pipeline_mode<synchronous>, transform_indices = @transform_1, window_bounds = array<i64: 1, 32>}, {pipeline_mode = #tpu.pipeline_mode<synchronous>, transform_indices = @transform_2, window_bounds = array<i64: 1, 32>}, {transform_indices = @transform_3, window_bounds = array<i64: 32, 96>}, {transform_indices = @transform_4, window_bounds = array<i64: 1, 96>}, {transform_indices = @transform_5, window_bounds = array<i64: 34, 96>}]} {
    %c0_i32 = arith.constant 0 : i32
    %0 = arith.cmpi eq, %arg1, %c0_i32 : i32
    %1 = arith.extui %0 : i1 to i32
    %c0_i32_0 = arith.constant 0 : i32
    %2 = arith.cmpi ne, %1, %c0_i32_0 : i32
    scf.if %2 {
      %c0_8 = arith.constant 0 : index
      %c0_9 = arith.constant 0 : index
      %12 = vector.load %arg2[%c0_8, %c0_9] : memref<34x32xbf16, #tpu.memory_space<vmem>>, vector<34x32xbf16>
      %13 = arith.extf %12 : vector<34x32xbf16> to vector<34x32xf32>
      %cst_10 = arith.constant dense<0.000000e+00> : vector<34xf32>
      %14 = vector.multi_reduction <add>, %13, %cst_10 [1] : vector<34x32xf32> to vector<34xf32>
      %15 = vector.shape_cast %14 : vector<34xf32> to vector<34x1xf32>
      %cst_11 = arith.constant 3.200000e+01 : f32
      %16 = vector.broadcast %cst_11 : f32 to vector<34x1xf32>
      %17 = arith.divf %15, %16 : vector<34x1xf32>
      %18 = vector.broadcast %17 : vector<34x1xf32> to vector<34x32xf32>
      %19 = arith.subf %13, %18 : vector<34x32xf32>
      %20 = arith.mulf %19, %19 : vector<34x32xf32>
      %cst_12 = arith.constant dense<0.000000e+00> : vector<34xf32>
      %21 = vector.multi_reduction <add>, %20, %cst_12 [1] : vector<34x32xf32> to vector<34xf32>
      %22 = vector.shape_cast %21 : vector<34xf32> to vector<34x1xf32>
      %cst_13 = arith.constant 3.200000e+01 : f32
      %23 = vector.broadcast %cst_13 : f32 to vector<34x1xf32>
      %24 = arith.divf %22, %23 : vector<34x1xf32>
      %25 = vector.broadcast %17 : vector<34x1xf32> to vector<34x32xf32>
      %26 = arith.subf %13, %25 : vector<34x32xf32>
      %cst_14 = arith.constant 9.99999974E-6 : f32
      %27 = vector.broadcast %cst_14 : f32 to vector<34x1xf32>
      %28 = arith.addf %24, %27 : vector<34x1xf32>
      %29 = math.rsqrt %28 : vector<34x1xf32>
      %30 = vector.broadcast %29 : vector<34x1xf32> to vector<34x32xf32>
      %31 = arith.mulf %26, %30 : vector<34x32xf32>
      %c0_15 = arith.constant 0 : index
      %c0_16 = arith.constant 0 : index
      %32 = vector.load %arg3[%c0_15, %c0_16] : memref<1x32xbf16, #tpu.memory_space<vmem>>, vector<1x32xbf16>
      %33 = arith.extf %32 : vector<1x32xbf16> to vector<1x32xf32>
      %34 = vector.broadcast %33 : vector<1x32xf32> to vector<34x32xf32>
      %35 = arith.mulf %31, %34 : vector<34x32xf32>
      %c0_17 = arith.constant 0 : index
      %c0_18 = arith.constant 0 : index
      %36 = vector.load %arg4[%c0_17, %c0_18] : memref<1x32xbf16, #tpu.memory_space<vmem>>, vector<1x32xbf16>
      %37 = arith.extf %36 : vector<1x32xbf16> to vector<1x32xf32>
      %38 = vector.broadcast %37 : vector<1x32xf32> to vector<34x32xf32>
      %39 = arith.addf %35, %38 : vector<34x32xf32>
      %40 = arith.truncf %39 : vector<34x32xf32> to vector<34x32xbf16>
      %c0_19 = arith.constant 0 : index
      %c0_20 = arith.constant 0 : index
      %41 = vector.load %arg8[%c0_19, %c0_20] : memref<34x32xbf16, #tpu.memory_space<vmem>>, vector<34x32xbf16>
      tpu.vector_store %arg8[%c0_19, %c0_20], %40 {strides = array<i32>} : memref<34x32xbf16, #tpu.memory_space<vmem>>, vector<34x32xbf16>,
    } else {
    }
    %c0 = arith.constant 0 : index
    %c0_1 = arith.constant 0 : index
    %3 = vector.load %arg8[%c0, %c0_1] : memref<34x32xbf16, #tpu.memory_space<vmem>>, vector<34x32xbf16>
    %c0_2 = arith.constant 0 : index
    %c0_3 = arith.constant 0 : index
    %4 = vector.load %arg5[%c0_2, %c0_3] : memref<32x96xbf16, #tpu.memory_space<vmem>>, vector<32x96xbf16>
    %cst = arith.constant dense<0.000000e+00> : vector<34x96xf32>
    %5 = tpu.matmul %3, %4, %cst {dimension_numbers = #tpu.dot_dimension_numbers<[1], [0], [0], [1], [0, 0, 1, 1], [], []>} : vector<34x32xbf16>, vector<32x96xbf16>, vector<34x96xf32> -> vector<34x96xf32>
    %c0_4 = arith.constant 0 : index
    %c0_5 = arith.constant 0 : index
    %6 = vector.load %arg6[%c0_4, %c0_5] : memref<1x96xbf16, #tpu.memory_space<vmem>>, vector<1x96xbf16>
    %7 = arith.extf %6 : vector<1x96xbf16> to vector<1x96xf32>
    %8 = vector.broadcast %7 : vector<1x96xf32> to vector<34x96xf32>
    %9 = arith.addf %5, %8 : vector<34x96xf32>
    %10 = arith.truncf %9 : vector<34x96xf32> to vector<34x96xbf16>
    %c0_6 = arith.constant 0 : index
    %c0_7 = arith.constant 0 : index
    %11 = vector.load %arg7[%c0_6, %c0_7] : memref<34x96xbf16, #tpu.memory_space<vmem>>, vector<34x96xbf16>
    tpu.vector_store %arg7[%c0_6, %c0_7], %10 {strides = array<i32>} : memref<34x96xbf16, #tpu.memory_space<vmem>>, vector<34x96xbf16>,
    return
  }
  func.func @transform_0(%arg0: i32, %arg1: i32) -> (i32, i32) {
    %c0_i32 = arith.constant 0 : i32
    %c0_i32_0 = arith.constant 0 : i32
    return %arg0, %c0_i32 : i32, i32
  }
  func.func @transform_1(%arg0: i32, %arg1: i32) -> (i32, i32) {
    %c0_i32 = arith.constant 0 : i32
    %c0_i32_0 = arith.constant 0 : i32
    %c0_i32_1 = arith.constant 0 : i32
    return %c0_i32, %c0_i32_0 : i32, i32
  }
  func.func @transform_2(%arg0: i32, %arg1: i32) -> (i32, i32) {
    %c0_i32 = arith.constant 0 : i32
    %c0_i32_0 = arith.constant 0 : i32
    %c0_i32_1 = arith.constant 0 : i32
    return %c0_i32, %c0_i32_0 : i32, i32
  }
  func.func @transform_3(%arg0: i32, %arg1: i32) -> (i32, i32) {
    %c0_i32 = arith.constant 0 : i32
    %c0_i32_0 = arith.constant 0 : i32
    return %c0_i32, %arg1 : i32, i32
  }
  func.func @transform_4(%arg0: i32, %arg1: i32) -> (i32, i32) {
    %c0_i32 = arith.constant 0 : i32
    %c0_i32_0 = arith.constant 0 : i32
    return %c0_i32, %arg1 : i32, i32
  }
  func.func @transform_5(%arg0: i32, %arg1: i32) -> (i32, i32) {
    %c0_i32 = arith.constant 0 : i32
    return %arg0, %arg1 : i32, i32
  }
}

module attributes {stable_mosaic.version = 11 : i64} {
  func.func @_attn_outproj_kernel(%arg0: i32, %arg1: i32, %arg2: memref<1x17x96xbf16, #tpu.memory_space<vmem>>, %arg3: memref<1x17x32xbf16, #tpu.memory_space<vmem>>, %arg4: memref<32x32xbf16, #tpu.memory_space<vmem>>, %arg5: memref<1x32xbf16, #tpu.memory_space<vmem>>, %arg6: memref<1x17x32xbf16, #tpu.memory_space<vmem>>, %arg7: memref<17x32xf32, #tpu.memory_space<vmem>>, %arg8: memref<17x32xbf16, #tpu.memory_space<vmem>>) attributes {dimension_semantics = [#tpu.dimension_semantics<parallel>, #tpu.dimension_semantics<arbitrary>], iteration_bounds = array<i64: 2, 1>, scalar_prefetch = 0 : i64, scratch_operands = 2 : i64, tpu.core_type = #tpu.core_type<tc>, window_params = [{transform_indices = @transform_0, window_bounds = array<i64: 1, 17, 96>}, {transform_indices = @transform_1, window_bounds = array<i64: 1, 17, 32>}, {transform_indices = @transform_2, window_bounds = array<i64: 32, 32>}, {pipeline_mode = #tpu.pipeline_mode<synchronous>, transform_indices = @transform_3, window_bounds = array<i64: 1, 32>}, {transform_indices = @transform_4, window_bounds = array<i64: 1, 17, 32>}]} {
    %c0_i32 = arith.constant 0 : i32
    %0 = arith.cmpi eq, %arg1, %c0_i32 : i32
    %1 = arith.extui %0 : i1 to i32
    %c0_i32_0 = arith.constant 0 : i32
    %2 = arith.cmpi ne, %1, %c0_i32_0 : i32
    scf.if %2 {
      %cst_59 = arith.constant 0.000000e+00 : f32
      %96 = vector.broadcast %cst_59 : f32 to vector<17x32xf32>
      %c0_60 = arith.constant 0 : index
      %c0_61 = arith.constant 0 : index
      %97 = vector.load %arg7[%c0_60, %c0_61] : memref<17x32xf32, #tpu.memory_space<vmem>>, vector<17x32xf32>
      tpu.vector_store %arg7[%c0_60, %c0_61], %96 {strides = array<i32>} : memref<17x32xf32, #tpu.memory_space<vmem>>, vector<17x32xf32>,
    } else {
    }
    %c0 = arith.constant 0 : index
    %c0_1 = arith.constant 0 : index
    %c0_2 = arith.constant 0 : index
    %3 = vector.load %arg2[%c0, %c0_1, %c0_2] : memref<1x17x96xbf16, #tpu.memory_space<vmem>>, vector<1x17x8xbf16>
    %4 = vector.shape_cast %3 : vector<1x17x8xbf16> to vector<17x8xbf16>
    %c0_3 = arith.constant 0 : index
    %c0_4 = arith.constant 0 : index
    %c32 = arith.constant 32 : index
    %5 = vector.load %arg2[%c0_3, %c0_4, %c32] : memref<1x17x96xbf16, #tpu.memory_space<vmem>>, vector<1x17x8xbf16>
    %6 = vector.shape_cast %5 : vector<1x17x8xbf16> to vector<17x8xbf16>
    %c0_5 = arith.constant 0 : index
    %c0_6 = arith.constant 0 : index
    %c64 = arith.constant 64 : index
    %7 = vector.load %arg2[%c0_5, %c0_6, %c64] : memref<1x17x96xbf16, #tpu.memory_space<vmem>>, vector<1x17x8xbf16>
    %8 = vector.shape_cast %7 : vector<1x17x8xbf16> to vector<17x8xbf16>
    %cst = arith.constant dense<0.000000e+00> : vector<17x17xf32>
    %9 = tpu.matmul %4, %6, %cst {dimension_numbers = #tpu.dot_dimension_numbers<[1], [1], [0], [0], [0, 0, 1, 0], [], []>} : vector<17x8xbf16>, vector<17x8xbf16>, vector<17x17xf32> -> vector<17x17xf32>
    %cst_7 = arith.constant dense<0xFF800000> : vector<17xf32>
    %10 = vector.multi_reduction <maximumf>, %9, %cst_7 [1] : vector<17x17xf32> to vector<17xf32>
    %11 = vector.shape_cast %10 : vector<17xf32> to vector<17x1xf32>
    %12 = vector.broadcast %11 : vector<17x1xf32> to vector<17x17xf32>
    %13 = arith.subf %9, %12 : vector<17x17xf32>
    %14 = math.exp %13 : vector<17x17xf32>
    %cst_8 = arith.constant dense<0.000000e+00> : vector<17xf32>
    %15 = vector.multi_reduction <add>, %14, %cst_8 [1] : vector<17x17xf32> to vector<17xf32>
    %16 = vector.shape_cast %15 : vector<17xf32> to vector<17x1xf32>
    %17 = tpu.reciprocal %16 {approx = true} : vector<17x1xf32> -> vector<17x1xf32>
    %18 = vector.broadcast %17 : vector<17x1xf32> to vector<17x17xf32>
    %19 = arith.mulf %14, %18 : vector<17x17xf32>
    %20 = arith.truncf %19 : vector<17x17xf32> to vector<17x17xbf16>
    %cst_9 = arith.constant dense<0.000000e+00> : vector<17x8xf32>
    %21 = tpu.matmul %20, %8, %cst_9 {dimension_numbers = #tpu.dot_dimension_numbers<[1], [0], [0], [1], [0, 0, 1, 1], [], []>} : vector<17x17xbf16>, vector<17x8xbf16>, vector<17x8xf32> -> vector<17x8xf32>
    %22 = arith.truncf %21 : vector<17x8xf32> to vector<17x8xbf16>
    %c0_10 = arith.constant 0 : index
    %c0_11 = arith.constant 0 : index
    %23 = vector.load %arg8[%c0_10, %c0_11] : memref<17x32xbf16, #tpu.memory_space<vmem>>, vector<17x8xbf16>
    tpu.vector_store %arg8[%c0_10, %c0_11], %22 {strides = array<i32>} : memref<17x32xbf16, #tpu.memory_space<vmem>>, vector<17x8xbf16>,
    %c0_12 = arith.constant 0 : index
    %c0_13 = arith.constant 0 : index
    %c8 = arith.constant 8 : index
    %24 = vector.load %arg2[%c0_12, %c0_13, %c8] : memref<1x17x96xbf16, #tpu.memory_space<vmem>>, vector<1x17x8xbf16>
    %25 = vector.shape_cast %24 : vector<1x17x8xbf16> to vector<17x8xbf16>
    %c0_14 = arith.constant 0 : index
    %c0_15 = arith.constant 0 : index
    %c40 = arith.constant 40 : index
    %26 = vector.load %arg2[%c0_14, %c0_15, %c40] : memref<1x17x96xbf16, #tpu.memory_space<vmem>>, vector<1x17x8xbf16>
    %27 = vector.shape_cast %26 : vector<1x17x8xbf16> to vector<17x8xbf16>
    %c0_16 = arith.constant 0 : index
    %c0_17 = arith.constant 0 : index
    %c72 = arith.constant 72 : index
    %28 = vector.load %arg2[%c0_16, %c0_17, %c72] : memref<1x17x96xbf16, #tpu.memory_space<vmem>>, vector<1x17x8xbf16>
    %29 = vector.shape_cast %28 : vector<1x17x8xbf16> to vector<17x8xbf16>
    %cst_18 = arith.constant dense<0.000000e+00> : vector<17x17xf32>
    %30 = tpu.matmul %25, %27, %cst_18 {dimension_numbers = #tpu.dot_dimension_numbers<[1], [1], [0], [0], [0, 0, 1, 0], [], []>} : vector<17x8xbf16>, vector<17x8xbf16>, vector<17x17xf32> -> vector<17x17xf32>
    %cst_19 = arith.constant dense<0xFF800000> : vector<17xf32>
    %31 = vector.multi_reduction <maximumf>, %30, %cst_19 [1] : vector<17x17xf32> to vector<17xf32>
    %32 = vector.shape_cast %31 : vector<17xf32> to vector<17x1xf32>
    %33 = vector.broadcast %32 : vector<17x1xf32> to vector<17x17xf32>
    %34 = arith.subf %30, %33 : vector<17x17xf32>
    %35 = math.exp %34 : vector<17x17xf32>
    %cst_20 = arith.constant dense<0.000000e+00> : vector<17xf32>
    %36 = vector.multi_reduction <add>, %35, %cst_20 [1] : vector<17x17xf32> to vector<17xf32>
    %37 = vector.shape_cast %36 : vector<17xf32> to vector<17x1xf32>
    %38 = tpu.reciprocal %37 {approx = true} : vector<17x1xf32> -> vector<17x1xf32>
    %39 = vector.broadcast %38 : vector<17x1xf32> to vector<17x17xf32>
    %40 = arith.mulf %35, %39 : vector<17x17xf32>
    %41 = arith.truncf %40 : vector<17x17xf32> to vector<17x17xbf16>
    %cst_21 = arith.constant dense<0.000000e+00> : vector<17x8xf32>
    %42 = tpu.matmul %41, %29, %cst_21 {dimension_numbers = #tpu.dot_dimension_numbers<[1], [0], [0], [1], [0, 0, 1, 1], [], []>} : vector<17x17xbf16>, vector<17x8xbf16>, vector<17x8xf32> -> vector<17x8xf32>
    %43 = arith.truncf %42 : vector<17x8xf32> to vector<17x8xbf16>
    %c0_22 = arith.constant 0 : index
    %c8_23 = arith.constant 8 : index
    %44 = vector.load %arg8[%c0_22, %c8_23] : memref<17x32xbf16, #tpu.memory_space<vmem>>, vector<17x8xbf16>
    tpu.vector_store %arg8[%c0_22, %c8_23], %43 {strides = array<i32>} : memref<17x32xbf16, #tpu.memory_space<vmem>>, vector<17x8xbf16>,
    %c0_24 = arith.constant 0 : index
    %c0_25 = arith.constant 0 : index
    %c16 = arith.constant 16 : index
    %45 = vector.load %arg2[%c0_24, %c0_25, %c16] : memref<1x17x96xbf16, #tpu.memory_space<vmem>>, vector<1x17x8xbf16>
    %46 = vector.shape_cast %45 : vector<1x17x8xbf16> to vector<17x8xbf16>
    %c0_26 = arith.constant 0 : index
    %c0_27 = arith.constant 0 : index
    %c48 = arith.constant 48 : index
    %47 = vector.load %arg2[%c0_26, %c0_27, %c48] : memref<1x17x96xbf16, #tpu.memory_space<vmem>>, vector<1x17x8xbf16>
    %48 = vector.shape_cast %47 : vector<1x17x8xbf16> to vector<17x8xbf16>
    %c0_28 = arith.constant 0 : index
    %c0_29 = arith.constant 0 : index
    %c80 = arith.constant 80 : index
    %49 = vector.load %arg2[%c0_28, %c0_29, %c80] : memref<1x17x96xbf16, #tpu.memory_space<vmem>>, vector<1x17x8xbf16>
    %50 = vector.shape_cast %49 : vector<1x17x8xbf16> to vector<17x8xbf16>
    %cst_30 = arith.constant dense<0.000000e+00> : vector<17x17xf32>
    %51 = tpu.matmul %46, %48, %cst_30 {dimension_numbers = #tpu.dot_dimension_numbers<[1], [1], [0], [0], [0, 0, 1, 0], [], []>} : vector<17x8xbf16>, vector<17x8xbf16>, vector<17x17xf32> -> vector<17x17xf32>
    %cst_31 = arith.constant dense<0xFF800000> : vector<17xf32>
    %52 = vector.multi_reduction <maximumf>, %51, %cst_31 [1] : vector<17x17xf32> to vector<17xf32>
    %53 = vector.shape_cast %52 : vector<17xf32> to vector<17x1xf32>
    %54 = vector.broadcast %53 : vector<17x1xf32> to vector<17x17xf32>
    %55 = arith.subf %51, %54 : vector<17x17xf32>
    %56 = math.exp %55 : vector<17x17xf32>
    %cst_32 = arith.constant dense<0.000000e+00> : vector<17xf32>
    %57 = vector.multi_reduction <add>, %56, %cst_32 [1] : vector<17x17xf32> to vector<17xf32>
    %58 = vector.shape_cast %57 : vector<17xf32> to vector<17x1xf32>
    %59 = tpu.reciprocal %58 {approx = true} : vector<17x1xf32> -> vector<17x1xf32>
    %60 = vector.broadcast %59 : vector<17x1xf32> to vector<17x17xf32>
    %61 = arith.mulf %56, %60 : vector<17x17xf32>
    %62 = arith.truncf %61 : vector<17x17xf32> to vector<17x17xbf16>
    %cst_33 = arith.constant dense<0.000000e+00> : vector<17x8xf32>
    %63 = tpu.matmul %62, %50, %cst_33 {dimension_numbers = #tpu.dot_dimension_numbers<[1], [0], [0], [1], [0, 0, 1, 1], [], []>} : vector<17x17xbf16>, vector<17x8xbf16>, vector<17x8xf32> -> vector<17x8xf32>
    %64 = arith.truncf %63 : vector<17x8xf32> to vector<17x8xbf16>
    %c0_34 = arith.constant 0 : index
    %c16_35 = arith.constant 16 : index
    %65 = vector.load %arg8[%c0_34, %c16_35] : memref<17x32xbf16, #tpu.memory_space<vmem>>, vector<17x8xbf16>
    tpu.vector_store %arg8[%c0_34, %c16_35], %64 {strides = array<i32>} : memref<17x32xbf16, #tpu.memory_space<vmem>>, vector<17x8xbf16>,
    %c0_36 = arith.constant 0 : index
    %c0_37 = arith.constant 0 : index
    %c24 = arith.constant 24 : index
    %66 = vector.load %arg2[%c0_36, %c0_37, %c24] : memref<1x17x96xbf16, #tpu.memory_space<vmem>>, vector<1x17x8xbf16>
    %67 = vector.shape_cast %66 : vector<1x17x8xbf16> to vector<17x8xbf16>
    %c0_38 = arith.constant 0 : index
    %c0_39 = arith.constant 0 : index
    %c56 = arith.constant 56 : index
    %68 = vector.load %arg2[%c0_38, %c0_39, %c56] : memref<1x17x96xbf16, #tpu.memory_space<vmem>>, vector<1x17x8xbf16>
    %69 = vector.shape_cast %68 : vector<1x17x8xbf16> to vector<17x8xbf16>
    %c0_40 = arith.constant 0 : index
    %c0_41 = arith.constant 0 : index
    %c88 = arith.constant 88 : index
    %70 = vector.load %arg2[%c0_40, %c0_41, %c88] : memref<1x17x96xbf16, #tpu.memory_space<vmem>>, vector<1x17x8xbf16>
    %71 = vector.shape_cast %70 : vector<1x17x8xbf16> to vector<17x8xbf16>
    %cst_42 = arith.constant dense<0.000000e+00> : vector<17x17xf32>
    %72 = tpu.matmul %67, %69, %cst_42 {dimension_numbers = #tpu.dot_dimension_numbers<[1], [1], [0], [0], [0, 0, 1, 0], [], []>} : vector<17x8xbf16>, vector<17x8xbf16>, vector<17x17xf32> -> vector<17x17xf32>
    %cst_43 = arith.constant dense<0xFF800000> : vector<17xf32>
    %73 = vector.multi_reduction <maximumf>, %72, %cst_43 [1] : vector<17x17xf32> to vector<17xf32>
    %74 = vector.shape_cast %73 : vector<17xf32> to vector<17x1xf32>
    %75 = vector.broadcast %74 : vector<17x1xf32> to vector<17x17xf32>
    %76 = arith.subf %72, %75 : vector<17x17xf32>
    %77 = math.exp %76 : vector<17x17xf32>
    %cst_44 = arith.constant dense<0.000000e+00> : vector<17xf32>
    %78 = vector.multi_reduction <add>, %77, %cst_44 [1] : vector<17x17xf32> to vector<17xf32>
    %79 = vector.shape_cast %78 : vector<17xf32> to vector<17x1xf32>
    %80 = tpu.reciprocal %79 {approx = true} : vector<17x1xf32> -> vector<17x1xf32>
    %81 = vector.broadcast %80 : vector<17x1xf32> to vector<17x17xf32>
    %82 = arith.mulf %77, %81 : vector<17x17xf32>
    %83 = arith.truncf %82 : vector<17x17xf32> to vector<17x17xbf16>
    %cst_45 = arith.constant dense<0.000000e+00> : vector<17x8xf32>
    %84 = tpu.matmul %83, %71, %cst_45 {dimension_numbers = #tpu.dot_dimension_numbers<[1], [0], [0], [1], [0, 0, 1, 1], [], []>} : vector<17x17xbf16>, vector<17x8xbf16>, vector<17x8xf32> -> vector<17x8xf32>
    %85 = arith.truncf %84 : vector<17x8xf32> to vector<17x8xbf16>
    %c0_46 = arith.constant 0 : index
    %c24_47 = arith.constant 24 : index
    %86 = vector.load %arg8[%c0_46, %c24_47] : memref<17x32xbf16, #tpu.memory_space<vmem>>, vector<17x8xbf16>
    tpu.vector_store %arg8[%c0_46, %c24_47], %85 {strides = array<i32>} : memref<17x32xbf16, #tpu.memory_space<vmem>>, vector<17x8xbf16>,
    %c0_48 = arith.constant 0 : index
    %c0_49 = arith.constant 0 : index
    %87 = vector.load %arg7[%c0_48, %c0_49] : memref<17x32xf32, #tpu.memory_space<vmem>>, vector<17x32xf32>
    %c0_50 = arith.constant 0 : index
    %c0_51 = arith.constant 0 : index
    %88 = vector.load %arg8[%c0_50, %c0_51] : memref<17x32xbf16, #tpu.memory_space<vmem>>, vector<17x32xbf16>
    %c0_52 = arith.constant 0 : index
    %c0_53 = arith.constant 0 : index
    %89 = vector.load %arg4[%c0_52, %c0_53] : memref<32x32xbf16, #tpu.memory_space<vmem>>, vector<32x32xbf16>
    %cst_54 = arith.constant dense<0.000000e+00> : vector<17x32xf32>
    %90 = tpu.matmul %88, %89, %cst_54 {dimension_numbers = #tpu.dot_dimension_numbers<[1], [0], [0], [1], [0, 0, 1, 1], [], []>} : vector<17x32xbf16>, vector<32x32xbf16>, vector<17x32xf32> -> vector<17x32xf32>
    %91 = arith.addf %87, %90 : vector<17x32xf32>
    %c0_55 = arith.constant 0 : index
    %c0_56 = arith.constant 0 : index
    %92 = vector.load %arg7[%c0_55, %c0_56] : memref<17x32xf32, #tpu.memory_space<vmem>>, vector<17x32xf32>
    tpu.vector_store %arg7[%c0_55, %c0_56], %91 {strides = array<i32>} : memref<17x32xf32, #tpu.memory_space<vmem>>, vector<17x32xf32>,
    %c0_i32_57 = arith.constant 0 : i32
    %93 = arith.cmpi eq, %arg1, %c0_i32_57 : i32
    %94 = arith.extui %93 : i1 to i32
    %c0_i32_58 = arith.constant 0 : i32
    %95 = arith.cmpi ne, %94, %c0_i32_58 : i32
    scf.if %95 {
      %c0_59 = arith.constant 0 : index
      %c0_60 = arith.constant 0 : index
      %96 = vector.load %arg7[%c0_59, %c0_60] : memref<17x32xf32, #tpu.memory_space<vmem>>, vector<17x32xf32>
      %c0_61 = arith.constant 0 : index
      %c0_62 = arith.constant 0 : index
      %97 = vector.load %arg5[%c0_61, %c0_62] : memref<1x32xbf16, #tpu.memory_space<vmem>>, vector<1x32xbf16>
      %98 = arith.extf %97 : vector<1x32xbf16> to vector<1x32xf32>
      %99 = vector.broadcast %98 : vector<1x32xf32> to vector<17x32xf32>
      %100 = arith.addf %96, %99 : vector<17x32xf32>
      %c0_63 = arith.constant 0 : index
      %c0_64 = arith.constant 0 : index
      %c0_65 = arith.constant 0 : index
      %101 = vector.load %arg3[%c0_63, %c0_64, %c0_65] : memref<1x17x32xbf16, #tpu.memory_space<vmem>>, vector<1x17x32xbf16>
      %102 = vector.shape_cast %101 : vector<1x17x32xbf16> to vector<17x32xbf16>
      %103 = arith.extf %102 : vector<17x32xbf16> to vector<17x32xf32>
      %104 = arith.addf %100, %103 : vector<17x32xf32>
      %105 = arith.truncf %104 : vector<17x32xf32> to vector<17x32xbf16>
      %c0_66 = arith.constant 0 : index
      %c0_67 = arith.constant 0 : index
      %c0_68 = arith.constant 0 : index
      %106 = vector.load %arg6[%c0_66, %c0_67, %c0_68] : memref<1x17x32xbf16, #tpu.memory_space<vmem>>, vector<1x17x32xbf16>
      %107 = vector.shape_cast %106 : vector<1x17x32xbf16> to vector<17x32xbf16>
      %108 = vector.shape_cast %105 : vector<17x32xbf16> to vector<1x17x32xbf16>
      tpu.vector_store %arg6[%c0_66, %c0_67, %c0_68], %108 {strides = array<i32>} : memref<1x17x32xbf16, #tpu.memory_space<vmem>>, vector<1x17x32xbf16>,
    } else {
    }
    return
  }
  func.func @transform_0(%arg0: i32, %arg1: i32) -> (i32, i32, i32) {
    %c0_i32 = arith.constant 0 : i32
    %c0_i32_0 = arith.constant 0 : i32
    return %arg0, %c0_i32, %arg1 : i32, i32, i32
  }
  func.func @transform_1(%arg0: i32, %arg1: i32) -> (i32, i32, i32) {
    %c0_i32 = arith.constant 0 : i32
    %c0_i32_0 = arith.constant 0 : i32
    %c0_i32_1 = arith.constant 0 : i32
    return %arg0, %c0_i32, %c0_i32_0 : i32, i32, i32
  }
  func.func @transform_2(%arg0: i32, %arg1: i32) -> (i32, i32) {
    %c0_i32 = arith.constant 0 : i32
    %c0_i32_0 = arith.constant 0 : i32
    return %arg1, %c0_i32 : i32, i32
  }
  func.func @transform_3(%arg0: i32, %arg1: i32) -> (i32, i32) {
    %c0_i32 = arith.constant 0 : i32
    %c0_i32_0 = arith.constant 0 : i32
    %c0_i32_1 = arith.constant 0 : i32
    return %c0_i32, %c0_i32_0 : i32, i32
  }
  func.func @transform_4(%arg0: i32, %arg1: i32) -> (i32, i32, i32) {
    %c0_i32 = arith.constant 0 : i32
    %c0_i32_0 = arith.constant 0 : i32
    %c0_i32_1 = arith.constant 0 : i32
    return %arg0, %c0_i32, %c0_i32_0 : i32, i32, i32
  }
}

module attributes {stable_mosaic.version = 11 : i64} {
  func.func @_ln_mm_kernel(%arg0: i32, %arg1: i32, %arg2: memref<34x32xbf16, #tpu.memory_space<vmem>>, %arg3: memref<1x32xbf16, #tpu.memory_space<vmem>>, %arg4: memref<1x32xbf16, #tpu.memory_space<vmem>>, %arg5: memref<32x128xbf16, #tpu.memory_space<vmem>>, %arg6: memref<1x128xbf16, #tpu.memory_space<vmem>>, %arg7: memref<34x128xbf16, #tpu.memory_space<vmem>>, %arg8: memref<34x32xbf16, #tpu.memory_space<vmem>>) attributes {dimension_semantics = [#tpu.dimension_semantics<parallel>, #tpu.dimension_semantics<arbitrary>], iteration_bounds = array<i64: 1, 1>, scalar_prefetch = 0 : i64, scratch_operands = 1 : i64, tpu.core_type = #tpu.core_type<tc>, window_params = [{transform_indices = @transform_0, window_bounds = array<i64: 34, 32>}, {pipeline_mode = #tpu.pipeline_mode<synchronous>, transform_indices = @transform_1, window_bounds = array<i64: 1, 32>}, {pipeline_mode = #tpu.pipeline_mode<synchronous>, transform_indices = @transform_2, window_bounds = array<i64: 1, 32>}, {transform_indices = @transform_3, window_bounds = array<i64: 32, 128>}, {transform_indices = @transform_4, window_bounds = array<i64: 1, 128>}, {transform_indices = @transform_5, window_bounds = array<i64: 34, 128>}]} {
    %c0_i32 = arith.constant 0 : i32
    %0 = arith.cmpi eq, %arg1, %c0_i32 : i32
    %1 = arith.extui %0 : i1 to i32
    %c0_i32_0 = arith.constant 0 : i32
    %2 = arith.cmpi ne, %1, %c0_i32_0 : i32
    scf.if %2 {
      %c0_10 = arith.constant 0 : index
      %c0_11 = arith.constant 0 : index
      %20 = vector.load %arg2[%c0_10, %c0_11] : memref<34x32xbf16, #tpu.memory_space<vmem>>, vector<34x32xbf16>
      %21 = arith.extf %20 : vector<34x32xbf16> to vector<34x32xf32>
      %cst_12 = arith.constant dense<0.000000e+00> : vector<34xf32>
      %22 = vector.multi_reduction <add>, %21, %cst_12 [1] : vector<34x32xf32> to vector<34xf32>
      %23 = vector.shape_cast %22 : vector<34xf32> to vector<34x1xf32>
      %cst_13 = arith.constant 3.200000e+01 : f32
      %24 = vector.broadcast %cst_13 : f32 to vector<34x1xf32>
      %25 = arith.divf %23, %24 : vector<34x1xf32>
      %26 = vector.broadcast %25 : vector<34x1xf32> to vector<34x32xf32>
      %27 = arith.subf %21, %26 : vector<34x32xf32>
      %28 = arith.mulf %27, %27 : vector<34x32xf32>
      %cst_14 = arith.constant dense<0.000000e+00> : vector<34xf32>
      %29 = vector.multi_reduction <add>, %28, %cst_14 [1] : vector<34x32xf32> to vector<34xf32>
      %30 = vector.shape_cast %29 : vector<34xf32> to vector<34x1xf32>
      %cst_15 = arith.constant 3.200000e+01 : f32
      %31 = vector.broadcast %cst_15 : f32 to vector<34x1xf32>
      %32 = arith.divf %30, %31 : vector<34x1xf32>
      %33 = vector.broadcast %25 : vector<34x1xf32> to vector<34x32xf32>
      %34 = arith.subf %21, %33 : vector<34x32xf32>
      %cst_16 = arith.constant 9.99999974E-6 : f32
      %35 = vector.broadcast %cst_16 : f32 to vector<34x1xf32>
      %36 = arith.addf %32, %35 : vector<34x1xf32>
      %37 = math.rsqrt %36 : vector<34x1xf32>
      %38 = vector.broadcast %37 : vector<34x1xf32> to vector<34x32xf32>
      %39 = arith.mulf %34, %38 : vector<34x32xf32>
      %c0_17 = arith.constant 0 : index
      %c0_18 = arith.constant 0 : index
      %40 = vector.load %arg3[%c0_17, %c0_18] : memref<1x32xbf16, #tpu.memory_space<vmem>>, vector<1x32xbf16>
      %41 = arith.extf %40 : vector<1x32xbf16> to vector<1x32xf32>
      %42 = vector.broadcast %41 : vector<1x32xf32> to vector<34x32xf32>
      %43 = arith.mulf %39, %42 : vector<34x32xf32>
      %c0_19 = arith.constant 0 : index
      %c0_20 = arith.constant 0 : index
      %44 = vector.load %arg4[%c0_19, %c0_20] : memref<1x32xbf16, #tpu.memory_space<vmem>>, vector<1x32xbf16>
      %45 = arith.extf %44 : vector<1x32xbf16> to vector<1x32xf32>
      %46 = vector.broadcast %45 : vector<1x32xf32> to vector<34x32xf32>
      %47 = arith.addf %43, %46 : vector<34x32xf32>
      %48 = arith.truncf %47 : vector<34x32xf32> to vector<34x32xbf16>
      %c0_21 = arith.constant 0 : index
      %c0_22 = arith.constant 0 : index
      %49 = vector.load %arg8[%c0_21, %c0_22] : memref<34x32xbf16, #tpu.memory_space<vmem>>, vector<34x32xbf16>
      tpu.vector_store %arg8[%c0_21, %c0_22], %48 {strides = array<i32>} : memref<34x32xbf16, #tpu.memory_space<vmem>>, vector<34x32xbf16>,
    } else {
    }
    %c0 = arith.constant 0 : index
    %c0_1 = arith.constant 0 : index
    %3 = vector.load %arg8[%c0, %c0_1] : memref<34x32xbf16, #tpu.memory_space<vmem>>, vector<34x32xbf16>
    %c0_2 = arith.constant 0 : index
    %c0_3 = arith.constant 0 : index
    %4 = vector.load %arg5[%c0_2, %c0_3] : memref<32x128xbf16, #tpu.memory_space<vmem>>, vector<32x128xbf16>
    %cst = arith.constant dense<0.000000e+00> : vector<34x128xf32>
    %5 = tpu.matmul %3, %4, %cst {dimension_numbers = #tpu.dot_dimension_numbers<[1], [0], [0], [1], [0, 0, 1, 1], [], []>} : vector<34x32xbf16>, vector<32x128xbf16>, vector<34x128xf32> -> vector<34x128xf32>
    %c0_4 = arith.constant 0 : index
    %c0_5 = arith.constant 0 : index
    %6 = vector.load %arg6[%c0_4, %c0_5] : memref<1x128xbf16, #tpu.memory_space<vmem>>, vector<1x128xbf16>
    %7 = arith.extf %6 : vector<1x128xbf16> to vector<1x128xf32>
    %8 = vector.broadcast %7 : vector<1x128xf32> to vector<34x128xf32>
    %9 = arith.addf %5, %8 : vector<34x128xf32>
    %cst_6 = arith.constant 1.702000e+00 : f32
    %10 = vector.broadcast %cst_6 : f32 to vector<34x128xf32>
    %11 = arith.mulf %10, %9 : vector<34x128xf32>
    %12 = arith.negf %11 : vector<34x128xf32>
    %13 = math.exp %12 : vector<34x128xf32>
    %cst_7 = arith.constant 1.000000e+00 : f32
    %14 = vector.broadcast %cst_7 : f32 to vector<34x128xf32>
    %15 = arith.addf %14, %13 : vector<34x128xf32>
    %16 = arith.divf %14, %15 : vector<34x128xf32>
    %17 = arith.mulf %9, %16 : vector<34x128xf32>
    %18 = arith.truncf %17 : vector<34x128xf32> to vector<34x128xbf16>
    %c0_8 = arith.constant 0 : index
    %c0_9 = arith.constant 0 : index
    %19 = vector.load %arg7[%c0_8, %c0_9] : memref<34x128xbf16, #tpu.memory_space<vmem>>, vector<34x128xbf16>
    tpu.vector_store %arg7[%c0_8, %c0_9], %18 {strides = array<i32>} : memref<34x128xbf16, #tpu.memory_space<vmem>>, vector<34x128xbf16>,
    return
  }
  func.func @transform_0(%arg0: i32, %arg1: i32) -> (i32, i32) {
    %c0_i32 = arith.constant 0 : i32
    %c0_i32_0 = arith.constant 0 : i32
    return %arg0, %c0_i32 : i32, i32
  }
  func.func @transform_1(%arg0: i32, %arg1: i32) -> (i32, i32) {
    %c0_i32 = arith.constant 0 : i32
    %c0_i32_0 = arith.constant 0 : i32
    %c0_i32_1 = arith.constant 0 : i32
    return %c0_i32, %c0_i32_0 : i32, i32
  }
  func.func @transform_2(%arg0: i32, %arg1: i32) -> (i32, i32) {
    %c0_i32 = arith.constant 0 : i32
    %c0_i32_0 = arith.constant 0 : i32
    %c0_i32_1 = arith.constant 0 : i32
    return %c0_i32, %c0_i32_0 : i32, i32
  }
  func.func @transform_3(%arg0: i32, %arg1: i32) -> (i32, i32) {
    %c0_i32 = arith.constant 0 : i32
    %c0_i32_0 = arith.constant 0 : i32
    return %c0_i32, %arg1 : i32, i32
  }
  func.func @transform_4(%arg0: i32, %arg1: i32) -> (i32, i32) {
    %c0_i32 = arith.constant 0 : i32
    %c0_i32_0 = arith.constant 0 : i32
    return %c0_i32, %arg1 : i32, i32
  }
  func.func @transform_5(%arg0: i32, %arg1: i32) -> (i32, i32) {
    %c0_i32 = arith.constant 0 : i32
    return %arg0, %arg1 : i32, i32
  }
}

module attributes {stable_mosaic.version = 11 : i64} {
  func.func @_mm_single_kernel(%arg0: i32, %arg1: i32, %arg2: memref<34x128xbf16, #tpu.memory_space<vmem>>, %arg3: memref<128x32xbf16, #tpu.memory_space<vmem>>, %arg4: memref<1x32xbf16, #tpu.memory_space<vmem>>, %arg5: memref<34x32xbf16, #tpu.memory_space<vmem>>, %arg6: memref<34x32xbf16, #tpu.memory_space<vmem>>) attributes {dimension_semantics = [#tpu.dimension_semantics<parallel>, #tpu.dimension_semantics<parallel>], iteration_bounds = array<i64: 1, 1>, scalar_prefetch = 0 : i64, scratch_operands = 0 : i64, tpu.core_type = #tpu.core_type<tc>, window_params = [{transform_indices = @transform_0, window_bounds = array<i64: 34, 128>}, {transform_indices = @transform_1, window_bounds = array<i64: 128, 32>}, {transform_indices = @transform_2, window_bounds = array<i64: 1, 32>}, {transform_indices = @transform_3, window_bounds = array<i64: 34, 32>}, {transform_indices = @transform_4, window_bounds = array<i64: 34, 32>}]} {
    %c0 = arith.constant 0 : index
    %c0_0 = arith.constant 0 : index
    %0 = vector.load %arg2[%c0, %c0_0] : memref<34x128xbf16, #tpu.memory_space<vmem>>, vector<34x128xbf16>
    %c0_1 = arith.constant 0 : index
    %c0_2 = arith.constant 0 : index
    %1 = vector.load %arg3[%c0_1, %c0_2] : memref<128x32xbf16, #tpu.memory_space<vmem>>, vector<128x32xbf16>
    %cst = arith.constant dense<0.000000e+00> : vector<34x32xf32>
    %2 = tpu.matmul %0, %1, %cst {dimension_numbers = #tpu.dot_dimension_numbers<[1], [0], [0], [1], [0, 0, 1, 1], [], []>} : vector<34x128xbf16>, vector<128x32xbf16>, vector<34x32xf32> -> vector<34x32xf32>
    %c0_3 = arith.constant 0 : index
    %c0_4 = arith.constant 0 : index
    %3 = vector.load %arg4[%c0_3, %c0_4] : memref<1x32xbf16, #tpu.memory_space<vmem>>, vector<1x32xbf16>
    %4 = arith.extf %3 : vector<1x32xbf16> to vector<1x32xf32>
    %5 = vector.broadcast %4 : vector<1x32xf32> to vector<34x32xf32>
    %6 = arith.addf %2, %5 : vector<34x32xf32>
    %c0_5 = arith.constant 0 : index
    %c0_6 = arith.constant 0 : index
    %7 = vector.load %arg5[%c0_5, %c0_6] : memref<34x32xbf16, #tpu.memory_space<vmem>>, vector<34x32xbf16>
    %8 = arith.extf %7 : vector<34x32xbf16> to vector<34x32xf32>
    %9 = arith.addf %6, %8 : vector<34x32xf32>
    %10 = arith.truncf %9 : vector<34x32xf32> to vector<34x32xbf16>
    %c0_7 = arith.constant 0 : index
    %c0_8 = arith.constant 0 : index
    %11 = vector.load %arg6[%c0_7, %c0_8] : memref<34x32xbf16, #tpu.memory_space<vmem>>, vector<34x32xbf16>
    tpu.vector_store %arg6[%c0_7, %c0_8], %10 {strides = array<i32>} : memref<34x32xbf16, #tpu.memory_space<vmem>>, vector<34x32xbf16>,
    return
  }
  func.func @transform_0(%arg0: i32, %arg1: i32) -> (i32, i32) {
    %c0_i32 = arith.constant 0 : i32
    %c0_i32_0 = arith.constant 0 : i32
    return %arg0, %c0_i32 : i32, i32
  }
  func.func @transform_1(%arg0: i32, %arg1: i32) -> (i32, i32) {
    %c0_i32 = arith.constant 0 : i32
    %c0_i32_0 = arith.constant 0 : i32
    return %c0_i32, %arg1 : i32, i32
  }
  func.func @transform_2(%arg0: i32, %arg1: i32) -> (i32, i32) {
    %c0_i32 = arith.constant 0 : i32
    %c0_i32_0 = arith.constant 0 : i32
    return %c0_i32, %arg1 : i32, i32
  }
  func.func @transform_3(%arg0: i32, %arg1: i32) -> (i32, i32) {
    %c0_i32 = arith.constant 0 : i32
    return %arg0, %arg1 : i32, i32
  }
  func.func @transform_4(%arg0: i32, %arg1: i32) -> (i32, i32) {
    %c0_i32 = arith.constant 0 : i32
    return %arg0, %arg1 : i32, i32
  }
}

module attributes {stable_mosaic.version = 11 : i64} {
  func.func @_ln_kernel(%arg0: i32, %arg1: memref<34x32xbf16, #tpu.memory_space<vmem>>, %arg2: memref<1x32xbf16, #tpu.memory_space<vmem>>, %arg3: memref<1x32xbf16, #tpu.memory_space<vmem>>, %arg4: memref<34x32xbf16, #tpu.memory_space<vmem>>) attributes {dimension_semantics = [#tpu.dimension_semantics<parallel>], iteration_bounds = array<i64: 1>, scalar_prefetch = 0 : i64, scratch_operands = 0 : i64, tpu.core_type = #tpu.core_type<tc>, window_params = [{transform_indices = @transform_0, window_bounds = array<i64: 34, 32>}, {pipeline_mode = #tpu.pipeline_mode<synchronous>, transform_indices = @transform_1, window_bounds = array<i64: 1, 32>}, {pipeline_mode = #tpu.pipeline_mode<synchronous>, transform_indices = @transform_2, window_bounds = array<i64: 1, 32>}, {transform_indices = @transform_3, window_bounds = array<i64: 34, 32>}]} {
    %c0 = arith.constant 0 : index
    %c0_0 = arith.constant 0 : index
    %0 = vector.load %arg1[%c0, %c0_0] : memref<34x32xbf16, #tpu.memory_space<vmem>>, vector<34x32xbf16>
    %1 = arith.extf %0 : vector<34x32xbf16> to vector<34x32xf32>
    %cst = arith.constant dense<0.000000e+00> : vector<34xf32>
    %2 = vector.multi_reduction <add>, %1, %cst [1] : vector<34x32xf32> to vector<34xf32>
    %3 = vector.shape_cast %2 : vector<34xf32> to vector<34x1xf32>
    %cst_1 = arith.constant 3.200000e+01 : f32
    %4 = vector.broadcast %cst_1 : f32 to vector<34x1xf32>
    %5 = arith.divf %3, %4 : vector<34x1xf32>
    %6 = vector.broadcast %5 : vector<34x1xf32> to vector<34x32xf32>
    %7 = arith.subf %1, %6 : vector<34x32xf32>
    %8 = arith.mulf %7, %7 : vector<34x32xf32>
    %cst_2 = arith.constant dense<0.000000e+00> : vector<34xf32>
    %9 = vector.multi_reduction <add>, %8, %cst_2 [1] : vector<34x32xf32> to vector<34xf32>
    %10 = vector.shape_cast %9 : vector<34xf32> to vector<34x1xf32>
    %cst_3 = arith.constant 3.200000e+01 : f32
    %11 = vector.broadcast %cst_3 : f32 to vector<34x1xf32>
    %12 = arith.divf %10, %11 : vector<34x1xf32>
    %13 = vector.broadcast %5 : vector<34x1xf32> to vector<34x32xf32>
    %14 = arith.subf %1, %13 : vector<34x32xf32>
    %cst_4 = arith.constant 9.99999997E-7 : f32
    %15 = vector.broadcast %cst_4 : f32 to vector<34x1xf32>
    %16 = arith.addf %12, %15 : vector<34x1xf32>
    %17 = math.rsqrt %16 : vector<34x1xf32>
    %18 = vector.broadcast %17 : vector<34x1xf32> to vector<34x32xf32>
    %19 = arith.mulf %14, %18 : vector<34x32xf32>
    %c0_5 = arith.constant 0 : index
    %c0_6 = arith.constant 0 : index
    %20 = vector.load %arg2[%c0_5, %c0_6] : memref<1x32xbf16, #tpu.memory_space<vmem>>, vector<1x32xbf16>
    %21 = arith.extf %20 : vector<1x32xbf16> to vector<1x32xf32>
    %22 = vector.broadcast %21 : vector<1x32xf32> to vector<34x32xf32>
    %23 = arith.mulf %19, %22 : vector<34x32xf32>
    %c0_7 = arith.constant 0 : index
    %c0_8 = arith.constant 0 : index
    %24 = vector.load %arg3[%c0_7, %c0_8] : memref<1x32xbf16, #tpu.memory_space<vmem>>, vector<1x32xbf16>
    %25 = arith.extf %24 : vector<1x32xbf16> to vector<1x32xf32>
    %26 = vector.broadcast %25 : vector<1x32xf32> to vector<34x32xf32>
    %27 = arith.addf %23, %26 : vector<34x32xf32>
    %28 = arith.truncf %27 : vector<34x32xf32> to vector<34x32xbf16>
    %c0_9 = arith.constant 0 : index
    %c0_10 = arith.constant 0 : index
    %29 = vector.load %arg4[%c0_9, %c0_10] : memref<34x32xbf16, #tpu.memory_space<vmem>>, vector<34x32xbf16>
    tpu.vector_store %arg4[%c0_9, %c0_10], %28 {strides = array<i32>} : memref<34x32xbf16, #tpu.memory_space<vmem>>, vector<34x32xbf16>,
    return
  }
  func.func @transform_0(%arg0: i32) -> (i32, i32) {
    %c0_i32 = arith.constant 0 : i32
    %c0_i32_0 = arith.constant 0 : i32
    return %arg0, %c0_i32 : i32, i32
  }
  func.func @transform_1(%arg0: i32) -> (i32, i32) {
    %c0_i32 = arith.constant 0 : i32
    %c0_i32_0 = arith.constant 0 : i32
    %c0_i32_1 = arith.constant 0 : i32
    return %c0_i32, %c0_i32_0 : i32, i32
  }
  func.func @transform_2(%arg0: i32) -> (i32, i32) {
    %c0_i32 = arith.constant 0 : i32
    %c0_i32_0 = arith.constant 0 : i32
    %c0_i32_1 = arith.constant 0 : i32
    return %c0_i32, %c0_i32_0 : i32, i32
  }
  func.func @transform_3(%arg0: i32) -> (i32, i32) {
    %c0_i32 = arith.constant 0 : i32
    %c0_i32_0 = arith.constant 0 : i32
    return %arg0, %c0_i32 : i32, i32
  }
}

module attributes {stable_mosaic.version = 11 : i64} {
  func.func @_ln_mm_kernel(%arg0: i32, %arg1: i32, %arg2: memref<34x32xbf16, #tpu.memory_space<vmem>>, %arg3: memref<1x32xbf16, #tpu.memory_space<vmem>>, %arg4: memref<1x32xbf16, #tpu.memory_space<vmem>>, %arg5: memref<32x16xbf16, #tpu.memory_space<vmem>>, %arg6: memref<34x16xbf16, #tpu.memory_space<vmem>>, %arg7: memref<34x32xbf16, #tpu.memory_space<vmem>>) attributes {dimension_semantics = [#tpu.dimension_semantics<parallel>, #tpu.dimension_semantics<arbitrary>], iteration_bounds = array<i64: 1, 1>, scalar_prefetch = 0 : i64, scratch_operands = 1 : i64, tpu.core_type = #tpu.core_type<tc>, window_params = [{transform_indices = @transform_0, window_bounds = array<i64: 34, 32>}, {pipeline_mode = #tpu.pipeline_mode<synchronous>, transform_indices = @transform_1, window_bounds = array<i64: 1, 32>}, {pipeline_mode = #tpu.pipeline_mode<synchronous>, transform_indices = @transform_2, window_bounds = array<i64: 1, 32>}, {transform_indices = @transform_3, window_bounds = array<i64: 32, 16>}, {transform_indices = @transform_4, window_bounds = array<i64: 34, 16>}]} {
    %c0_i32 = arith.constant 0 : i32
    %0 = arith.cmpi eq, %arg1, %c0_i32 : i32
    %1 = arith.extui %0 : i1 to i32
    %c0_i32_0 = arith.constant 0 : i32
    %2 = arith.cmpi ne, %1, %c0_i32_0 : i32
    scf.if %2 {
      %c0_6 = arith.constant 0 : index
      %c0_7 = arith.constant 0 : index
      %8 = vector.load %arg2[%c0_6, %c0_7] : memref<34x32xbf16, #tpu.memory_space<vmem>>, vector<34x32xbf16>
      %9 = arith.extf %8 : vector<34x32xbf16> to vector<34x32xf32>
      %cst_8 = arith.constant dense<0.000000e+00> : vector<34xf32>
      %10 = vector.multi_reduction <add>, %9, %cst_8 [1] : vector<34x32xf32> to vector<34xf32>
      %11 = vector.shape_cast %10 : vector<34xf32> to vector<34x1xf32>
      %cst_9 = arith.constant 3.200000e+01 : f32
      %12 = vector.broadcast %cst_9 : f32 to vector<34x1xf32>
      %13 = arith.divf %11, %12 : vector<34x1xf32>
      %14 = vector.broadcast %13 : vector<34x1xf32> to vector<34x32xf32>
      %15 = arith.subf %9, %14 : vector<34x32xf32>
      %16 = arith.mulf %15, %15 : vector<34x32xf32>
      %cst_10 = arith.constant dense<0.000000e+00> : vector<34xf32>
      %17 = vector.multi_reduction <add>, %16, %cst_10 [1] : vector<34x32xf32> to vector<34xf32>
      %18 = vector.shape_cast %17 : vector<34xf32> to vector<34x1xf32>
      %cst_11 = arith.constant 3.200000e+01 : f32
      %19 = vector.broadcast %cst_11 : f32 to vector<34x1xf32>
      %20 = arith.divf %18, %19 : vector<34x1xf32>
      %21 = vector.broadcast %13 : vector<34x1xf32> to vector<34x32xf32>
      %22 = arith.subf %9, %21 : vector<34x32xf32>
      %cst_12 = arith.constant 9.99999974E-6 : f32
      %23 = vector.broadcast %cst_12 : f32 to vector<34x1xf32>
      %24 = arith.addf %20, %23 : vector<34x1xf32>
      %25 = math.rsqrt %24 : vector<34x1xf32>
      %26 = vector.broadcast %25 : vector<34x1xf32> to vector<34x32xf32>
      %27 = arith.mulf %22, %26 : vector<34x32xf32>
      %c0_13 = arith.constant 0 : index
      %c0_14 = arith.constant 0 : index
      %28 = vector.load %arg3[%c0_13, %c0_14] : memref<1x32xbf16, #tpu.memory_space<vmem>>, vector<1x32xbf16>
      %29 = arith.extf %28 : vector<1x32xbf16> to vector<1x32xf32>
      %30 = vector.broadcast %29 : vector<1x32xf32> to vector<34x32xf32>
      %31 = arith.mulf %27, %30 : vector<34x32xf32>
      %c0_15 = arith.constant 0 : index
      %c0_16 = arith.constant 0 : index
      %32 = vector.load %arg4[%c0_15, %c0_16] : memref<1x32xbf16, #tpu.memory_space<vmem>>, vector<1x32xbf16>
      %33 = arith.extf %32 : vector<1x32xbf16> to vector<1x32xf32>
      %34 = vector.broadcast %33 : vector<1x32xf32> to vector<34x32xf32>
      %35 = arith.addf %31, %34 : vector<34x32xf32>
      %36 = arith.truncf %35 : vector<34x32xf32> to vector<34x32xbf16>
      %c0_17 = arith.constant 0 : index
      %c0_18 = arith.constant 0 : index
      %37 = vector.load %arg7[%c0_17, %c0_18] : memref<34x32xbf16, #tpu.memory_space<vmem>>, vector<34x32xbf16>
      tpu.vector_store %arg7[%c0_17, %c0_18], %36 {strides = array<i32>} : memref<34x32xbf16, #tpu.memory_space<vmem>>, vector<34x32xbf16>,
    } else {
    }
    %c0 = arith.constant 0 : index
    %c0_1 = arith.constant 0 : index
    %3 = vector.load %arg7[%c0, %c0_1] : memref<34x32xbf16, #tpu.memory_space<vmem>>, vector<34x32xbf16>
    %c0_2 = arith.constant 0 : index
    %c0_3 = arith.constant 0 : index
    %4 = vector.load %arg5[%c0_2, %c0_3] : memref<32x16xbf16, #tpu.memory_space<vmem>>, vector<32x16xbf16>
    %cst = arith.constant dense<0.000000e+00> : vector<34x16xf32>
    %5 = tpu.matmul %3, %4, %cst {dimension_numbers = #tpu.dot_dimension_numbers<[1], [0], [0], [1], [0, 0, 1, 1], [], []>} : vector<34x32xbf16>, vector<32x16xbf16>, vector<34x16xf32> -> vector<34x16xf32>
    %6 = arith.truncf %5 : vector<34x16xf32> to vector<34x16xbf16>
    %c0_4 = arith.constant 0 : index
    %c0_5 = arith.constant 0 : index
    %7 = vector.load %arg6[%c0_4, %c0_5] : memref<34x16xbf16, #tpu.memory_space<vmem>>, vector<34x16xbf16>
    tpu.vector_store %arg6[%c0_4, %c0_5], %6 {strides = array<i32>} : memref<34x16xbf16, #tpu.memory_space<vmem>>, vector<34x16xbf16>,
    return
  }
  func.func @transform_0(%arg0: i32, %arg1: i32) -> (i32, i32) {
    %c0_i32 = arith.constant 0 : i32
    %c0_i32_0 = arith.constant 0 : i32
    return %arg0, %c0_i32 : i32, i32
  }
  func.func @transform_1(%arg0: i32, %arg1: i32) -> (i32, i32) {
    %c0_i32 = arith.constant 0 : i32
    %c0_i32_0 = arith.constant 0 : i32
    %c0_i32_1 = arith.constant 0 : i32
    return %c0_i32, %c0_i32_0 : i32, i32
  }
  func.func @transform_2(%arg0: i32, %arg1: i32) -> (i32, i32) {
    %c0_i32 = arith.constant 0 : i32
    %c0_i32_0 = arith.constant 0 : i32
    %c0_i32_1 = arith.constant 0 : i32
    return %c0_i32, %c0_i32_0 : i32, i32
  }
  func.func @transform_3(%arg0: i32, %arg1: i32) -> (i32, i32) {
    %c0_i32 = arith.constant 0 : i32
    %c0_i32_0 = arith.constant 0 : i32
    return %c0_i32, %arg1 : i32, i32
  }
  func.func @transform_4(%arg0: i32, %arg1: i32) -> (i32, i32) {
    %c0_i32 = arith.constant 0 : i32
    return %arg0, %arg1 : i32, i32
  }
}

</mosaic_0001>

<bundles_post_ra>
// kernel: _lambda_.22
= control target key start
LH: loop header
LB: loop body
LE: loop exit
PB: predicated region body
PF: predicated region fallthrough
CT: control target
= control target key end

     0   :  { %vm50_vm0 = vcmask 392192   ;;  %vm122_vm1 = vcmask 257024   ;;  %s208_s1 = inlined_call_operand.vmem [shape: bf16[48,32], index: 1, kind: input, shape index: {}]   ;;  %s209_s0 = inlined_call_operand.vmem [shape: bf16[32,48], index: 0, kind: input, shape index: {}]   ;;  %s210_s2 = inlined_call_operand.vmem [shape: bf16[32,32], index: 2, kind: output, shape index: {}]  }
   0x1   :  { %v161_v0 = vld [vmem:[%s208_s1 + $0x10] sm:$0xff]   ;;  %v162_v1 = vld [vmem:[%s208_s1 + $0x8] sm:$0xff]   ;;  %v164_v2 = vld [vmem:[%s209_s0] sm:$0xff]  }
   0x2   :  { %151 = vmatprep.subr.bf16.mxu0 %v161_v0  ;;  %v163_v3 = vld [vmem:[%s208_s1] sm:$0xff]   ;;  %157 = vmatprep.mubr.msk.bf16.mxu0 %vm50_vm0, %v164_v2  ;;  %v165_v4 = vld [vmem:[%s209_s0 + $0x8] sm:$0xff]  }
   0x3   :  { %152 = vmatpush3.bf16.msra.mxu0 %v161_v0 }
   0x4   :  { %153 = vmatprep.subr.bf16.mxu0 %v162_v1 }
   0x7   :  { %154 = vmatpush3.bf16.msra.mxu0 %v162_v1 }
   0x8   :  { %155 = vmatprep.subr.bf16.mxu0 %v163_v3 }
   0xb   :  { %156 = vmatpush3.bf16.msra.mxu0 %v163_v3 }
   0xe   :  { %158 = vmatmul.mubr.msk.bf16.vlgmr.msra.gmra.mxu0 %vm50_vm0, %v165_v4 }
  0xce   :  { %v159_v5 = vpop.f32.mrf.mxu0 }
  0xcf   :  { %v144_v6 = vpack.c.bf16 %v159_v5, %v159_v5 }
  0xd0   :  { %v91_v7 = vpop.f32.mrf.mxu0 }
  0xd1   :  { %125 = vst.msk [vmem:[%s210_s2 + $0x8] sm:$0xf] %vm122_vm1, %v144_v6  ;;  %v142_v8 = vpack.c.bf16 %v91_v7, %v91_v7 }
  0xd2   :  { %v160_v9 = vpop.f32.mrf.mxu0 }
  0xd3   :  { %123 = vst.msk [vmem:[%s210_s2] sm:$0xf] %vm122_vm1, %v142_v8  ;;  %v145_v10 = vpack.c.bf16 %v160_v9, %v160_v9 }
  0xd4   :  { %v94_v11 = vpop.f32.mrf.mxu0 }
  0xd5   :  { %126 = vst.msk [vmem:[%s210_s2 + $0xc] sm:$0xf] %vm122_vm1, %v145_v10  ;;  %v143_v12 = vpack.c.bf16 %v94_v11, %v94_v11 }
  0xd7   :  { %124 = vst.msk [vmem:[%s210_s2 + $0x4] sm:$0xf] %vm122_vm1, %v143_v12 }

// kernel: _lambda_.23
= control target key start
LH: loop header
LB: loop body
LE: loop exit
PB: predicated region body
PF: predicated region fallthrough
CT: control target
= control target key end

     0   :  { %vm24_vm0 = vcmask 261120   ;;  %vm37_vm1 = vcmask 254976   ;;  %v94_v43 = vlaneseq  ;;  %vm135_vm2 = vcmask 257024   ;;  %s244_s0 = inlined_call_operand.vmem [shape: bf16[34,32], index: 0, kind: input, shape index: {}]   ;;  %s245_s1 = inlined_call_operand.vmem [shape: bf16[1,32], index: 1, kind: input, shape index: {}]   ;;  %s246_s2 = inlined_call_operand.vmem [shape: bf16[1,32], index: 2, kind: input, shape index: {}]   ;;  %s247_s3 = inlined_call_operand.vmem [shape: bf16[34,32], index: 3, kind: output, shape index: {}]  }
   0x1   :  { %v157_v0 = vld [vmem:[%s244_s0] sm:$0xff]   ;;  %v164_v1 = vld [vmem:[%s244_s0 + $0x8] sm:$0xff]   ;;  %v18_v6 = vld [vmem:[%s244_s0 + $0x10] sm:$0x1]  ;;  %vm140_vm3 = vcmask 253952  }
   0x2   :  { %v158_v2 = vunpack.c.l.bf16 %v157_v0  ;;  %v162_v3 = vunpack.c.l.bf16 %v164_v1  ;;  %v159_v4 = vunpack.c.h.bf16 %v157_v0  ;;  %v163_v5 = vunpack.c.h.bf16 %v164_v1  ;;  %v92_v53 = vld [vmem:[%s245_s1] sm:$0x1] }
   0x3   :  { %v23_v11 = vunpack.c.l.bf16 %v18_v6  ;;  %v95_v50 = vshrl.u32 %v94_v43, 7  ;;  %v103_v56 = vld [vmem:[%s246_s2] sm:$0x1]  ;;  %v93_v57 = vunpack.c.l.bf16 %v92_v53 }
   0x4   :  { %v25_v7 = vsel %vm24_vm0, %v158_v2, 0.0  ;;  %v31_v8 = vsel %vm24_vm0, %v162_v3, 0.0  ;;  %v28_v9 = vsel %vm24_vm0, %v159_v4, 0.0  ;;  %v34_v10 = vsel %vm24_vm0, %v163_v5, 0.0 }
   0x5   :  { %26 = vadd.xlane.f32.xlu0 %v25_v7  ;;  %32 = vadd.xlane.f32.xlu1 %v31_v8  ;;  %v38_v12 = vsel %vm37_vm1, %v23_v11, 0.0  ;;  %v96_v58 = vsub.s32 0, %v95_v50  ;;  %v104_v59 = vunpack.c.l.bf16 %v103_v56 }
   0x7   :  { %v97_v60 = vrot.slane %v93_v57, %v96_v58  ;;  %v108_v62 = vrot.slane %v104_v59, %v96_v58 }
   0x9   :  { %29 = vadd.xlane.f32.xlu0 %v28_v9  ;;  %35 = vadd.xlane.f32.xlu1 %v34_v10 }
   0xd   :  { %39 = vadd.xlane.f32.xlu0 %v38_v12 }
  0x8e   :  { %v27_v13 = vpop.xlane.xlu0 %26  ;;  %v33_v14 = vpop.xlane.xlu1 %32 }
  0x8f   :  { %v42_v15 = vmul.f32 0.03125, %v27_v13  ;;  %v44_v16 = vmul.f32 0.03125, %v33_v14 }
  0x91   :  { %v47_v17 = vsub.f32 %v158_v2, %v42_v15  ;;  %v49_v18 = vsub.f32 %v162_v3, %v44_v16 }
  0x92   :  { %v30_v19 = vpop.xlane.xlu0 %29  ;;  %v36_v20 = vpop.xlane.xlu1 %35 }
  0x93   :  { %v43_v21 = vmul.f32 0.03125, %v30_v19  ;;  %v45_v22 = vmul.f32 0.03125, %v36_v20  ;;  %v52_v23 = vmul.f32 %v47_v17, %v47_v17  ;;  %v54_v24 = vmul.f32 %v49_v18, %v49_v18 }
  0x95   :  { %v48_v25 = vsub.f32 %v159_v4, %v43_v21  ;;  %v209_v26 = vsub.f32 %v163_v5, %v45_v22  ;;  %v57_v27 = vsel %vm24_vm0, %v52_v23, 0.0  ;;  %v63_v30 = vsel %vm24_vm0, %v54_v24, 0.0 }
  0x96   :  { %58 = vadd.xlane.f32.xlu1 %v57_v27  ;;  %v40_v28 = vpop.xlane.xlu0 %39 }
  0x97   :  { %v46_v29 = vmul.f32 0.03125, %v40_v28  ;;  %v53_v31 = vmul.f32 %v48_v25, %v48_v25  ;;  %v55_v32 = vmul.f32 %v209_v26, %v209_v26 }
  0x99   :  { %v51_v33 = vsub.f32 %v23_v11, %v46_v29  ;;  %v60_v34 = vsel %vm24_vm0, %v53_v31, 0.0  ;;  %v66_v35 = vsel %vm24_vm0, %v55_v32, 0.0 }
  0x9a   :  { %64 = vadd.xlane.f32.xlu1 %v63_v30  ;;  %61 = vadd.xlane.f32.xlu0 %v60_v34 }
  0x9b   :  { %v56_v36 = vmul.f32 %v51_v33, %v51_v33 }
  0x9d   :  { %v69_v37 = vsel %vm37_vm1, %v56_v36, 0.0 }
  0x9e   :  { %67 = vadd.xlane.f32.xlu0 %v66_v35  ;;  %70 = vadd.xlane.f32.xlu1 %v69_v37 }
 0x11f   :  { %v59_v38 = vpop.xlane.xlu1 %58 }
 0x120   :  { %v72_v39 = vmul.f32 0.03125, %v59_v38 }
 0x122   :  { %v77_v40 = vadd.f32 1e-05, %v72_v39 }
 0x123   :  { %v65_v41 = vpop.xlane.xlu1 %64  ;;  %v62_v42 = vpop.xlane.xlu0 %61 }
 0x124   :  { %165 = vrsqrt.f32 %v77_v40  ;;  %v74_v44 = vmul.f32 0.03125, %v65_v41  ;;  %v73_v45 = vmul.f32 0.03125, %v62_v42 }
 0x126   :  { %v79_v46 = vadd.f32 1e-05, %v74_v44  ;;  %v78_v47 = vadd.f32 1e-05, %v73_v45 }
 0x127   :  { %v71_v48 = vpop.xlane.xlu1 %70  ;;  %v68_v49 = vpop.xlane.xlu0 %67 }
 0x128   :  { %167 = vrsqrt.f32 %v79_v46  ;;  %v76_v51 = vmul.f32 0.03125, %v71_v48  ;;  %v75_v52 = vmul.f32 0.03125, %v68_v49 }
 0x129   :  { %169 = vrsqrt.f32 %v78_v47 }
 0x12a   :  { %v81_v54 = vadd.f32 1e-05, %v76_v51  ;;  %v80_v55 = vadd.f32 1e-05, %v75_v52 }
 0x12c   :  { %171 = vrsqrt.f32 %v81_v54 }
 0x12d   :  { %173 = vrsqrt.f32 %v80_v55 }
 0x131   :  { %v166_v61 = vpop.eup %165 }
 0x132   :  { %v87_v63 = vmul.f32 %v166_v61, %v47_v17 }
 0x134   :  { %v98_v0 = vmul.f32 %v97_v60, %v87_v63 }
 0x135   :  { %v168_v1 = vpop.eup %167 }
 0x136   :  { %v170_v2 = vpop.eup %169  ;;  %v109_v3 = vadd.f32 %v108_v62, %v98_v0  ;;  %v89_v4 = vmul.f32 %v168_v1, %v49_v18 }
 0x137   :  { %v88_v5 = vmul.f32 %v170_v2, %v48_v25 }
 0x138   :  { %v151_v6 = vpack.c.bf16 %v109_v3, %v109_v3  ;;  %v100_v7 = vmul.f32 %v97_v60, %v89_v4 }
 0x139   :  { %v172_v8 = vpop.eup %171  ;;  %v99_v9 = vmul.f32 %v97_v60, %v88_v5 }
 0x13a   :  { %v174_v10 = vpop.eup %173  ;;  %136 = vst.msk [vmem:[%s247_s3] sm:$0xf] %vm135_vm2, %v151_v6  ;;  %v111_v11 = vadd.f32 %v108_v62, %v100_v7  ;;  %v91_v12 = vmul.f32 %v172_v8, %v51_v33 }
 0x13b   :  { %v110_v13 = vadd.f32 %v108_v62, %v99_v9  ;;  %v90_v14 = vmul.f32 %v174_v10, %v209_v26 }
 0x13c   :  { %v153_v15 = vpack.c.bf16 %v111_v11, %v111_v11  ;;  %v102_v16 = vmul.f32 %v97_v60, %v91_v12 }
 0x13d   :  { %v152_v17 = vpack.c.bf16 %v110_v13, %v110_v13  ;;  %v101_v18 = vmul.f32 %v97_v60, %v90_v14 }
 0x13e   :  { %138 = vst.msk [vmem:[%s247_s3 + $0x8] sm:$0xf] %vm135_vm2, %v153_v15  ;;  %v113_v19 = vadd.f32 %v108_v62, %v102_v16 }
 0x13f   :  { %137 = vst.msk [vmem:[%s247_s3 + $0x4] sm:$0xf] %vm135_vm2, %v152_v17  ;;  %v112_v20 = vadd.f32 %v108_v62, %v101_v18 }
 0x140   :  { %v155_v21 = vpack.c.bf16 %v113_v19, %v113_v19 }
 0x141   :  { %v154_v22 = vpack.c.bf16 %v112_v20, %v112_v20 }
 0x142   :  { %141 = vst.msk [vmem:[%s247_s3 + $0x10] sm:$0x1] %vm140_vm3, %v155_v21 }
 0x143   :  { %139 = vst.msk [vmem:[%s247_s3 + $0xc] sm:$0xf] %vm135_vm2, %v154_v22 }

// kernel: _lambda_.24
= control target key start
LH: loop header
LB: loop body
LE: loop exit
PB: predicated region body
PF: predicated region fallthrough
CT: control target
= control target key end

     0   :  { %v107_v0 = vmov 0.0   ;;  %vm108_vm0 = vmmov 0   ;;  %vm38_vm1 = vcmask 261120   ;;  %v22_v4 = vlaneseq  ;;  %s144_s1 = inlined_call_operand.vmem [shape: bf16[32,32], index: 1, kind: input, shape index: {}]   ;;  %s145_s0 = inlined_call_operand.vmem [shape: bf16[4,32], index: 0, kind: input, shape index: {}]   ;;  %s146_s2 = inlined_call_operand.vmem [shape: bf16[1,32], index: 2, kind: input, shape index: {}]   ;;  %s147_s3 = inlined_call_operand.vmem [shape: bf16[4,32], index: 3, kind: output, shape index: {}]  }
   0x1   :  { %95 = vmatprep.subr.bf16.mxu0 %v107_v0  ;;  %v105_v1 = vld [vmem:[%s144_s1 + $0x8] sm:$0xff]   ;;  %99 = vmatprep.mubr.msk.bf16.mxu0 %vm108_vm0, %v107_v0  ;;  %v106_v2 = vld [vmem:[%s144_s1] sm:$0xff]   ;;  %vm83_vm2 = vcmask 254976  }
   0x2   :  { %96 = vmatpush3.bf16.msra.mxu0 %v105_v1  ;;  %v15_v3 = vld [vmem:[%s145_s0] sm:$0x3]  ;;  %v23_v5 = vshrl.u32 %v22_v4, 7 }
   0x3   :  { %97 = vmatprep.subr.bf16.mxu0 %v107_v0  ;;  %v20_v6 = vld [vmem:[%s146_s2] sm:$0x1] }
   0x4   :  { %v21_v7 = vunpack.c.l.bf16 %v20_v6  ;;  %v24_v8 = vsub.s32 0, %v23_v5 }
   0x6   :  { %98 = vmatpush3.bf16.msra.mxu0 %v106_v2  ;;  %v25_v9 = vrot.slane %v21_v7, %v24_v8 }
   0x9   :  { %100 = vmatmul.mubr.msk.bf16.vlgmr.msra.gmra.mxu0 %vm38_vm1, %v15_v3 }
  0xc9   :  { %v76_v10 = vpop.f32.mrf.mxu0 }
  0xca   :  { %v77_v11 = vadd.f32 %v76_v10, %v25_v9 }
  0xcb   :  { %v101_v12 = vpop.f32.mrf.mxu0 }
  0xcc   :  { %v82_v13 = vpack.c.bf16 %v77_v11, %v77_v11 }
  0xcd   :  { %v79_v14 = vpop.f32.mrf.mxu0 }
  0xce   :  { %84 = vst.msk [vmem:[%s147_s3] sm:$0x3] %vm83_vm2, %v82_v13 }
  0xcf   :  { %v102_v15 = vpop.f32.mrf.mxu0 }

// kernel: _lambda_.26
= control target key start
LH: loop header
LB: loop body
LE: loop exit
PB: predicated region body
PF: predicated region fallthrough
CT: control target
= control target key end

     0   :  { %vm37_vm0 = vcmask 261120   ;;  %vm53_vm1 = vcmask 254976   ;;  %v405_v47 = vmov 0.0   ;;  %vm406_vm2 = vmmov 0   ;;  %s547_s0 = inlined_call_operand.vmem [shape: bf16[42,32], index: 0, kind: input, shape index: {}]   ;;  %s548_s3 = inlined_call_operand.vmem [shape: bf16[32,96], index: 3, kind: input, shape index: {}]   ;;  %s549_s1 = inlined_call_operand.vmem [shape: bf16[1,32], index: 1, kind: input, shape index: {}]   ;;  %s550_s2 = inlined_call_operand.vmem [shape: bf16[1,32], index: 2, kind: input, shape index: {}]   ;;  %s551_s4 = inlined_call_operand.vmem [shape: bf16[1,96], index: 4, kind: input, shape index: {}]   ;;  %s552_s5 = inlined_call_operand.vmem [shape: bf16[42,96], index: 5, kind: output, shape index: {}]  }
   0x1   :  { %v360_v0 = vld [vmem:[%s547_s0 + $0x8] sm:$0xff]   ;;  %v353_v1 = vld [vmem:[%s547_s0] sm:$0xff]   ;;  %v29_v5 = vld [vmem:[%s547_s0 + $0x10] sm:$0xf]  ;;  %382 = vmatprep.subr.bf16.mxu1 %v405_v47  ;;  %366 = vmatprep.subr.bf16.mxu0 %v405_v47  ;;  %v120_v54 = vlaneseq  ;;  %vm166_vm3 = vcmask 257024   ;;  %vm172_vm4 = vcmask 253952  }
   0x2   :  { %v358_v2 = vunpack.c.l.bf16 %v360_v0  ;;  %v359_v3 = vunpack.c.h.bf16 %v360_v0  ;;  %v354_v4 = vunpack.c.l.bf16 %v353_v1  ;;  %v355_v6 = vunpack.c.h.bf16 %v353_v1  ;;  %v30_v7 = vld [vmem:[%s547_s0 + $0x14] sm:$0x1]  ;;  %v388_v46 = vld [vmem:[%s548_s3 + $0x8] sm:$0xff]   ;;  %v389_v48 = vld [vmem:[%s548_s3] sm:$0xff]   ;;  %374 = vmatprep.mubr.msk.bf16.mxu1 %vm406_vm2, %v405_v47  ;;  %370 = vmatprep.mubr.msk.bf16.mxu0 %vm406_vm2, %v405_v47 }
   0x3   :  { %v35_v11 = vunpack.c.l.bf16 %v29_v5  ;;  %v36_v13 = vunpack.c.l.bf16 %v30_v7  ;;  %384 = vmatpush3.bf16.msra.mxu1 %v388_v46  ;;  %367 = vmatpush3.bf16.msra.mxu0 %v388_v46  ;;  %v121_v61 = vshrl.u32 %v120_v54, 7  ;;  %v118_v0 = vld [vmem:[%s549_s1] sm:$0x1]  ;;  %vm308_vm5 = vcmask 781312  }
   0x4   :  { %v44_v8 = vsel %vm37_vm0, %v358_v2, 0.0  ;;  %v38_v9 = vsel %vm37_vm0, %v354_v4, 0.0  ;;  %v47_v10 = vsel %vm37_vm0, %v359_v3, 0.0  ;;  %v41_v12 = vsel %vm37_vm0, %v355_v6, 0.0  ;;  %383 = vmatprep.subr.bf16.mxu1 %v405_v47  ;;  %368 = vmatprep.subr.bf16.mxu0 %v405_v47 }
   0x5   :  { %45 = vadd.xlane.f32.xlu0 %v44_v8  ;;  %39 = vadd.xlane.f32.xlu1 %v38_v9  ;;  %v50_v14 = vsel %vm37_vm0, %v35_v11, 0.0  ;;  %v54_v15 = vsel %vm53_vm1, %v36_v13, 0.0  ;;  %v119_v5 = vunpack.c.l.bf16 %v118_v0  ;;  %vm314_vm6 = vcmask 778240  }
   0x7   :  { %385 = vmatpush3.bf16.msra.mxu1 %v389_v48  ;;  %369 = vmatpush3.bf16.msra.mxu0 %v389_v48 }
   0x9   :  { %48 = vadd.xlane.f32.xlu0 %v47_v10  ;;  %42 = vadd.xlane.f32.xlu1 %v41_v12 }
   0xd   :  { %51 = vadd.xlane.f32.xlu0 %v50_v14  ;;  %55 = vadd.xlane.f32.xlu1 %v54_v15 }
  0x8e   :  { %v46_v16 = vpop.xlane.xlu0 %45  ;;  %v40_v17 = vpop.xlane.xlu1 %39 }
  0x8f   :  { %v60_v18 = vmul.f32 0.03125, %v46_v16  ;;  %v58_v19 = vmul.f32 0.03125, %v40_v17 }
  0x91   :  { %v455_v20 = vsub.f32 %v358_v2, %v60_v18  ;;  %v457_v21 = vsub.f32 %v354_v4, %v58_v19 }
  0x92   :  { %v49_v22 = vpop.xlane.xlu0 %48  ;;  %v43_v23 = vpop.xlane.xlu1 %42 }
  0x93   :  { %v61_v24 = vmul.f32 0.03125, %v49_v22  ;;  %v72_v25 = vmul.f32 %v455_v20, %v455_v20  ;;  %v59_v26 = vmul.f32 0.03125, %v43_v23  ;;  %v70_v27 = vmul.f32 %v457_v21, %v457_v21 }
  0x95   :  { %v463_v28 = vsub.f32 %v359_v3, %v61_v24  ;;  %v82_v29 = vsel %vm37_vm0, %v72_v25, 0.0  ;;  %v466_v30 = vsub.f32 %v355_v6, %v59_v26  ;;  %v76_v32 = vsel %vm37_vm0, %v70_v27, 0.0  ;;  %v130_v3 = vld [vmem:[%s550_s2] sm:$0x1] }
  0x96   :  { %83 = vadd.xlane.f32.xlu0 %v82_v29  ;;  %v52_v31 = vpop.xlane.xlu0 %51  ;;  %v56_v33 = vpop.xlane.xlu1 %55  ;;  %v122_v6 = vsub.s32 0, %v121_v61  ;;  %v131_v8 = vunpack.c.l.bf16 %v130_v3 }
  0x97   :  { %v62_v34 = vmul.f32 0.03125, %v52_v31  ;;  %v73_v35 = vmul.f32 %v463_v28, %v463_v28  ;;  %v63_v36 = vmul.f32 0.03125, %v56_v33  ;;  %v71_v37 = vmul.f32 %v466_v30, %v466_v30 }
  0x98   :  { %v123_v10 = vrot.slane %v119_v5, %v122_v6  ;;  %v135_v12 = vrot.slane %v131_v8, %v122_v6 }
  0x99   :  { %v473_v38 = vsub.f32 %v35_v11, %v62_v34  ;;  %v85_v39 = vsel %vm37_vm0, %v73_v35, 0.0  ;;  %v476_v40 = vsub.f32 %v36_v13, %v63_v36  ;;  %v79_v42 = vsel %vm37_vm0, %v71_v37, 0.0 }
  0x9a   :  { %86 = vadd.xlane.f32.xlu1 %v85_v39  ;;  %77 = vadd.xlane.f32.xlu0 %v76_v32 }
  0x9b   :  { %v74_v41 = vmul.f32 %v473_v38, %v473_v38  ;;  %v75_v43 = vmul.f32 %v476_v40, %v476_v40 }
  0x9d   :  { %v88_v44 = vsel %vm37_vm0, %v74_v41, 0.0  ;;  %v91_v45 = vsel %vm53_vm1, %v75_v43, 0.0 }
  0x9e   :  { %89 = vadd.xlane.f32.xlu0 %v88_v44  ;;  %80 = vadd.xlane.f32.xlu1 %v79_v42 }
  0xa2   :  { %92 = vadd.xlane.f32.xlu1 %v91_v45  ;;  %v184_v45 = vld [vmem:[%s551_s4] sm:$0x1] }
  0xa3   :  { %v185_v46 = vunpack.c.l.bf16 %v184_v45 }
  0xa5   :  { %v189_v48 = vrot.slane %v185_v46, %v122_v6 }
 0x11f   :  { %v84_v49 = vpop.xlane.xlu0 %83 }
 0x120   :  { %v96_v50 = vmul.f32 0.03125, %v84_v49 }
 0x122   :  { %v102_v51 = vadd.f32 1e-05, %v96_v50 }
 0x123   :  { %v78_v52 = vpop.xlane.xlu0 %77  ;;  %v87_v53 = vpop.xlane.xlu1 %86 }
 0x124   :  { %393 = vrsqrt.f32 %v102_v51  ;;  %v94_v55 = vmul.f32 0.03125, %v78_v52  ;;  %v97_v56 = vmul.f32 0.03125, %v87_v53 }
 0x126   :  { %v100_v57 = vadd.f32 1e-05, %v94_v55  ;;  %v103_v58 = vadd.f32 1e-05, %v97_v56 }
 0x127   :  { %v90_v59 = vpop.xlane.xlu0 %89  ;;  %v81_v60 = vpop.xlane.xlu1 %80 }
 0x128   :  { %395 = vrsqrt.f32 %v100_v57  ;;  %v98_v62 = vmul.f32 0.03125, %v90_v59  ;;  %v95_v63 = vmul.f32 0.03125, %v81_v60 }
 0x129   :  { %397 = vrsqrt.f32 %v103_v58 }
 0x12a   :  { %v104_v1 = vadd.f32 1e-05, %v98_v62  ;;  %v101_v2 = vadd.f32 1e-05, %v95_v63 }
 0x12b   :  { %v93_v4 = vpop.xlane.xlu1 %92 }
 0x12c   :  { %399 = vrsqrt.f32 %v104_v1  ;;  %v99_v7 = vmul.f32 0.03125, %v93_v4 }
 0x12d   :  { %401 = vrsqrt.f32 %v101_v2 }
 0x12e   :  { %v105_v9 = vadd.f32 1e-05, %v99_v7 }
 0x130   :  { %403 = vrsqrt.f32 %v105_v9 }
 0x131   :  { %v394_v11 = vpop.eup %393 }
 0x132   :  { %v114_v13 = vmul.f32 %v394_v11, %v455_v20 }
 0x134   :  { %v126_v14 = vmul.f32 %v123_v10, %v114_v13 }
 0x135   :  { %v396_v15 = vpop.eup %395 }
 0x136   :  { %v398_v16 = vpop.eup %397  ;;  %v138_v17 = vadd.f32 %v135_v12, %v126_v14  ;;  %v112_v18 = vmul.f32 %v396_v15, %v457_v21 }
 0x137   :  { %v115_v19 = vmul.f32 %v398_v16, %v463_v28 }
 0x138   :  { %v342_v22 = vpack.c.bf16 %v138_v17, %v138_v17  ;;  %v124_v23 = vmul.f32 %v123_v10, %v112_v18 }
 0x139   :  { %v400_v24 = vpop.eup %399  ;;  %v127_v25 = vmul.f32 %v123_v10, %v115_v19 }
 0x13a   :  { %v402_v26 = vpop.eup %401  ;;  %169 = vst.msk [vmem:[#allocation2 + $0x8] sm:$0xf] %vm166_vm3, %v342_v22  ;;  %v136_v27 = vadd.f32 %v135_v12, %v124_v23  ;;  %v116_v29 = vmul.f32 %v400_v24, %v473_v38 }
 0x13b   :  { %v139_v20 = vadd.f32 %v135_v12, %v127_v25  ;;  %v113_v31 = vmul.f32 %v402_v26, %v466_v30 }
 0x13c   :  { %v340_v32 = vpack.c.bf16 %v136_v27, %v136_v27  ;;  %v128_v33 = vmul.f32 %v123_v10, %v116_v29 }
 0x13d   :  { %v404_v34 = vpop.eup %403  ;;  %v343_v21 = vpack.c.bf16 %v139_v20, %v139_v20  ;;  %v125_v35 = vmul.f32 %v123_v10, %v113_v31 }
 0x13e   :  { %167 = vst.msk [vmem:[#allocation2] sm:$0xf] %vm166_vm3, %v340_v32  ;;  %v140_v28 = vadd.f32 %v135_v12, %v128_v33  ;;  %v117_v36 = vmul.f32 %v404_v34, %v476_v40 }
 0x13f   :  { %170 = vst.msk [vmem:[#allocation2 + $0xc] sm:$0xf] %vm166_vm3, %v343_v21  ;;  %v137_v37 = vadd.f32 %v135_v12, %v125_v35 }
 0x140   :  { %v344_v39 = vpack.c.bf16 %v140_v28, %v140_v28  ;;  %v129_v41 = vmul.f32 %v123_v10, %v117_v36 }
 0x141   :  { %v341_v42 = vpack.c.bf16 %v137_v37, %v137_v37 }
 0x142   :  { %171 = vst.msk [vmem:[#allocation2 + $0x10] sm:$0xf] %vm166_vm3, %v344_v39  ;;  %v141_v38 = vadd.f32 %v135_v12, %v129_v41 }
 0x143   :  { %168 = vst.msk [vmem:[#allocation2 + $0x4] sm:$0xf] %vm166_vm3, %v341_v42 }
 0x144   :  { %v345_v30 = vpack.c.bf16 %v141_v38, %v141_v38 }
 0x146   :  { %173 = vst.msk [vmem:[#allocation2 + $0x14] sm:$0x1] %vm172_vm4, %v345_v30  ;;  %v390_v43 = vld [vmem:[#allocation2 + $0x8] sm:$0xff]  }
 0x147   :  { %375 = vmatmul.mubr.msk.bf16.vlgmr.msra.gmra.mxu1 %vm37_vm0, %v390_v43 }
 0x148   :  { %378 = vmatprep.mubr.msk.bf16.mxu1 %vm406_vm2, %v405_v47 }
 0x14a   :  { %v391_v40 = vld [vmem:[#allocation2] sm:$0xff]  }
 0x14b   :  { %371 = vmatmul.mubr.msk.bf16.vlgmr.msra.gmra.mxu0 %vm37_vm0, %v391_v40 }
 0x14d   :  { %v392_v44 = vld [vmem:[#allocation2 + $0x10] sm:$0x1f]  }
 0x14f   :  { %379 = vmatmul.mubr.msk.bf16.gmra.mxu1 %vm37_vm0, %v392_v44 }
 0x207   :  { %v269_v49 = vpop.f32.mrf.mxu1 }
 0x208   :  { %v270_v50 = vadd.f32 %v269_v49, %v189_v48 }
 0x209   :  { %v376_v51 = vpop.f32.mrf.mxu1 }
 0x20a   :  { %v348_v52 = vpack.c.bf16 %v270_v50, %v270_v50 }
 0x20b   :  { %v261_v53 = vpop.f32.mrf.mxu0  ;;  %v272_v54 = vpop.f32.mrf.mxu1 }
 0x20c   :  { %311 = vst.msk [vmem:[%s552_s5 + $0x8] sm:$0xf] %vm308_vm5, %v348_v52  ;;  %v262_v47 = vadd.f32 %v261_v53, %v189_v48  ;;  %v273_v55 = vadd.f32 %v272_v54, %v189_v48 }
 0x20d   :  { %v372_v56 = vpop.f32.mrf.mxu0  ;;  %v377_v57 = vpop.f32.mrf.mxu1 }
 0x20e   :  { %v346_v58 = vpack.c.bf16 %v262_v47, %v262_v47  ;;  %v349_v59 = vpack.c.bf16 %v273_v55, %v273_v55 }
 0x20f   :  { %v264_v60 = vpop.f32.mrf.mxu0  ;;  %v277_v61 = vpop.f32.mrf.mxu1 }
 0x210   :  { %309 = vst.msk [vmem:[%s552_s5] sm:$0xf] %vm308_vm5, %v346_v58  ;;  %312 = vst.msk [vmem:[%s552_s5 + $0xc] sm:$0xf] %vm308_vm5, %v349_v59  ;;  %v265_v62 = vadd.f32 %v264_v60, %v189_v48  ;;  %v278_v63 = vadd.f32 %v277_v61, %v189_v48 }
 0x211   :  { %v373_v0 = vpop.f32.mrf.mxu0  ;;  %v380_v1 = vpop.f32.mrf.mxu1 }
 0x212   :  { %v347_v2 = vpack.c.bf16 %v265_v62, %v265_v62  ;;  %v350_v3 = vpack.c.bf16 %v278_v63, %v278_v63 }
 0x213   :  { %v280_v4 = vpop.f32.mrf.mxu1 }
 0x214   :  { %310 = vst.msk [vmem:[%s552_s5 + $0x4] sm:$0xf] %vm308_vm5, %v347_v2  ;;  %313 = vst.msk [vmem:[%s552_s5 + $0x10] sm:$0xf] %vm308_vm5, %v350_v3  ;;  %v281_v5 = vadd.f32 %v280_v4, %v189_v48 }
 0x215   :  { %v381_v6 = vpop.f32.mrf.mxu1 }
 0x216   :  { %v351_v7 = vpack.c.bf16 %v281_v5, %v281_v5 }
 0x218   :  { %315 = vst.msk [vmem:[%s552_s5 + $0x14] sm:$0x1] %vm314_vm6, %v351_v7 }

// kernel: _lambda_.29
= control target key start
LH: loop header
LB: loop body
LE: loop exit
PB: predicated region body
PF: predicated region fallthrough
CT: control target
= control target key end

     0   :  { %v323_v0 = vmov 0.0   ;;  %vm324_vm0 = vmmov 0   ;;  %v42_v12 = vlaneseq  ;;  %vm211_vm1 = vcmask 257024   ;;  %s424_s1 = inlined_call_operand.vmem [shape: bf16[128,32], index: 1, kind: input, shape index: {}]   ;;  %s425_s0 = inlined_call_operand.vmem [shape: bf16[42,128], index: 0, kind: input, shape index: {}]   ;;  %s426_s2 = inlined_call_operand.vmem [shape: bf16[1,32], index: 2, kind: input, shape index: {}]   ;;  %s427_s3 = inlined_call_operand.vmem [shape: bf16[42,32], index: 3, kind: input, shape index: {}]   ;;  %s428_s4 = inlined_call_operand.vmem [shape: bf16[42,32], index: 4, kind: output, shape index: {}]  }
   0x1   :  { %294 = vmatprep.subr.bf16.mxu1 %v323_v0  ;;  %v312_v1 = vld [vmem:[%s424_s1 + $0x38] sm:$0xff]   ;;  %266 = vmatprep.subr.bf16.mxu0 %v323_v0  ;;  %v313_v2 = vld [vmem:[%s424_s1 + $0x30] sm:$0xff]   ;;  %v314_v3 = vld [vmem:[%s424_s1 + $0x28] sm:$0xff]   ;;  %vm217_vm2 = vcmask 253952  }
   0x2   :  { %286 = vmatprep.mubr.msk.bf16.mxu1 %vm324_vm0, %v323_v0  ;;  %282 = vmatprep.mubr.msk.bf16.mxu0 %vm324_vm0, %v323_v0  ;;  %v315_v4 = vld [vmem:[%s424_s1 + $0x20] sm:$0xff]   ;;  %v316_v5 = vld [vmem:[%s424_s1 + $0x18] sm:$0xff]   ;;  %v317_v6 = vld [vmem:[%s424_s1 + $0x10] sm:$0xff]   ;;  %v43_v13 = vshrl.u32 %v42_v12, 7 }
   0x3   :  { %302 = vmatpush3.bf16.msra.mxu1 %v312_v1  ;;  %267 = vmatpush3.bf16.msra.mxu0 %v312_v1  ;;  %v318_v7 = vld [vmem:[%s424_s1 + $0x8] sm:$0xff]   ;;  %v319_v8 = vld [vmem:[%s424_s1] sm:$0xff]   ;;  %v322_v11 = vld [vmem:[%s425_s0 + $0x10] sm:$0x1f]  }
   0x4   :  { %295 = vmatprep.subr.bf16.mxu1 %v323_v0  ;;  %268 = vmatprep.subr.bf16.mxu0 %v323_v0  ;;  %v320_v9 = vld [vmem:[%s425_s0 + $0x8] sm:$0xff]   ;;  %v321_v10 = vld [vmem:[%s425_s0] sm:$0xff]   ;;  %v44_v16 = vsub.s32 0, %v43_v13  ;;  %v173_v34 = vld [vmem:[%s427_s3 + $0x10] sm:$0xf] }
   0x5   :  { %v40_v14 = vld [vmem:[%s426_s2] sm:$0x1]  ;;  %v254_v17 = vld [vmem:[%s427_s3 + $0x8] sm:$0xff]   ;;  %v179_v43 = vunpack.c.l.bf16 %v173_v34  ;;  %v174_v45 = vld [vmem:[%s427_s3 + $0x14] sm:$0x1] }
   0x6   :  { %v41_v15 = vunpack.c.l.bf16 %v40_v14  ;;  %v247_v18 = vld [vmem:[%s427_s3] sm:$0xff]   ;;  %v252_v20 = vunpack.c.l.bf16 %v254_v17  ;;  %v253_v30 = vunpack.c.h.bf16 %v254_v17  ;;  %v180_v51 = vunpack.c.l.bf16 %v174_v45 }
   0x7   :  { %303 = vmatpush3.bf16.msra.mxu1 %v313_v2  ;;  %269 = vmatpush3.bf16.msra.mxu0 %v313_v2  ;;  %v248_v21 = vunpack.c.l.bf16 %v247_v18  ;;  %v249_v31 = vunpack.c.h.bf16 %v247_v18 }
   0x8   :  { %296 = vmatprep.subr.bf16.mxu1 %v323_v0  ;;  %270 = vmatprep.subr.bf16.mxu0 %v323_v0  ;;  %v45_v19 = vrot.slane %v41_v15, %v44_v16 }
   0xb   :  { %304 = vmatpush3.bf16.msra.mxu1 %v314_v3  ;;  %271 = vmatpush3.bf16.msra.mxu0 %v314_v3 }
   0xc   :  { %297 = vmatprep.subr.bf16.mxu1 %v323_v0  ;;  %272 = vmatprep.subr.bf16.mxu0 %v323_v0 }
   0xf   :  { %305 = vmatpush3.bf16.msra.mxu1 %v315_v4  ;;  %273 = vmatpush3.bf16.msra.mxu0 %v315_v4 }
  0x10   :  { %298 = vmatprep.subr.bf16.mxu1 %v323_v0  ;;  %274 = vmatprep.subr.bf16.mxu0 %v323_v0 }
  0x13   :  { %306 = vmatpush3.bf16.msra.mxu1 %v316_v5  ;;  %275 = vmatpush3.bf16.msra.mxu0 %v316_v5 }
  0x14   :  { %299 = vmatprep.subr.bf16.mxu1 %v323_v0  ;;  %276 = vmatprep.subr.bf16.mxu0 %v323_v0 }
  0x17   :  { %307 = vmatpush3.bf16.msra.mxu1 %v317_v6  ;;  %277 = vmatpush3.bf16.msra.mxu0 %v317_v6 }
  0x18   :  { %300 = vmatprep.subr.bf16.mxu1 %v323_v0  ;;  %278 = vmatprep.subr.bf16.mxu0 %v323_v0 }
  0x1b   :  { %308 = vmatpush3.bf16.msra.mxu1 %v318_v7  ;;  %279 = vmatpush3.bf16.msra.mxu0 %v318_v7 }
  0x1c   :  { %301 = vmatprep.subr.bf16.mxu1 %v323_v0  ;;  %280 = vmatprep.subr.bf16.mxu0 %v323_v0 }
  0x1f   :  { %309 = vmatpush3.bf16.msra.mxu1 %v319_v8  ;;  %281 = vmatpush3.bf16.msra.mxu0 %v319_v8 }
  0x22   :  { %287 = vmatmul.mubr.bf16.vlgmr.msra.gmra.mxu1 %v320_v9  ;;  %283 = vmatmul.mubr.bf16.vlgmr.msra.gmra.mxu0 %v321_v10 }
  0x23   :  { %290 = vmatprep.mubr.msk.bf16.mxu1 %vm324_vm0, %v323_v0 }
  0x2a   :  { %291 = vmatmul.mubr.bf16.gmra.mxu1 %v322_v11 }
  0xe2   :  { %v154_v22 = vpop.f32.mrf.mxu1  ;;  %v146_v23 = vpop.f32.mrf.mxu0 }
  0xe3   :  { %v155_v24 = vadd.f32 %v154_v22, %v45_v19  ;;  %v147_v25 = vadd.f32 %v146_v23, %v45_v19 }
  0xe4   :  { %v288_v26 = vpop.f32.mrf.mxu1  ;;  %v284_v27 = vpop.f32.mrf.mxu0 }
  0xe5   :  { %v183_v28 = vadd.f32 %v252_v20, %v155_v24  ;;  %v181_v29 = vadd.f32 %v248_v21, %v147_v25 }
  0xe6   :  { %v157_v32 = vpop.f32.mrf.mxu1  ;;  %v149_v33 = vpop.f32.mrf.mxu0 }
  0xe7   :  { %v242_v35 = vpack.c.bf16 %v183_v28, %v183_v28  ;;  %v240_v36 = vpack.c.bf16 %v181_v29, %v181_v29  ;;  %v158_v37 = vadd.f32 %v157_v32, %v45_v19  ;;  %v150_v38 = vadd.f32 %v149_v33, %v45_v19 }
  0xe8   :  { %v289_v39 = vpop.f32.mrf.mxu1  ;;  %v285_v40 = vpop.f32.mrf.mxu0 }
  0xe9   :  { %214 = vst.msk [vmem:[%s428_s4 + $0x8] sm:$0xf] %vm211_vm1, %v242_v35  ;;  %212 = vst.msk [vmem:[%s428_s4] sm:$0xf] %vm211_vm1, %v240_v36  ;;  %v184_v41 = vadd.f32 %v253_v30, %v158_v37  ;;  %v182_v42 = vadd.f32 %v249_v31, %v150_v38 }
  0xea   :  { %v162_v44 = vpop.f32.mrf.mxu1 }
  0xeb   :  { %v243_v46 = vpack.c.bf16 %v184_v41, %v184_v41  ;;  %v241_v47 = vpack.c.bf16 %v182_v42, %v182_v42  ;;  %v163_v48 = vadd.f32 %v162_v44, %v45_v19 }
  0xec   :  { %v292_v49 = vpop.f32.mrf.mxu1 }
  0xed   :  { %215 = vst.msk [vmem:[%s428_s4 + $0xc] sm:$0xf] %vm211_vm1, %v243_v46  ;;  %213 = vst.msk [vmem:[%s428_s4 + $0x4] sm:$0xf] %vm211_vm1, %v241_v47  ;;  %v185_v50 = vadd.f32 %v179_v43, %v163_v48 }
  0xee   :  { %v165_v52 = vpop.f32.mrf.mxu1 }
  0xef   :  { %v244_v53 = vpack.c.bf16 %v185_v50, %v185_v50  ;;  %v166_v54 = vadd.f32 %v165_v52, %v45_v19 }
  0xf0   :  { %v293_v55 = vpop.f32.mrf.mxu1 }
  0xf1   :  { %216 = vst.msk [vmem:[%s428_s4 + $0x10] sm:$0xf] %vm211_vm1, %v244_v53  ;;  %v186_v56 = vadd.f32 %v180_v51, %v166_v54 }
  0xf3   :  { %v245_v57 = vpack.c.bf16 %v186_v56, %v186_v56 }
  0xf5   :  { %218 = vst.msk [vmem:[%s428_s4 + $0x14] sm:$0x1] %vm217_vm2, %v245_v57 }

// kernel: _lambda_.28
= control target key start
LH: loop header
LB: loop body
LE: loop exit
PB: predicated region body
PF: predicated region fallthrough
CT: control target
= control target key end

     0   :  { %vm37_vm0 = vcmask 261120   ;;  %vm53_vm1 = vcmask 254976   ;;  %v492_v47 = vmov 0.0   ;;  %vm493_vm2 = vmmov 0   ;;  %s623_s0 = inlined_call_operand.vmem [shape: bf16[42,32], index: 0, kind: input, shape index: {}]   ;;  %s624_s3 = inlined_call_operand.vmem [shape: bf16[32,128], index: 3, kind: input, shape index: {}]   ;;  %s625_s1 = inlined_call_operand.vmem [shape: bf16[1,32], index: 1, kind: input, shape index: {}]   ;;  %s626_s2 = inlined_call_operand.vmem [shape: bf16[1,32], index: 2, kind: input, shape index: {}]   ;;  %s627_s4 = inlined_call_operand.vmem [shape: bf16[1,128], index: 4, kind: input, shape index: {}]   ;;  %s628_s5 = inlined_call_operand.vmem [shape: bf16[42,128], index: 5, kind: output, shape index: {}]  }
   0x1   :  { %v422_v0 = vld [vmem:[%s623_s0 + $0x8] sm:$0xff]   ;;  %v405_v1 = vld [vmem:[%s623_s0] sm:$0xff]   ;;  %v29_v5 = vld [vmem:[%s623_s0 + $0x10] sm:$0xf]  ;;  %445 = vmatprep.subr.bf16.mxu1 %v492_v47  ;;  %429 = vmatprep.subr.bf16.mxu0 %v492_v47  ;;  %v120_v54 = vlaneseq  ;;  %vm166_vm3 = vcmask 257024   ;;  %vm172_vm4 = vcmask 253952  }
   0x2   :  { %v410_v2 = vunpack.c.l.bf16 %v422_v0  ;;  %v411_v3 = vunpack.c.h.bf16 %v422_v0  ;;  %v406_v4 = vunpack.c.l.bf16 %v405_v1  ;;  %v407_v6 = vunpack.c.h.bf16 %v405_v1  ;;  %v30_v7 = vld [vmem:[%s623_s0 + $0x14] sm:$0x1]  ;;  %v451_v46 = vld [vmem:[%s624_s3 + $0x8] sm:$0xff]   ;;  %v452_v48 = vld [vmem:[%s624_s3] sm:$0xff]   ;;  %437 = vmatprep.mubr.msk.bf16.mxu1 %vm493_vm2, %v492_v47  ;;  %433 = vmatprep.mubr.msk.bf16.mxu0 %vm493_vm2, %v492_v47 }
   0x3   :  { %v35_v11 = vunpack.c.l.bf16 %v29_v5  ;;  %v36_v13 = vunpack.c.l.bf16 %v30_v7  ;;  %447 = vmatpush3.bf16.msra.mxu1 %v451_v46  ;;  %430 = vmatpush3.bf16.msra.mxu0 %v451_v46  ;;  %v121_v61 = vshrl.u32 %v120_v54, 7  ;;  %v118_v0 = vld [vmem:[%s625_s1] sm:$0x1] }
   0x4   :  { %v44_v8 = vsel %vm37_vm0, %v410_v2, 0.0  ;;  %v38_v9 = vsel %vm37_vm0, %v406_v4, 0.0  ;;  %v47_v10 = vsel %vm37_vm0, %v411_v3, 0.0  ;;  %v41_v12 = vsel %vm37_vm0, %v407_v6, 0.0  ;;  %446 = vmatprep.subr.bf16.mxu1 %v492_v47  ;;  %431 = vmatprep.subr.bf16.mxu0 %v492_v47 }
   0x5   :  { %45 = vadd.xlane.f32.xlu0 %v44_v8  ;;  %39 = vadd.xlane.f32.xlu1 %v38_v9  ;;  %v50_v14 = vsel %vm37_vm0, %v35_v11, 0.0  ;;  %v54_v15 = vsel %vm53_vm1, %v36_v13, 0.0  ;;  %v119_v5 = vunpack.c.l.bf16 %v118_v0 }
   0x7   :  { %448 = vmatpush3.bf16.msra.mxu1 %v452_v48  ;;  %432 = vmatpush3.bf16.msra.mxu0 %v452_v48 }
   0x9   :  { %48 = vadd.xlane.f32.xlu0 %v47_v10  ;;  %42 = vadd.xlane.f32.xlu1 %v41_v12 }
   0xd   :  { %51 = vadd.xlane.f32.xlu0 %v50_v14  ;;  %55 = vadd.xlane.f32.xlu1 %v54_v15 }
  0x8e   :  { %v46_v16 = vpop.xlane.xlu0 %45  ;;  %v40_v17 = vpop.xlane.xlu1 %39 }
  0x8f   :  { %v60_v18 = vmul.f32 0.03125, %v46_v16  ;;  %v58_v19 = vmul.f32 0.03125, %v40_v17 }
  0x91   :  { %v542_v20 = vsub.f32 %v410_v2, %v60_v18  ;;  %v544_v21 = vsub.f32 %v406_v4, %v58_v19 }
  0x92   :  { %v49_v22 = vpop.xlane.xlu0 %48  ;;  %v43_v23 = vpop.xlane.xlu1 %42 }
  0x93   :  { %v61_v24 = vmul.f32 0.03125, %v49_v22  ;;  %v72_v25 = vmul.f32 %v542_v20, %v542_v20  ;;  %v59_v26 = vmul.f32 0.03125, %v43_v23  ;;  %v70_v27 = vmul.f32 %v544_v21, %v544_v21 }
  0x95   :  { %v550_v28 = vsub.f32 %v411_v3, %v61_v24  ;;  %v82_v29 = vsel %vm37_vm0, %v72_v25, 0.0  ;;  %v553_v30 = vsub.f32 %v407_v6, %v59_v26  ;;  %v76_v32 = vsel %vm37_vm0, %v70_v27, 0.0  ;;  %v130_v3 = vld [vmem:[%s626_s2] sm:$0x1] }
  0x96   :  { %83 = vadd.xlane.f32.xlu0 %v82_v29  ;;  %v52_v31 = vpop.xlane.xlu0 %51  ;;  %v56_v33 = vpop.xlane.xlu1 %55  ;;  %v122_v6 = vsub.s32 0, %v121_v61  ;;  %v131_v8 = vunpack.c.l.bf16 %v130_v3 }
  0x97   :  { %v62_v34 = vmul.f32 0.03125, %v52_v31  ;;  %v73_v35 = vmul.f32 %v550_v28, %v550_v28  ;;  %v63_v36 = vmul.f32 0.03125, %v56_v33  ;;  %v71_v37 = vmul.f32 %v553_v30, %v553_v30 }
  0x98   :  { %v123_v10 = vrot.slane %v119_v5, %v122_v6  ;;  %v135_v12 = vrot.slane %v131_v8, %v122_v6 }
  0x99   :  { %v560_v38 = vsub.f32 %v35_v11, %v62_v34  ;;  %v85_v39 = vsel %vm37_vm0, %v73_v35, 0.0  ;;  %v563_v40 = vsub.f32 %v36_v13, %v63_v36  ;;  %v79_v42 = vsel %vm37_vm0, %v71_v37, 0.0 }
  0x9a   :  { %86 = vadd.xlane.f32.xlu1 %v85_v39  ;;  %77 = vadd.xlane.f32.xlu0 %v76_v32 }
  0x9b   :  { %v74_v41 = vmul.f32 %v560_v38, %v560_v38  ;;  %v75_v43 = vmul.f32 %v563_v40, %v563_v40 }
  0x9d   :  { %v88_v44 = vsel %vm37_vm0, %v74_v41, 0.0  ;;  %v91_v45 = vsel %vm53_vm1, %v75_v43, 0.0 }
  0x9e   :  { %89 = vadd.xlane.f32.xlu0 %v88_v44  ;;  %80 = vadd.xlane.f32.xlu1 %v79_v42 }
  0xa2   :  { %92 = vadd.xlane.f32.xlu1 %v91_v45  ;;  %v184_v45 = vld [vmem:[%s627_s4] sm:$0x1] }
  0xa3   :  { %v185_v46 = vunpack.c.l.bf16 %v184_v45 }
  0xa5   :  { %v189_v48 = vrot.slane %v185_v46, %v122_v6 }
 0x11f   :  { %v84_v49 = vpop.xlane.xlu0 %83 }
 0x120   :  { %v96_v50 = vmul.f32 0.03125, %v84_v49 }
 0x122   :  { %v102_v51 = vadd.f32 1e-05, %v96_v50 }
 0x123   :  { %v78_v52 = vpop.xlane.xlu0 %77  ;;  %v87_v53 = vpop.xlane.xlu1 %86 }
 0x124   :  { %456 = vrsqrt.f32 %v102_v51  ;;  %v94_v55 = vmul.f32 0.03125, %v78_v52  ;;  %v97_v56 = vmul.f32 0.03125, %v87_v53 }
 0x126   :  { %v100_v57 = vadd.f32 1e-05, %v94_v55  ;;  %v103_v58 = vadd.f32 1e-05, %v97_v56 }
 0x127   :  { %v90_v59 = vpop.xlane.xlu0 %89  ;;  %v81_v60 = vpop.xlane.xlu1 %80 }
 0x128   :  { %458 = vrsqrt.f32 %v100_v57  ;;  %v98_v62 = vmul.f32 0.03125, %v90_v59  ;;  %v95_v63 = vmul.f32 0.03125, %v81_v60 }
 0x129   :  { %460 = vrsqrt.f32 %v103_v58 }
 0x12a   :  { %v104_v1 = vadd.f32 1e-05, %v98_v62  ;;  %v101_v2 = vadd.f32 1e-05, %v95_v63 }
 0x12b   :  { %v93_v4 = vpop.xlane.xlu1 %92 }
 0x12c   :  { %462 = vrsqrt.f32 %v104_v1  ;;  %v99_v7 = vmul.f32 0.03125, %v93_v4 }
 0x12d   :  { %464 = vrsqrt.f32 %v101_v2 }
 0x12e   :  { %v105_v9 = vadd.f32 1e-05, %v99_v7 }
 0x130   :  { %466 = vrsqrt.f32 %v105_v9 }
 0x131   :  { %v457_v11 = vpop.eup %456 }
 0x132   :  { %v114_v13 = vmul.f32 %v457_v11, %v542_v20 }
 0x134   :  { %v126_v14 = vmul.f32 %v123_v10, %v114_v13 }
 0x135   :  { %v459_v15 = vpop.eup %458 }
 0x136   :  { %v461_v16 = vpop.eup %460  ;;  %v138_v17 = vadd.f32 %v135_v12, %v126_v14  ;;  %v112_v18 = vmul.f32 %v459_v15, %v544_v21 }
 0x137   :  { %v115_v19 = vmul.f32 %v461_v16, %v550_v28 }
 0x138   :  { %v394_v22 = vpack.c.bf16 %v138_v17, %v138_v17  ;;  %v124_v23 = vmul.f32 %v123_v10, %v112_v18 }
 0x139   :  { %v463_v24 = vpop.eup %462  ;;  %v127_v25 = vmul.f32 %v123_v10, %v115_v19 }
 0x13a   :  { %v465_v26 = vpop.eup %464  ;;  %169 = vst.msk [vmem:[#allocation2 + $0x8] sm:$0xf] %vm166_vm3, %v394_v22  ;;  %v136_v27 = vadd.f32 %v135_v12, %v124_v23  ;;  %v116_v29 = vmul.f32 %v463_v24, %v560_v38 }
 0x13b   :  { %v139_v20 = vadd.f32 %v135_v12, %v127_v25  ;;  %v113_v31 = vmul.f32 %v465_v26, %v553_v30 }
 0x13c   :  { %v392_v32 = vpack.c.bf16 %v136_v27, %v136_v27  ;;  %v128_v33 = vmul.f32 %v123_v10, %v116_v29 }
 0x13d   :  { %v467_v34 = vpop.eup %466  ;;  %v395_v21 = vpack.c.bf16 %v139_v20, %v139_v20  ;;  %v125_v35 = vmul.f32 %v123_v10, %v113_v31 }
 0x13e   :  { %167 = vst.msk [vmem:[#allocation2] sm:$0xf] %vm166_vm3, %v392_v32  ;;  %v140_v28 = vadd.f32 %v135_v12, %v128_v33  ;;  %v117_v36 = vmul.f32 %v467_v34, %v563_v40 }
 0x13f   :  { %170 = vst.msk [vmem:[#allocation2 + $0xc] sm:$0xf] %vm166_vm3, %v395_v21  ;;  %v137_v37 = vadd.f32 %v135_v12, %v125_v35 }
 0x140   :  { %v396_v39 = vpack.c.bf16 %v140_v28, %v140_v28  ;;  %v129_v41 = vmul.f32 %v123_v10, %v117_v36 }
 0x141   :  { %v393_v42 = vpack.c.bf16 %v137_v37, %v137_v37 }
 0x142   :  { %171 = vst.msk [vmem:[#allocation2 + $0x10] sm:$0xf] %vm166_vm3, %v396_v39  ;;  %v141_v38 = vadd.f32 %v135_v12, %v129_v41 }
 0x143   :  { %168 = vst.msk [vmem:[#allocation2 + $0x4] sm:$0xf] %vm166_vm3, %v393_v42 }
 0x144   :  { %v397_v30 = vpack.c.bf16 %v141_v38, %v141_v38 }
 0x146   :  { %173 = vst.msk [vmem:[#allocation2 + $0x14] sm:$0x1] %vm172_vm4, %v397_v30  ;;  %v453_v43 = vld [vmem:[#allocation2 + $0x8] sm:$0xff]  }
 0x147   :  { %438 = vmatmul.mubr.msk.bf16.vlgmr.msra.gmra.mxu1 %vm37_vm0, %v453_v43 }
 0x148   :  { %441 = vmatprep.mubr.msk.bf16.mxu1 %vm493_vm2, %v492_v47 }
 0x14a   :  { %v454_v40 = vld [vmem:[#allocation2] sm:$0xff]  }
 0x14b   :  { %434 = vmatmul.mubr.msk.bf16.vlgmr.msra.gmra.mxu0 %vm37_vm0, %v454_v40 }
 0x14d   :  { %v455_v44 = vld [vmem:[#allocation2 + $0x10] sm:$0x1f]  }
 0x14f   :  { %442 = vmatmul.mubr.msk.bf16.gmra.mxu1 %vm37_vm0, %v455_v44 }
 0x207   :  { %v269_v49 = vpop.f32.mrf.mxu1 }
 0x208   :  { %v270_v50 = vadd.f32 %v269_v49, %v189_v48 }
 0x209   :  { %v439_v51 = vpop.f32.mrf.mxu1 }
 0x20a   :  { %v382_v52 = vmul.f32 -1.702, %v270_v50 }
 0x20b   :  { %v261_v53 = vpop.f32.mrf.mxu0  ;;  %v272_v54 = vpop.f32.mrf.mxu1 }
 0x20c   :  { %v300_v55 = vmul.f32 1.442695, %v382_v52  ;;  %v262_v47 = vadd.f32 %v261_v53, %v189_v48  ;;  %v273_v56 = vadd.f32 %v272_v54, %v189_v48 }
 0x20d   :  { %v435_v57 = vpop.f32.mrf.mxu0  ;;  %v440_v58 = vpop.f32.mrf.mxu1 }
 0x20e   :  { %468 = vpow2.f32 %v300_v55  ;;  %v380_v59 = vmul.f32 -1.702, %v262_v47  ;;  %v383_v60 = vmul.f32 -1.702, %v273_v56 }
 0x20f   :  { %v264_v61 = vpop.f32.mrf.mxu0  ;;  %v277_v62 = vpop.f32.mrf.mxu1 }
 0x210   :  { %v296_v63 = vmul.f32 1.442695, %v380_v59  ;;  %v302_v0 = vmul.f32 1.442695, %v383_v60  ;;  %v265_v1 = vadd.f32 %v264_v61, %v189_v48  ;;  %v278_v2 = vadd.f32 %v277_v62, %v189_v48 }
 0x211   :  { %v436_v3 = vpop.f32.mrf.mxu0  ;;  %v443_v4 = vpop.f32.mrf.mxu1 }
 0x212   :  { %470 = vpow2.f32 %v296_v63  ;;  %v381_v5 = vmul.f32 -1.702, %v265_v1  ;;  %v384_v6 = vmul.f32 -1.702, %v278_v2 }
 0x213   :  { %472 = vpow2.f32 %v302_v0  ;;  %v280_v7 = vpop.f32.mrf.mxu1 }
 0x214   :  { %v298_v8 = vmul.f32 1.442695, %v381_v5  ;;  %v304_v9 = vmul.f32 1.442695, %v384_v6  ;;  %v281_v10 = vadd.f32 %v280_v7, %v189_v48 }
 0x215   :  { %v444_v11 = vpop.f32.mrf.mxu1 }
 0x216   :  { %474 = vpow2.f32 %v298_v8  ;;  %v385_v12 = vmul.f32 -1.702, %v281_v10 }
 0x217   :  { %476 = vpow2.f32 %v304_v9 }
 0x218   :  { %v306_v13 = vmul.f32 1.442695, %v385_v12 }
 0x21a   :  { %478 = vpow2.f32 %v306_v13 }
 0x21b   :  { %v469_v14 = vpop.eup %468 }
 0x21c   :  { %v310_v15 = vadd.f32 1.0, %v469_v14 }
 0x21e   :  { %480 = vrcp.f32 %v310_v15 }
 0x21f   :  { %v471_v16 = vpop.eup %470 }
 0x220   :  { %v473_v17 = vpop.eup %472  ;;  %v308_v18 = vadd.f32 1.0, %v471_v16 }
 0x221   :  { %v311_v19 = vadd.f32 1.0, %v473_v17 }
 0x223   :  { %v475_v22 = vpop.eup %474  ;;  %482 = vrcp.f32 %v311_v19 }
 0x224   :  { %v477_v23 = vpop.eup %476  ;;  %484 = vrcp.f32 %v308_v18  ;;  %v309_v24 = vadd.f32 1.0, %v475_v22 }
 0x225   :  { %v312_v25 = vadd.f32 1.0, %v477_v23 }
 0x226   :  { %486 = vrcp.f32 %v309_v24 }
 0x227   :  { %v479_v26 = vpop.eup %478  ;;  %488 = vrcp.f32 %v312_v25 }
 0x228   :  { %v313_v27 = vadd.f32 1.0, %v479_v26 }
 0x22a   :  { %490 = vrcp.f32 %v313_v27 }
 0x22b   :  { %v481_v29 = vpop.eup %480 }
 0x22c   :  { %v328_v32 = vmul.f32 %v481_v29, %v270_v50 }
 0x230   :  { %v483_v20 = vpop.eup %482 }
 0x231   :  { %v485_v31 = vpop.eup %484  ;;  %v329_v33 = vmul.f32 %v483_v20, %v273_v56 }
 0x232   :  { %v326_v28 = vmul.f32 %v485_v31, %v262_v47 }
 0x233   :  { %v487_v34 = vpop.eup %486  ;;  %v420_v21 = vpack.c.bf16 %v329_v33, %v328_v32 }
 0x234   :  { %v489_v35 = vpop.eup %488  ;;  %v327_v36 = vmul.f32 %v487_v34, %v265_v1 }
 0x235   :  { %423 = vst [vmem:[%s628_s5 + $0x8] sm:$0xff] %v420_v21   ;;  %v330_v37 = vmul.f32 %v489_v35, %v278_v2 }
 0x236   :  { %v415_v39 = vpack.c.bf16 %v327_v36, %v326_v28 }
 0x237   :  { %v491_v41 = vpop.eup %490  ;;  %v402_v42 = vpack.c.bf16 %v330_v37, %v330_v37 }
 0x238   :  { %416 = vst [vmem:[%s628_s5] sm:$0xff] %v415_v39   ;;  %v331_v38 = vmul.f32 %v491_v41, %v281_v10 }
 0x239   :  { %360 = vst [vmem:[%s628_s5 + $0x10] sm:$0xf] %v402_v42 }
 0x23a   :  { %v403_v30 = vpack.c.bf16 %v331_v38, %v331_v38 }
 0x23c   :  { %361 = vst [vmem:[%s628_s5 + $0x14] sm:$0x1] %v403_v30 }

// kernel: _lambda_.27
= control target key start
LH: loop header
LB: loop body
LE: loop exit
PB: predicated region body
PF: predicated region fallthrough
CT: control target
= control target key end

     0   :  { %s1674_s15 = smov 0   ;;  %s1676_s16 = smov 0   ;;  %s1858_s0 = inlined_call_operand.vmem [shape: bf16[2,21,96], index: 0, kind: input, shape index: {}]   ;;  %s1859_s1 = inlined_call_operand.vmem [shape: bf16[2,21,32], index: 1, kind: input, shape index: {}]   ;;  %s1860_s2 = inlined_call_operand.vmem [shape: bf16[32,32], index: 2, kind: input, shape index: {}]   ;;  %s1861_s3 = inlined_call_operand.vmem [shape: bf16[1,32], index: 3, kind: input, shape index: {}]   ;;  %s1862_s4 = inlined_call_operand.vmem [shape: bf16[2,21,32], index: 4, kind: output, shape index: {}]  }
   0x1   :  { %s1678_s17 = smov 0  }
   0x2 LB: > { %s26_s18 = sadd.s32 1, %s1627_s16  ;;  %p1322_p0 = scmp.ge.s32.totalorder %s1631_s17, 1  ;;  %s1631_s17 = sphi %s1678_s17, %s14_s17   ;;  %s1627_s16 = sphi %s1676_s16, %s1864_s16   ;;  %s1623_s15 = sphi %s1674_s15, %s1863_s15  }
   0x3   : > { %p28_p1 = scmp.ge.s32.totalorder %s26_s18, 2  ;;  %p200_p2 = scmp.lt.s32.totalorder %s1631_s17, 3 }
   0x5   : > { %s1866_s18 = smov (%p28_p1, %s26_s18), 0  ;;  %p201_p3 = pnand %p1322_p0, %p200_p2 }
   0x6   : > { %p239_p4 = scmp.lt.s32.totalorder (!%p201_p3), %s1623_s15, 1  ;;  %s1633_s23 = smov (!%p201_p3), 96  }
   0x7   : > { %204 = sbr.rel (%p201_p3) target bundleno = 2807 (0xaf7), region = 36  ;;  %s1634_s24 = smov (!%p201_p3), 64  }
   0x8   : > { %s1635_s25 = smov (!%p201_p3), 88   ;;  %s1637_s26 = smov (!%p201_p3), 120  }
   0x9   : > { %s1638_s27 = smov (!%p201_p3), 56   ;;  %s1639_s28 = smov (!%p201_p3), 80  }
   0xa   : > { %s1640_s29 = smov (!%p201_p3), 112   ;;  %s1641_s30 = smov (!%p201_p3), 48  }
   0xb   : > { %s1642_s5 = smov (!%p201_p3), 72   ;;  %s1643_s6 = smov (!%p201_p3), 104  }
   0xc   : > { %s1868_s15 = smov (!%p239_p4, %s1623_s15), 1  ;;  %vm288_vm0 = vcmask 64512   ;;  %vm356_vm1 = vcmask 167936   ;;  %vm349_vm2 = vcmask 171008   ;;  %vm397_vm3 = vcmask 1041408   ;;  %s1644_s7 = smov 40  }
   0xd   : > { %s1692_s19 = smul.u32 12, %s1868_s15  ;;  %vm398_vm4 = vcmask 1042432   ;;  %v1636_v20 = vmov 65535   ;;  %vm468_vm5 = vcmask 59392   ;;  %vm469_vm6 = vsmask.f32 2304 }
   0xe   : > { %v399_v21 = vsel %vm397_vm3, 4294967295, %v1636_v20  ;;  %vm470_vm7 = vmand %vm468_vm5, %vm469_vm6  ;;  %v471_v54 = vld [vmem:[#allocation3 + $0x8] sm:$0x7]  ;;  %vm465_vm8 = vcmask 60416   ;;  %s1645_s8 = smov 8   ;;  %s1646_s9 = smov 16  }
   0xf   : > { %s1698_s22 = scalar_lea.vmem %s1858_s0, %s1692_s19  ;;  %v1717_v24 = vsel %vm398_vm4, %v399_v21, 0  ;;  %vm672_vm9 = vcmask 124992   ;;  %vm669_vm11 = vcmask 126016   ;;  %vm875_vm12 = vcmask 190592   ;;  %s1647_s14 = smov 24  }
  0x10   : > { %v1549_v0 = vld [vmem:[%s1698_s22 + $0x8] ss:$0 sps:$4 sm:$0x77]   ;;  %v1550_v1 = vld [vmem:[%s1698_s22] sm:$0xff]   ;;  %vm673_vm10 = vmand %vm672_vm9, %vm469_vm6  ;;  %vm872_vm13 = vcmask 191616   ;;  %vm268_vm15 = vcmask 261120  }
  0x11   : > { %286 = vrot.lane.b32.xlu0 %v1549_v0, %s1633_s23  ;;  %1432 = vmatprep.mubr.msk.bf16.mxu0 %vm288_vm0, %v1550_v1  ;;  %v1713_v13 = vld [vmem:[%s1698_s22 + $0x8] ss:$0 sps:$4 sm:$0x77]   ;;  %v1725_v34 = vld [vmem:[%s1698_s22] sm:$0xff]   ;;  %vm876_vm14 = vmand %vm875_vm12, %vm469_vm6  ;;  %vm1215_vm4 = vcmask 256000  }
  0x12   : > { %vm1216_vm5 = vmand %vm1215_vm4, %vm469_vm6 }
  0x15   : > { %284 = vrot.lane.b32.xlu0 %v1550_v1, %s1633_s23  ;;  %s251_s23 = scalar_lea.vmem %s1859_s1, %s1692_s19 }
  0x83   : > { %v287_v2 = vpop.permute.xlu0 %286 }
  0x84   : > { %1500 = vmatprep.subr.msk.bf16.mxu0 %vm288_vm0, %v287_v2  ;;  %v299_v3 = vsel %vm288_vm0, %v287_v2, 0 }
  0x85   : > { %1429 = vmatpush3.bf16.xpose.msra.mxu0 %v299_v3 }
  0x87   : > { %v285_v4 = vpop.permute.xlu0 %284 }
  0x88   : > { %1501 = vmatprep.subr.msk.bf16.mxu0 %vm288_vm0, %v285_v4  ;;  %v296_v5 = vsel %vm288_vm0, %v285_v4, 0 }
  0x8d   : > { %1431 = vmatpush3.bf16.xpose.msra.mxu0 %v296_v5 }
  0x94   : > { %1433 = vmatmul.mubr.msk.bf16.vlgmr.msra.gmra.mxu0 %vm288_vm0, %v1549_v0 }
 0x154   : > { %v1434_v6 = vpop.f32.mrf.mxu0 }
 0x155   : > { %v357_v7 = vsel %vm356_vm1, %v1434_v6, -inf }
 0x156   : > { %358 = vmax.xlane.f32.xlu0 %v357_v7  ;;  %v335_v8 = vpop.f32.mrf.mxu0 }
 0x157   : > { %v350_v9 = vsel %vm349_vm2, %v335_v8, -inf }
 0x158   : > { %351 = vmax.xlane.f32.xlu1 %v350_v9  ;;  %v1435_v10 = vpop.f32.mrf.mxu0 }
 0x15a   : > { %v338_v11 = vpop.f32.mrf.mxu0 }
 0x15b   : > { %v353_v12 = vsel %vm349_vm2, %v338_v11, -inf }
 0x15c   : > { %354 = vmax.xlane.f32.xlu1 %v353_v12 }
 0x16c   : > { %491 = vrot.lane.b32.xlu0 %v1713_v13, %s1635_s25 }
 0x16d   : > { %388 = vrot.lane.b32.xlu1 %v1549_v0, %s1634_s24 }
 0x1df   : > { %v359_v14 = vpop.xlane.xlu0 %358 }
 0x1e0   : > { %v362_v15 = vsub.f32 %v1434_v6, %v359_v14 }
 0x1e1   : > { %v352_v16 = vpop.xlane.xlu1 %351 }
 0x1e2   : > { %v367_v17 = vmul.f32 1.442695, %v362_v15  ;;  %v360_v18 = vsub.f32 %v335_v8, %v352_v16 }
 0x1e3   : > { %v492_v39 = vpop.permute.xlu0 %491 }
 0x1e4   : > { %1561 = vpow2.f32 %v367_v17  ;;  %v363_v19 = vmul.f32 1.442695, %v360_v18  ;;  %v503_v48 = vsel %vm288_vm0, %v492_v39, 0 }
 0x1e5   : > { %v355_v22 = vpop.xlane.xlu1 %354 }
 0x1e6   : > { %1563 = vpow2.f32 %v363_v19  ;;  %v361_v23 = vsub.f32 %v338_v11, %v355_v22  ;;  %v1553_v22 = vld [vmem:[%s1698_s22 + $0x8] ss:$0 sps:$4 sm:$0x77]  }
 0x1e8   : > { %v365_v25 = vmul.f32 1.442695, %v361_v23  ;;  %v1751_v23 = vld [vmem:[%s1698_s22] sm:$0xff]  }
 0x1e9   : > { %v389_v26 = vpop.permute.xlu1 %388 }
 0x1ea   : > { %1565 = vpow2.f32 %v365_v25  ;;  %v402_v27 = vand.u32 %v1717_v24, %v389_v26 }
 0x1ec   : > { %1436 = vmatprep.subr.bf16.mxu1 %v402_v27 }
 0x1ed   : > { %1437 = vmatpush3.bf16.msra.mxu1 %v402_v27 }
 0x1f1   : > { %v1562_v28 = vpop.eup %1561 }
 0x1f2   : > { %v375_v29 = vsel %vm356_vm1, %v1562_v28, 0.0 }
 0x1f3   : > { %v1564_v30 = vpop.eup %1563  ;;  %376 = vadd.xlane.f32.xlu1 %v375_v29 }
 0x1f4   : > { %v369_v31 = vsel %vm349_vm2, %v1564_v30, 0.0 }
 0x1f7   : > { %v1566_v32 = vpop.eup %1565  ;;  %370 = vadd.xlane.f32.xlu1 %v369_v31 }
 0x1f8   : > { %v372_v33 = vsel %vm349_vm2, %v1566_v32, 0.0 }
 0x1fb   : > { %373 = vadd.xlane.f32.xlu1 %v372_v33 }
 0x20c   : > { %386 = vrot.lane.b32.xlu1 %v1550_v1, %s1634_s24 }
 0x210   : > { %489 = vrot.lane.b32.xlu1 %v1725_v34, %s1635_s25 }
 0x214   : > { %485 = vrot.lane.b32.xlu1 %v1725_v34, %s1637_s26 }
 0x218   : > { %487 = vrot.lane.b32.xlu1 %v1713_v13, %s1637_s26  ;;  %s262_s26 = scalar_lea.vmem %s1862_s4, %s1692_s19 }
 0x27c   : > { %v377_v35 = vpop.xlane.xlu1 %376 }
 0x27d   : > { %1567 = vrcp.f32 %v377_v35 }
 0x280   : > { %v371_v36 = vpop.xlane.xlu1 %370 }
 0x281   : > { %1569 = vrcp.f32 %v371_v36 }
 0x284   : > { %v374_v37 = vpop.xlane.xlu1 %373 }
 0x285   : > { %1571 = vrcp.f32 %v374_v37 }
 0x288   : > { %v387_v38 = vpop.permute.xlu1 %386 }
 0x289   : > { %1438 = vmatprep.subr.bf16.mxu1 %v387_v38 }
 0x28a   : > { %1439 = vmatpush3.bf16.msra.mxu1 %v387_v38  ;;  %v1568_v40 = vpop.eup %1567 }
 0x28b   : > { %1502 = vmatprep.subr.msk.bf16.mxu1 %vm288_vm0, %v492_v39  ;;  %v383_v44 = vmul.f32 %v1568_v40, %v1562_v28 }
 0x28c   : > { %v490_v42 = vpop.permute.xlu1 %489 }
 0x28d   : > { %v385_v49 = vpack.c.bf16 %v383_v44, %v383_v44  ;;  %v500_v51 = vsel %vm288_vm0, %v490_v42, 0 }
 0x28e   : > { %v1570_v41 = vpop.eup %1569 }
 0x28f   : > { %v381_v45 = vmul.f32 %v1570_v41, %v1564_v30 }
 0x290   : > { %v486_v50 = vpop.permute.xlu1 %485 }
 0x292   : > { %v1572_v43 = vpop.eup %1571 }
 0x293   : > { %v382_v46 = vmul.f32 %v1572_v43, %v1566_v32 }
 0x294   : > { %v488_v52 = vpop.permute.xlu1 %487 }
 0x295   : > { %v384_v47 = vpack.c.bf16 %v382_v46, %v381_v45 }
 0x297   : > { %1440 = vmatprep.mubr.msk.bf16.mxu1 %vm349_vm2, %v384_v47 }
 0x298   : > { %1441 = vmatmul.mubr.msk.bf16.vlgmr.msra.gmra.mxu1 %vm349_vm2, %v385_v49 }
 0x299   : > { %1445 = vmatpush3.bf16.xpose.msra.mxu1 %v503_v48  ;;  %1448 = vmatprep.mubr.msk.bf16.mxu1 %vm288_vm0, %v486_v50 }
 0x29a   : > { %1503 = vmatprep.subr.msk.bf16.mxu1 %vm288_vm0, %v490_v42 }
 0x2a1   : > { %1447 = vmatpush3.bf16.xpose.msra.mxu1 %v500_v51 }
 0x2a8   : > { %1449 = vmatmul.mubr.msk.bf16.vlgmr.msra.gmra.mxu1 %vm288_vm0, %v488_v52 }
 0x358   : > { %v1442_v53 = vpop.f32.mrf.mxu1 }
 0x359   : > { %v1375_v55 = vpack.c.bf16 %v1442_v53, %v1442_v53 }
 0x35a   : > { %v438_v56 = vpop.f32.mrf.mxu1 }
 0x35b   : > { %v472_v57 = vsel %vm470_vm7, %v1375_v55, %v471_v54  ;;  %v1373_v58 = vpack.c.bf16 %v438_v56, %v438_v56  ;;  %vm1212_vm7 = vcmask 257024  }
 0x35c   : > { %473 = vst [vmem:[#allocation3 + $0x8] sm:$0x7] %v472_v57  ;;  %v1443_v59 = vpop.f32.mrf.mxu1 }
 0x35d   : > { %466 = vst.msk [vmem:[#allocation3] sm:$0xf] %vm465_vm8, %v1373_v58 }
 0x35e   : > { %v441_v60 = vpop.f32.mrf.mxu1 }
 0x35f   : > { %v1374_v61 = vpack.c.bf16 %v441_v60, %v441_v60 }
 0x361   : > { %467 = vst.msk [vmem:[#allocation3 + $0x4] sm:$0xf] %vm465_vm8, %v1374_v61 }
 0x368   : > { %v1450_v62 = vpop.f32.mrf.mxu1 }
 0x369   : > { %v559_v3 = vsel %vm356_vm1, %v1450_v62, -inf }
 0x36a   : > { %v539_v63 = vpop.f32.mrf.mxu1 }
 0x36b   : > { %v553_v0 = vsel %vm349_vm2, %v539_v63, -inf }
 0x36c   : > { %554 = vmax.xlane.f32.xlu1 %v553_v0  ;;  %v1451_v1 = vpop.f32.mrf.mxu1 }
 0x36e   : > { %v542_v2 = vpop.f32.mrf.mxu1 }
 0x36f   : > { %v556_v4 = vsel %vm349_vm2, %v542_v2, -inf }
 0x370   : > { %560 = vmax.xlane.f32.xlu1 %v559_v3  ;;  %557 = vmax.xlane.f32.xlu0 %v556_v4 }
 0x381   : > { %590 = vrot.lane.b32.xlu1 %v1713_v13, %s1638_s27 }
 0x3f5   : > { %v555_v5 = vpop.xlane.xlu1 %554 }
 0x3f6   : > { %v562_v6 = vsub.f32 %v539_v63, %v555_v5 }
 0x3f8   : > { %v565_v11 = vmul.f32 1.442695, %v562_v6 }
 0x3f9   : > { %v561_v7 = vpop.xlane.xlu1 %560  ;;  %v558_v8 = vpop.xlane.xlu0 %557 }
 0x3fa   : > { %v564_v9 = vsub.f32 %v1450_v62, %v561_v7  ;;  %v563_v10 = vsub.f32 %v542_v2, %v558_v8  ;;  %v1780_v7 = vld [vmem:[%s1698_s22 + $0x8] ss:$0 sps:$4 sm:$0x77]   ;;  %v1784_v8 = vld [vmem:[%s1698_s22] sm:$0xff]  }
 0x3fc   : > { %v569_v12 = vmul.f32 1.442695, %v564_v9  ;;  %v567_v14 = vmul.f32 1.442695, %v563_v10 }
 0x3fd   : > { %v591_v15 = vpop.permute.xlu1 %590 }
 0x3fe   : > { %1573 = vpow2.f32 %v569_v12  ;;  %v600_v16 = vand.u32 %v591_v15, %v1717_v24 }
 0x3ff   : > { %1575 = vpow2.f32 %v567_v14 }
 0x400   : > { %1577 = vpow2.f32 %v565_v11  ;;  %1452 = vmatprep.subr.bf16.mxu0 %v600_v16 }
 0x401   : > { %1453 = vmatpush3.bf16.msra.mxu0 %v600_v16 }
 0x40b   : > { %v1574_v13 = vpop.eup %1573 }
 0x40c   : > { %v1576_v17 = vpop.eup %1575  ;;  %v577_v18 = vsel %vm356_vm1, %v1574_v13, 0.0 }
 0x40d   : > { %v1578_v19 = vpop.eup %1577  ;;  %578 = vadd.xlane.f32.xlu0 %v577_v18  ;;  %v574_v20 = vsel %vm349_vm2, %v1576_v17, 0.0 }
 0x40e   : > { %575 = vadd.xlane.f32.xlu1 %v574_v20  ;;  %v571_v21 = vsel %vm349_vm2, %v1578_v19, 0.0 }
 0x411   : > { %572 = vadd.xlane.f32.xlu0 %v571_v21 }
 0x41f   : > { %694 = vrot.lane.b32.xlu1 %v1553_v22, %s1639_s28 }
 0x423   : > { %692 = vrot.lane.b32.xlu1 %v1751_v23, %s1639_s28 }
 0x427   : > { %588 = vrot.lane.b32.xlu0 %v1725_v34, %s1638_s27  ;;  %690 = vrot.lane.b32.xlu1 %v1553_v22, %s1640_s29 }
 0x42b   : > { %688 = vrot.lane.b32.xlu0 %v1751_v23, %s1640_s29 }
 0x496   : > { %v579_v25 = vpop.xlane.xlu0 %578 }
 0x497   : > { %v576_v26 = vpop.xlane.xlu1 %575  ;;  %1579 = vrcp.f32 %v579_v25 }
 0x498   : > { %1581 = vrcp.f32 %v576_v26 }
 0x49a   : > { %v573_v27 = vpop.xlane.xlu0 %572 }
 0x49b   : > { %1583 = vrcp.f32 %v573_v27  ;;  %v695_v29 = vpop.permute.xlu1 %694 }
 0x49c   : > { %v706_v37 = vsel %vm288_vm0, %v695_v29, 0 }
 0x49e   : > { %v589_v28 = vpop.permute.xlu0 %588 }
 0x49f   : > { %1454 = vmatprep.subr.bf16.mxu0 %v589_v28  ;;  %v693_v40 = vpop.permute.xlu1 %692 }
 0x4a0   : > { %1455 = vmatpush3.bf16.msra.mxu0 %v589_v28  ;;  %v703_v41 = vsel %vm288_vm0, %v693_v40, 0 }
 0x4a1   : > { %1504 = vmatprep.subr.msk.bf16.mxu0 %vm288_vm0, %v695_v29 }
 0x4a2   : > { %v689_v39 = vpop.permute.xlu0 %688 }
 0x4a3   : > { %v691_v42 = vpop.permute.xlu1 %690 }
 0x4a4   : > { %v1580_v30 = vpop.eup %1579 }
 0x4a5   : > { %v1582_v31 = vpop.eup %1581  ;;  %v585_v33 = vmul.f32 %v1580_v30, %v1574_v13 }
 0x4a6   : > { %v584_v35 = vmul.f32 %v1582_v31, %v1576_v17 }
 0x4a7   : > { %v587_v38 = vpack.c.bf16 %v585_v33, %v585_v33 }
 0x4a8   : > { %v1584_v32 = vpop.eup %1583 }
 0x4a9   : > { %v583_v34 = vmul.f32 %v1584_v32, %v1578_v19 }
 0x4ab   : > { %v586_v36 = vpack.c.bf16 %v584_v35, %v583_v34 }
 0x4ad   : > { %1456 = vmatprep.mubr.msk.bf16.mxu0 %vm349_vm2, %v586_v36 }
 0x4ae   : > { %1457 = vmatmul.mubr.msk.bf16.vlgmr.msra.gmra.mxu0 %vm349_vm2, %v587_v38 }
 0x4af   : > { %1461 = vmatpush3.bf16.xpose.msra.mxu0 %v706_v37  ;;  %1464 = vmatprep.mubr.msk.bf16.mxu0 %vm288_vm0, %v689_v39 }
 0x4b0   : > { %1505 = vmatprep.subr.msk.bf16.mxu0 %vm288_vm0, %v693_v40 }
 0x4b7   : > { %1463 = vmatpush3.bf16.xpose.msra.mxu0 %v703_v41 }
 0x4be   : > { %1465 = vmatmul.mubr.msk.bf16.vlgmr.msra.gmra.mxu0 %vm288_vm0, %v691_v42 }
 0x56e   : > { %v1765_v43 = vpop.f32.mrf.mxu0 }
 0x570   : > { %v1767_v44 = vpop.f32.mrf.mxu0 }
 0x572   : > { %v1459_v45 = vpop.f32.mrf.mxu0 }
 0x574   : > { %v1769_v46 = vpop.f32.mrf.mxu0 }
 0x57e   : > { %v1466_v47 = vpop.f32.mrf.mxu0 }
 0x57f   : > { %v762_v52 = vsel %vm356_vm1, %v1466_v47, -inf }
 0x580   : > { %v742_v48 = vpop.f32.mrf.mxu0 }
 0x581   : > { %v756_v49 = vsel %vm349_vm2, %v742_v48, -inf }
 0x582   : > { %757 = vmax.xlane.f32.xlu0 %v756_v49  ;;  %v1467_v50 = vpop.f32.mrf.mxu0 }
 0x584   : > { %v745_v51 = vpop.f32.mrf.mxu0 }
 0x585   : > { %v759_v53 = vsel %vm349_vm2, %v745_v51, -inf }
 0x586   : > { %763 = vmax.xlane.f32.xlu0 %v762_v52  ;;  %760 = vmax.xlane.f32.xlu1 %v759_v53 }
 0x597   : > { %793 = vrot.lane.b32.xlu1 %v1553_v22, %s1641_s30 }
 0x60b   : > { %v758_v54 = vpop.xlane.xlu0 %757 }
 0x60c   : > { %v765_v55 = vsub.f32 %v742_v48, %v758_v54 }
 0x60e   : > { %v768_v60 = vmul.f32 1.442695, %v765_v55 }
 0x60f   : > { %v764_v56 = vpop.xlane.xlu0 %763  ;;  %v761_v57 = vpop.xlane.xlu1 %760 }
 0x610   : > { %v767_v58 = vsub.f32 %v1466_v47, %v764_v56  ;;  %v766_v59 = vsub.f32 %v745_v51, %v761_v57  ;;  %v1378_v57 = vpack.c.bf16 %v1765_v43, %v1765_v43 }
 0x612   : > { %v772_v61 = vmul.f32 1.442695, %v767_v58  ;;  %v770_v62 = vmul.f32 1.442695, %v766_v59  ;;  %v1376_v59 = vpack.c.bf16 %v1767_v44, %v1767_v44 }
 0x613   : > { %v794_v63 = vpop.permute.xlu1 %793 }
 0x614   : > { %1585 = vpow2.f32 %v772_v61  ;;  %v803_v0 = vand.u32 %v794_v63, %v1717_v24 }
 0x615   : > { %1587 = vpow2.f32 %v770_v62 }
 0x616   : > { %1589 = vpow2.f32 %v768_v60  ;;  %1468 = vmatprep.subr.bf16.mxu1 %v803_v0  ;;  %v1377_v60 = vpack.c.bf16 %v1769_v46, %v1769_v46  ;;  %v674_v46 = vld [vmem:[#allocation3 + $0x8] sm:$0x7] }
 0x617   : > { %1469 = vmatpush3.bf16.msra.mxu1 %v803_v0 }
 0x621   : > { %v1586_v1 = vpop.eup %1585 }
 0x622   : > { %v1588_v2 = vpop.eup %1587  ;;  %v780_v3 = vsel %vm356_vm1, %v1586_v1, 0.0 }
 0x623   : > { %v1590_v4 = vpop.eup %1589  ;;  %781 = vadd.xlane.f32.xlu0 %v780_v3  ;;  %v777_v5 = vsel %vm349_vm2, %v1588_v2, 0.0 }
 0x624   : > { %778 = vadd.xlane.f32.xlu1 %v777_v5  ;;  %v774_v6 = vsel %vm349_vm2, %v1590_v4, 0.0 }
 0x627   : > { %775 = vadd.xlane.f32.xlu0 %v774_v6 }
 0x635   : > { %897 = vrot.lane.b32.xlu1 %v1780_v7, %s1642_s5 }
 0x639   : > { %895 = vrot.lane.b32.xlu1 %v1784_v8, %s1642_s5 }
 0x63d   : > { %791 = vrot.lane.b32.xlu0 %v1751_v23, %s1641_s30  ;;  %893 = vrot.lane.b32.xlu1 %v1780_v7, %s1643_s6 }
 0x641   : > { %891 = vrot.lane.b32.xlu0 %v1784_v8, %s1643_s6 }
 0x6ac   : > { %v782_v9 = vpop.xlane.xlu0 %781 }
 0x6ad   : > { %v779_v10 = vpop.xlane.xlu1 %778  ;;  %1591 = vrcp.f32 %v782_v9 }
 0x6ae   : > { %1593 = vrcp.f32 %v779_v10 }
 0x6b0   : > { %v776_v11 = vpop.xlane.xlu0 %775 }
 0x6b1   : > { %1595 = vrcp.f32 %v776_v11  ;;  %v898_v14 = vpop.permute.xlu1 %897 }
 0x6b2   : > { %v909_v21 = vsel %vm288_vm0, %v898_v14, 0 }
 0x6b4   : > { %v792_v12 = vpop.permute.xlu0 %791 }
 0x6b5   : > { %1470 = vmatprep.subr.bf16.mxu1 %v792_v12  ;;  %v896_v25 = vpop.permute.xlu1 %895 }
 0x6b6   : > { %1471 = vmatpush3.bf16.msra.mxu1 %v792_v12  ;;  %v906_v26 = vsel %vm288_vm0, %v896_v25, 0 }
 0x6b7   : > { %1506 = vmatprep.subr.msk.bf16.mxu1 %vm288_vm0, %v898_v14 }
 0x6b8   : > { %v892_v23 = vpop.permute.xlu0 %891 }
 0x6b9   : > { %v894_v27 = vpop.permute.xlu1 %893 }
 0x6ba   : > { %v1592_v15 = vpop.eup %1591 }
 0x6bb   : > { %v1594_v16 = vpop.eup %1593  ;;  %v788_v17 = vmul.f32 %v1592_v15, %v1586_v1 }
 0x6bc   : > { %v787_v19 = vmul.f32 %v1594_v16, %v1588_v2 }
 0x6bd   : > { %v790_v22 = vpack.c.bf16 %v788_v17, %v788_v17 }
 0x6be   : > { %v1596_v13 = vpop.eup %1595 }
 0x6bf   : > { %v786_v18 = vmul.f32 %v1596_v13, %v1590_v4 }
 0x6c1   : > { %v789_v20 = vpack.c.bf16 %v787_v19, %v786_v18  ;;  %v1557_v19 = vld [vmem:[%s1860_s2 + $0x8] sm:$0xff]  }
 0x6c3   : > { %1472 = vmatprep.mubr.msk.bf16.mxu1 %vm349_vm2, %v789_v20  ;;  %v1558_v20 = vld [vmem:[%s1860_s2] sm:$0xff]  }
 0x6c4   : > { %1473 = vmatmul.mubr.msk.bf16.vlgmr.msra.gmra.mxu1 %vm349_vm2, %v790_v22 }
 0x6c5   : > { %1477 = vmatpush3.bf16.xpose.msra.mxu1 %v909_v21  ;;  %1480 = vmatprep.mubr.msk.bf16.mxu1 %vm288_vm0, %v892_v23 }
 0x6c6   : > { %1507 = vmatprep.subr.msk.bf16.mxu1 %vm288_vm0, %v896_v25 }
 0x6cd   : > { %1479 = vmatpush3.bf16.xpose.msra.mxu1 %v906_v26 }
 0x6d4   : > { %1481 = vmatmul.mubr.msk.bf16.vlgmr.msra.gmra.mxu1 %vm288_vm0, %v894_v27  ;;  %vm271_vm0 = vcmask 258048  }
 0x784   : > { %v1474_v28 = vpop.f32.mrf.mxu1 }
 0x785   : > { %v1381_v58 = vpack.c.bf16 %v1474_v28, %v1474_v28 }
 0x786   : > { %v839_v29 = vpop.f32.mrf.mxu1 }
 0x787   : > { %v1379_v61 = vpack.c.bf16 %v839_v29, %v839_v29  ;;  %v1648_v29 = vmov 0.0  }
 0x788   : > { %v1475_v30 = vpop.f32.mrf.mxu1  ;;  %272 = vst.msk [vmem:[#allocation2 + $0x10] sm:$0x1f] %vm271_vm0, %v1648_v29 }
 0x789   : > { %269 = vst.msk [vmem:[#allocation2] sm:$0xff] %vm268_vm15, %v1648_v29  ;;  %270 = vst.msk [vmem:[#allocation2 + $0x8] sm:$0xff] %vm268_vm15, %v1648_v29 }
 0x78a   : > { %v842_v31 = vpop.f32.mrf.mxu1 }
 0x78b   : > { %v1380_v62 = vpack.c.bf16 %v842_v31, %v842_v31 }
 0x794   : > { %v1482_v32 = vpop.f32.mrf.mxu1 }
 0x795   : > { %v965_v37 = vsel %vm356_vm1, %v1482_v32, -inf }
 0x796   : > { %v945_v33 = vpop.f32.mrf.mxu1 }
 0x797   : > { %v959_v34 = vsel %vm349_vm2, %v945_v33, -inf }
 0x798   : > { %960 = vmax.xlane.f32.xlu0 %v959_v34  ;;  %v1483_v35 = vpop.f32.mrf.mxu1 }
 0x79a   : > { %v948_v36 = vpop.f32.mrf.mxu1 }
 0x79b   : > { %v962_v38 = vsel %vm349_vm2, %v948_v36, -inf }
 0x79c   : > { %966 = vmax.xlane.f32.xlu0 %v965_v37  ;;  %963 = vmax.xlane.f32.xlu1 %v962_v38  ;;  %v1183_v37 = vlaneseq  ;;  %v1085_v38 = vld [vmem:[#allocation2 + $0x10] sm:$0x1f] }
 0x821   : > { %v961_v39 = vpop.xlane.xlu0 %960 }
 0x822   : > { %v968_v40 = vsub.f32 %v945_v33, %v961_v39  ;;  %v1184_v39 = vshrl.u32 %v1183_v37, 7 }
 0x824   : > { %v971_v48 = vmul.f32 1.442695, %v968_v40 }
 0x825   : > { %v967_v41 = vpop.xlane.xlu0 %966  ;;  %v964_v42 = vpop.xlane.xlu1 %963 }
 0x826   : > { %v970_v45 = vsub.f32 %v1482_v32, %v967_v41  ;;  %v969_v47 = vsub.f32 %v948_v36, %v964_v42  ;;  %v1181_v41 = vld [vmem:[%s1861_s3] sm:$0x1] }
 0x827   : > { %v1083_v42 = vld [vmem:[#allocation2] sm:$0xff] }
 0x828   : > { %v975_v49 = vmul.f32 1.442695, %v970_v45  ;;  %v973_v50 = vmul.f32 1.442695, %v969_v47 }
 0x82a   : > { %1597 = vpow2.f32 %v975_v49  ;;  %v1185_v49 = vsub.s32 0, %v1184_v39 }
 0x82b   : > { %1599 = vpow2.f32 %v973_v50 }
 0x82c   : > { %1601 = vpow2.f32 %v971_v48  ;;  %v1182_v48 = vunpack.c.l.bf16 %v1181_v41 }
 0x837   : > { %v1598_v51 = vpop.eup %1597 }
 0x838   : > { %v1600_v52 = vpop.eup %1599  ;;  %v983_v53 = vsel %vm356_vm1, %v1598_v51, 0.0  ;;  %vm1075_vm1 = vcmask 257216  }
 0x839   : > { %v1602_v54 = vpop.eup %1601  ;;  %984 = vadd.xlane.f32.xlu0 %v983_v53  ;;  %v980_v55 = vsel %vm349_vm2, %v1600_v52, 0.0  ;;  %v1192_v53 = vld [vmem:[%s251_s23 + $0x8] sm:$0x7] }
 0x83a   : > { %981 = vadd.xlane.f32.xlu1 %v980_v55  ;;  %v977_v56 = vsel %vm349_vm2, %v1602_v54, 0.0  ;;  %v1186_v55 = vrot.slane %v1182_v48, %v1185_v49 }
 0x83d   : > { %978 = vadd.xlane.f32.xlu0 %v977_v56 }
 0x84b   : > { %996 = vrot.lane.b32.xlu1 %v1780_v7, %s1644_s7 }
 0x84f   : > { %664 = vrot.lane.b32.xlu1 %v1378_v57, %s1645_s8  ;;  %v1389_v57 = vld [vmem:[%s251_s23] sm:$0xff]  }
 0x853   : > { %867 = vrot.lane.b32.xlu1 %v1381_v58, %s1646_s9  ;;  %994 = vrot.lane.b32.xlu0 %v1784_v8, %s1644_s7  ;;  %v1195_v58 = vunpack.c.l.bf16 %v1192_v53 }
 0x857   : > { %662 = vrot.lane.b32.xlu1 %v1377_v60, %s1645_s8  ;;  %660 = vrot.lane.b32.xlu0 %v1376_v59, %s1645_s8 }
 0x85b   : > { %865 = vrot.lane.b32.xlu1 %v1380_v62, %s1646_s9  ;;  %863 = vrot.lane.b32.xlu0 %v1379_v61, %s1646_s9  ;;  %v1390_v61 = vunpack.c.l.bf16 %v1389_v57 }
 0x8c2   : > { %v985_v43 = vpop.xlane.xlu0 %984 }
 0x8c3   : > { %v982_v63 = vpop.xlane.xlu1 %981  ;;  %1603 = vrcp.f32 %v985_v43 }
 0x8c4   : > { %1605 = vrcp.f32 %v982_v63 }
 0x8c6   : > { %v979_v0 = vpop.xlane.xlu0 %978 }
 0x8c7   : > { %1607 = vrcp.f32 %v979_v0  ;;  %v997_v1 = vpop.permute.xlu1 %996  ;;  %v1217_v0 = vld [vmem:[%s262_s26 + $0x8] sm:$0x7] }
 0x8c8   : > { %v1006_v2 = vand.u32 %v997_v1, %v1717_v24 }
 0x8ca   : > { %v995_v44 = vpop.permute.xlu0 %994  ;;  %1484 = vmatprep.subr.bf16.mxu0 %v1006_v2 }
 0x8cb   : > { %v665_v3 = vpop.permute.xlu1 %664  ;;  %1485 = vmatpush3.bf16.msra.mxu0 %v1006_v2 }
 0x8cc   : > { %v675_v4 = vsel %vm673_vm10, %v665_v3, %v674_v46  ;;  %1486 = vmatprep.subr.bf16.mxu0 %v995_v44 }
 0x8cd   : > { %676 = vst [vmem:[#allocation3 + $0x8] sm:$0x7] %v675_v4 }
 0x8ce   : > { %v661_v5 = vpop.permute.xlu0 %660 }
 0x8cf   : > { %670 = vst.msk [vmem:[#allocation3] sm:$0xf] %vm669_vm11, %v661_v5  ;;  %v868_v6 = vpop.permute.xlu1 %867  ;;  %1487 = vmatpush3.bf16.msra.mxu0 %v995_v44  ;;  %v1391_v44 = vunpack.c.h.bf16 %v1389_v57 }
 0x8d0   : > { %v1604_v7 = vpop.eup %1603  ;;  %1492 = vmatprep.subr.bf16.mxu0 %v1557_v19 }
 0x8d1   : > { %v1606_v24 = vpop.eup %1605  ;;  %v991_v12 = vmul.f32 %v1604_v7, %v1598_v51 }
 0x8d2   : > { %v864_v8 = vpop.permute.xlu0 %863  ;;  %v990_v16 = vmul.f32 %v1606_v24, %v1600_v52  ;;  %v1084_v52 = vld [vmem:[#allocation2 + $0x8] sm:$0xff] }
 0x8d3   : > { %873 = vst.msk [vmem:[#allocation3] sm:$0xf] %vm872_vm13, %v864_v8  ;;  %v663_v9 = vpop.permute.xlu1 %662  ;;  %v993_v18 = vpack.c.bf16 %v991_v12, %v991_v12 }
 0x8d4   : > { %v1608_v10 = vpop.eup %1607  ;;  %v877_v11 = vld [vmem:[#allocation3 + $0x8] sm:$0x7]  ;;  %671 = vst.msk [vmem:[#allocation3 + $0x4] sm:$0xf] %vm669_vm11, %v663_v9 }
 0x8d5   : > { %v878_v14 = vsel %vm876_vm14, %v868_v6, %v877_v11  ;;  %v989_v15 = vmul.f32 %v1608_v10, %v1602_v54 }
 0x8d6   : > { %879 = vst [vmem:[#allocation3 + $0x8] sm:$0x7] %v878_v14 }
 0x8d7   : > { %v866_v13 = vpop.permute.xlu1 %865  ;;  %v992_v17 = vpack.c.bf16 %v990_v16, %v989_v15 }
 0x8d8   : > { %874 = vst.msk [vmem:[#allocation3 + $0x4] sm:$0xf] %vm872_vm13, %v866_v13 }
 0x8d9   : > { %1488 = vmatprep.mubr.msk.bf16.mxu0 %vm349_vm2, %v992_v17 }
 0x8da   : > { %1489 = vmatmul.mubr.msk.bf16.vlgmr.msra.gmra.mxu0 %vm349_vm2, %v993_v18  ;;  %vm1078_vm2 = vcmask 256192  }
 0x8db   : > { %1493 = vmatpush3.bf16.msra.mxu0 %v1557_v19  ;;  %vm1079_vm3 = vmand %vm1078_vm2, %vm469_vm6 }
 0x8dc   : > { %1494 = vmatprep.subr.bf16.mxu0 %v1558_v20 }
 0x8dd   : > { %v1080_v32 = vld [vmem:[#allocation3 + $0x8] sm:$0x7] }
 0x8df   : > { %1495 = vmatpush3.bf16.msra.mxu0 %v1558_v20 }
 0x99a   : > { %v1490_v21 = vpop.f32.mrf.mxu0 }
 0x99b   : > { %v1384_v27 = vpack.c.bf16 %v1490_v21, %v1490_v21 }
 0x99c   : > { %v1042_v22 = vpop.f32.mrf.mxu0 }
 0x99d   : > { %v1382_v23 = vpack.c.bf16 %v1042_v22, %v1042_v22 }
 0x99e   : > { %v1491_v25 = vpop.f32.mrf.mxu0 }
 0x99f   : > { %1066 = vrot.lane.b32.xlu0 %v1382_v23, %s1647_s14 }
 0x9a0   : > { %v1045_v26 = vpop.f32.mrf.mxu0 }
 0x9a1   : > { %v1383_v28 = vpack.c.bf16 %v1045_v26, %v1045_v26 }
 0x9a3   : > { %1070 = vrot.lane.b32.xlu0 %v1384_v27, %s1647_s14  ;;  %1068 = vrot.lane.b32.xlu1 %v1383_v28, %s1647_s14 }
 0xa11   : > { %v1067_v30 = vpop.permute.xlu0 %1066 }
 0xa12   : > { %1076 = vst.msk [vmem:[#allocation3] sm:$0xf] %vm1075_vm1, %v1067_v30 }
 0xa15   : > { %v1071_v31 = vpop.permute.xlu0 %1070  ;;  %v1069_v33 = vpop.permute.xlu1 %1068 }
 0xa16   : > { %v1081_v34 = vsel %vm1079_vm3, %v1071_v31, %v1080_v32  ;;  %1077 = vst.msk [vmem:[#allocation3 + $0x4] sm:$0xf] %vm1075_vm1, %v1069_v33 }
 0xa17   : > { %1082 = vst [vmem:[#allocation3 + $0x8] sm:$0x7] %v1081_v34 }
 0xa1d   : > { %v1559_v35 = vld [vmem:[#allocation3] sm:$0xff]  }
 0xa1e   : > { %v1560_v36 = vld [vmem:[#allocation3 + $0x8] ss:$0 sps:$4 sm:$0x77]   ;;  %1496 = vmatprep.mubr.msk.bf16.mxu0 %vm268_vm15, %v1559_v35 }
 0xa1f   : > { %1497 = vmatmul.mubr.msk.bf16.vlgmr.msra.gmra.mxu0 %vm268_vm15, %v1560_v36 }
 0xadf   : > { %v1498_v40 = vpop.f32.mrf.mxu0 }
 0xae0   : > { %v1170_v45 = vadd.f32 %v1498_v40, %v1085_v38 }
 0xae1   : > { %v1154_v47 = vpop.f32.mrf.mxu0 }
 0xae2   : > { %1174 = vst.msk [vmem:[#allocation2 + $0x10] sm:$0x1f] %vm271_vm0, %v1170_v45  ;;  %v1168_v50 = vadd.f32 %v1154_v47, %v1083_v42 }
 0xae3   : > { %v1499_v51 = vpop.f32.mrf.mxu0 }
 0xae4   : > { %1171 = vst.msk [vmem:[#allocation2] sm:$0xff] %vm268_vm15, %v1168_v50 }
 0xae5   : > { %v1157_v54 = vpop.f32.mrf.mxu0 }
 0xae6   : > { %v1169_v56 = vadd.f32 %v1157_v54, %v1084_v52 }
 0xae8   : > { %1172 = vst.msk [vmem:[#allocation2 + $0x8] sm:$0xff] %vm268_vm15, %v1169_v56 }
 0xae9   : > { %v1180_v59 = vld [vmem:[#allocation2 + $0x10] sm:$0x1f] }
 0xaea   : > { %v1189_v60 = vadd.f32 %v1186_v55, %v1180_v59 }
 0xaeb   : > { %v1178_v62 = vld [vmem:[#allocation2] sm:$0xff] }
 0xaec   : > { %v1198_v43 = vadd.f32 %v1195_v58, %v1189_v60  ;;  %v1187_v63 = vadd.f32 %v1186_v55, %v1178_v62 }
 0xaee   : > { %v1387_v1 = vpack.c.bf16 %v1198_v43, %v1198_v43  ;;  %v1196_v2 = vadd.f32 %v1390_v61, %v1187_v63 }
 0xaef   : > { %v1179_v46 = vld [vmem:[#allocation2 + $0x8] sm:$0xff] }
 0xaf0   : > { %v1218_v3 = vsel %vm1216_vm5, %v1387_v1, %v1217_v0  ;;  %v1385_v4 = vpack.c.bf16 %v1196_v2, %v1196_v2  ;;  %v1188_v5 = vadd.f32 %v1186_v55, %v1179_v46 }
 0xaf1   : > { %1219 = vst [vmem:[%s262_s26 + $0x8] sm:$0x7] %v1218_v3 }
 0xaf2   : > { %1213 = vst.msk [vmem:[%s262_s26] sm:$0xf] %vm1212_vm7, %v1385_v4  ;;  %v1197_v6 = vadd.f32 %v1391_v44, %v1188_v5 }
 0xaf4   : > { %v1386_v7 = vpack.c.bf16 %v1197_v6, %v1197_v6 }
 0xaf6   : > { %1214 = vst.msk [vmem:[%s262_s26 + $0x4] sm:$0xf] %vm1212_vm7, %v1386_v7 }
 0xaf7 PF: > { %s14_s17 = sadd.s32 1, %s1631_s17   ;;  %s1863_s15 = smov %s1627_s16 }
 0xaf8   : > { %p11_p5 = scmp.ge.s32.totalorder %s14_s17, 4   ;;  %s1864_s16 = smov %s1866_s18 }
 0xafa   :  { %13 = sbr.rel (!%p11_p5) target bundleno = 2 (0x2), region = 80 }

// kernel: _lambda_.25
= control target key start
LH: loop header
LB: loop body
LE: loop exit
PB: predicated region body
PF: predicated region fallthrough
CT: control target
= control target key end

     0   :  { %v107_v0 = vmov 0.0   ;;  %vm108_vm0 = vmmov 0   ;;  %vm38_vm1 = vcmask 261120   ;;  %v22_v4 = vlaneseq  ;;  %s144_s1 = inlined_call_operand.vmem [shape: bf16[32,32], index: 1, kind: input, shape index: {}]   ;;  %s145_s0 = inlined_call_operand.vmem [shape: bf16[8,32], index: 0, kind: input, shape index: {}]   ;;  %s146_s2 = inlined_call_operand.vmem [shape: bf16[1,32], index: 2, kind: input, shape index: {}]   ;;  %s147_s3 = inlined_call_operand.vmem [shape: bf16[8,32], index: 3, kind: output, shape index: {}]  }
   0x1   :  { %95 = vmatprep.subr.bf16.mxu0 %v107_v0  ;;  %v105_v1 = vld [vmem:[%s144_s1 + $0x8] sm:$0xff]   ;;  %99 = vmatprep.mubr.msk.bf16.mxu0 %vm108_vm0, %v107_v0  ;;  %v106_v2 = vld [vmem:[%s144_s1] sm:$0xff]   ;;  %vm83_vm2 = vcmask 257024  }
   0x2   :  { %96 = vmatpush3.bf16.msra.mxu0 %v105_v1  ;;  %v15_v3 = vld [vmem:[%s145_s0] sm:$0xf]  ;;  %v23_v5 = vshrl.u32 %v22_v4, 7 }
   0x3   :  { %97 = vmatprep.subr.bf16.mxu0 %v107_v0  ;;  %v20_v6 = vld [vmem:[%s146_s2] sm:$0x1] }
   0x4   :  { %v21_v7 = vunpack.c.l.bf16 %v20_v6  ;;  %v24_v8 = vsub.s32 0, %v23_v5 }
   0x6   :  { %98 = vmatpush3.bf16.msra.mxu0 %v106_v2  ;;  %v25_v9 = vrot.slane %v21_v7, %v24_v8 }
   0x9   :  { %100 = vmatmul.mubr.msk.bf16.vlgmr.msra.gmra.mxu0 %vm38_vm1, %v15_v3 }
  0xc9   :  { %v76_v10 = vpop.f32.mrf.mxu0 }
  0xca   :  { %v77_v11 = vadd.f32 %v76_v10, %v25_v9 }
  0xcb   :  { %v101_v12 = vpop.f32.mrf.mxu0 }
  0xcc   :  { %v82_v13 = vpack.c.bf16 %v77_v11, %v77_v11 }
  0xcd   :  { %v79_v14 = vpop.f32.mrf.mxu0 }
  0xce   :  { %84 = vst.msk [vmem:[%s147_s3] sm:$0xf] %vm83_vm2, %v82_v13 }
  0xcf   :  { %v102_v15 = vpop.f32.mrf.mxu0 }

// kernel: _lambda_.38
= control target key start
LH: loop header
LB: loop body
LE: loop exit
PB: predicated region body
PF: predicated region fallthrough
CT: control target
= control target key end

     0   :  { %vm35_vm0 = vcmask 261120   ;;  %vm48_vm1 = vcmask 254976   ;;  %v370_v39 = vmov 0.0   ;;  %vm371_vm2 = vmmov 0   ;;  %s497_s0 = inlined_call_operand.vmem [shape: bf16[34,32], index: 0, kind: input, shape index: {}]   ;;  %s498_s3 = inlined_call_operand.vmem [shape: bf16[32,96], index: 3, kind: input, shape index: {}]   ;;  %s499_s1 = inlined_call_operand.vmem [shape: bf16[1,32], index: 1, kind: input, shape index: {}]   ;;  %s500_s2 = inlined_call_operand.vmem [shape: bf16[1,32], index: 2, kind: input, shape index: {}]   ;;  %s501_s4 = inlined_call_operand.vmem [shape: bf16[1,96], index: 4, kind: input, shape index: {}]   ;;  %s502_s5 = inlined_call_operand.vmem [shape: bf16[34,96], index: 5, kind: output, shape index: {}]  }
   0x1   :  { %v327_v0 = vld [vmem:[%s497_s0 + $0x8] sm:$0xff]   ;;  %v320_v1 = vld [vmem:[%s497_s0] sm:$0xff]   ;;  %v29_v5 = vld [vmem:[%s497_s0 + $0x10] sm:$0x1]  ;;  %349 = vmatprep.subr.bf16.mxu1 %v370_v39  ;;  %333 = vmatprep.subr.bf16.mxu0 %v370_v39  ;;  %v105_v46 = vlaneseq  ;;  %vm146_vm3 = vcmask 257024   ;;  %vm151_vm4 = vcmask 253952  }
   0x2   :  { %v325_v2 = vunpack.c.l.bf16 %v327_v0  ;;  %v326_v3 = vunpack.c.h.bf16 %v327_v0  ;;  %v321_v4 = vunpack.c.l.bf16 %v320_v1  ;;  %v322_v6 = vunpack.c.h.bf16 %v320_v1  ;;  %v355_v38 = vld [vmem:[%s498_s3 + $0x8] sm:$0xff]   ;;  %v356_v40 = vld [vmem:[%s498_s3] sm:$0xff]   ;;  %341 = vmatprep.mubr.msk.bf16.mxu1 %vm371_vm2, %v370_v39  ;;  %337 = vmatprep.mubr.msk.bf16.mxu0 %vm371_vm2, %v370_v39 }
   0x3   :  { %v34_v10 = vunpack.c.l.bf16 %v29_v5  ;;  %351 = vmatpush3.bf16.msra.mxu1 %v355_v38  ;;  %334 = vmatpush3.bf16.msra.mxu0 %v355_v38  ;;  %v106_v53 = vshrl.u32 %v105_v46, 7  ;;  %v103_v56 = vld [vmem:[%s499_s1] sm:$0x1]  ;;  %vm280_vm5 = vcmask 781312   ;;  %vm285_vm6 = vcmask 778240  }
   0x4   :  { %v42_v7 = vsel %vm35_vm0, %v325_v2, 0.0  ;;  %v36_v8 = vsel %vm35_vm0, %v321_v4, 0.0  ;;  %v45_v9 = vsel %vm35_vm0, %v326_v3, 0.0  ;;  %v39_v11 = vsel %vm35_vm0, %v322_v6, 0.0  ;;  %350 = vmatprep.subr.bf16.mxu1 %v370_v39  ;;  %335 = vmatprep.subr.bf16.mxu0 %v370_v39  ;;  %v114_v59 = vld [vmem:[%s500_s2] sm:$0x1] }
   0x5   :  { %43 = vadd.xlane.f32.xlu0 %v42_v7  ;;  %37 = vadd.xlane.f32.xlu1 %v36_v8  ;;  %v49_v12 = vsel %vm48_vm1, %v34_v10, 0.0  ;;  %v104_v60 = vunpack.c.l.bf16 %v103_v56  ;;  %v107_v61 = vsub.s32 0, %v106_v53  ;;  %v115_v62 = vunpack.c.l.bf16 %v114_v59 }
   0x7   :  { %352 = vmatpush3.bf16.msra.mxu1 %v356_v40  ;;  %336 = vmatpush3.bf16.msra.mxu0 %v356_v40  ;;  %v108_v63 = vrot.slane %v104_v60, %v107_v61  ;;  %v119_v1 = vrot.slane %v115_v62, %v107_v61 }
   0x9   :  { %46 = vadd.xlane.f32.xlu0 %v45_v9  ;;  %40 = vadd.xlane.f32.xlu1 %v39_v11 }
   0xd   :  { %50 = vadd.xlane.f32.xlu0 %v49_v12 }
  0x8e   :  { %v44_v13 = vpop.xlane.xlu0 %43  ;;  %v38_v14 = vpop.xlane.xlu1 %37 }
  0x8f   :  { %v55_v15 = vmul.f32 0.03125, %v44_v13  ;;  %v53_v16 = vmul.f32 0.03125, %v38_v14 }
  0x91   :  { %v416_v17 = vsub.f32 %v325_v2, %v55_v15  ;;  %v418_v18 = vsub.f32 %v321_v4, %v53_v16 }
  0x92   :  { %v47_v19 = vpop.xlane.xlu0 %46  ;;  %v41_v20 = vpop.xlane.xlu1 %40 }
  0x93   :  { %v56_v21 = vmul.f32 0.03125, %v47_v19  ;;  %v65_v22 = vmul.f32 %v416_v17, %v416_v17  ;;  %v54_v23 = vmul.f32 0.03125, %v41_v20  ;;  %v63_v24 = vmul.f32 %v418_v18, %v418_v18 }
  0x95   :  { %v424_v25 = vsub.f32 %v326_v3, %v56_v21  ;;  %v74_v26 = vsel %vm35_vm0, %v65_v22, 0.0  ;;  %v427_v27 = vsub.f32 %v322_v6, %v54_v23  ;;  %v68_v31 = vsel %vm35_vm0, %v63_v24, 0.0 }
  0x96   :  { %v51_v28 = vpop.xlane.xlu0 %50  ;;  %75 = vadd.xlane.f32.xlu1 %v74_v26 }
  0x97   :  { %v57_v29 = vmul.f32 0.03125, %v51_v28  ;;  %v66_v30 = vmul.f32 %v424_v25, %v424_v25  ;;  %v64_v32 = vmul.f32 %v427_v27, %v427_v27 }
  0x99   :  { %v434_v33 = vsub.f32 %v34_v10, %v57_v29  ;;  %v77_v34 = vsel %vm35_vm0, %v66_v30, 0.0  ;;  %v71_v36 = vsel %vm35_vm0, %v64_v32, 0.0  ;;  %v162_v29 = vld [vmem:[%s501_s4] sm:$0x1] }
  0x9a   :  { %78 = vadd.xlane.f32.xlu0 %v77_v34  ;;  %69 = vadd.xlane.f32.xlu1 %v68_v31  ;;  %v163_v30 = vunpack.c.l.bf16 %v162_v29 }
  0x9b   :  { %v67_v35 = vmul.f32 %v434_v33, %v434_v33 }
  0x9c   :  { %v167_v31 = vrot.slane %v163_v30, %v107_v61 }
  0x9d   :  { %v80_v37 = vsel %vm48_vm1, %v67_v35, 0.0 }
  0x9e   :  { %81 = vadd.xlane.f32.xlu1 %v80_v37  ;;  %72 = vadd.xlane.f32.xlu0 %v71_v36 }
 0x11f   :  { %v76_v41 = vpop.xlane.xlu1 %75 }
 0x120   :  { %v85_v42 = vmul.f32 0.03125, %v76_v41 }
 0x122   :  { %v90_v43 = vadd.f32 1e-05, %v85_v42 }
 0x123   :  { %v79_v44 = vpop.xlane.xlu0 %78  ;;  %v70_v45 = vpop.xlane.xlu1 %69 }
 0x124   :  { %360 = vrsqrt.f32 %v90_v43  ;;  %v86_v47 = vmul.f32 0.03125, %v79_v44  ;;  %v83_v48 = vmul.f32 0.03125, %v70_v45 }
 0x126   :  { %v91_v49 = vadd.f32 1e-05, %v86_v47  ;;  %v88_v50 = vadd.f32 1e-05, %v83_v48 }
 0x127   :  { %v73_v51 = vpop.xlane.xlu0 %72  ;;  %v82_v52 = vpop.xlane.xlu1 %81 }
 0x128   :  { %362 = vrsqrt.f32 %v91_v49  ;;  %v84_v54 = vmul.f32 0.03125, %v73_v51  ;;  %v87_v55 = vmul.f32 0.03125, %v82_v52 }
 0x129   :  { %364 = vrsqrt.f32 %v88_v50 }
 0x12a   :  { %v89_v57 = vadd.f32 1e-05, %v84_v54  ;;  %v92_v58 = vadd.f32 1e-05, %v87_v55 }
 0x12c   :  { %366 = vrsqrt.f32 %v89_v57 }
 0x12d   :  { %368 = vrsqrt.f32 %v92_v58 }
 0x131   :  { %v361_v0 = vpop.eup %360 }
 0x132   :  { %v100_v2 = vmul.f32 %v361_v0, %v416_v17 }
 0x134   :  { %v111_v3 = vmul.f32 %v108_v63, %v100_v2 }
 0x135   :  { %v363_v4 = vpop.eup %362 }
 0x136   :  { %v365_v5 = vpop.eup %364  ;;  %v122_v6 = vadd.f32 %v119_v1, %v111_v3  ;;  %v101_v7 = vmul.f32 %v363_v4, %v424_v25 }
 0x137   :  { %v98_v8 = vmul.f32 %v365_v5, %v418_v18 }
 0x138   :  { %v311_v9 = vpack.c.bf16 %v122_v6, %v122_v6  ;;  %v112_v10 = vmul.f32 %v108_v63, %v101_v7 }
 0x139   :  { %v367_v11 = vpop.eup %366  ;;  %v109_v12 = vmul.f32 %v108_v63, %v98_v8 }
 0x13a   :  { %v369_v13 = vpop.eup %368  ;;  %149 = vst.msk [vmem:[#allocation2 + $0x8] sm:$0xf] %vm146_vm3, %v311_v9  ;;  %v123_v14 = vadd.f32 %v119_v1, %v112_v10  ;;  %v99_v15 = vmul.f32 %v367_v11, %v427_v27 }
 0x13b   :  { %v120_v16 = vadd.f32 %v119_v1, %v109_v12  ;;  %v102_v17 = vmul.f32 %v369_v13, %v434_v33 }
 0x13c   :  { %v312_v19 = vpack.c.bf16 %v123_v14, %v123_v14  ;;  %v110_v20 = vmul.f32 %v108_v63, %v99_v15 }
 0x13d   :  { %v309_v21 = vpack.c.bf16 %v120_v16, %v120_v16  ;;  %v113_v22 = vmul.f32 %v108_v63, %v102_v17 }
 0x13e   :  { %150 = vst.msk [vmem:[#allocation2 + $0xc] sm:$0xf] %vm146_vm3, %v312_v19  ;;  %v121_v18 = vadd.f32 %v119_v1, %v110_v20 }
 0x13f   :  { %147 = vst.msk [vmem:[#allocation2] sm:$0xf] %vm146_vm3, %v309_v21  ;;  %v124_v23 = vadd.f32 %v119_v1, %v113_v22 }
 0x140   :  { %v310_v24 = vpack.c.bf16 %v121_v18, %v121_v18 }
 0x141   :  { %v313_v25 = vpack.c.bf16 %v124_v23, %v124_v23 }
 0x142   :  { %148 = vst.msk [vmem:[#allocation2 + $0x4] sm:$0xf] %vm146_vm3, %v310_v24 }
 0x143   :  { %152 = vst.msk [vmem:[#allocation2 + $0x10] sm:$0x1] %vm151_vm4, %v313_v25 }
 0x145   :  { %v357_v26 = vld [vmem:[#allocation2 + $0x8] sm:$0xff]  }
 0x146   :  { %342 = vmatmul.mubr.msk.bf16.vlgmr.msra.gmra.mxu1 %vm35_vm0, %v357_v26 }
 0x147   :  { %345 = vmatprep.mubr.msk.bf16.mxu1 %vm371_vm2, %v370_v39 }
 0x149   :  { %v358_v27 = vld [vmem:[#allocation2] sm:$0xff]  }
 0x14a   :  { %338 = vmatmul.mubr.msk.bf16.vlgmr.msra.gmra.mxu0 %vm35_vm0, %v358_v27  ;;  %v359_v28 = vld [vmem:[#allocation2 + $0x10] ss:$0 sps:$4 sm:$0x11]  }
 0x14e   :  { %346 = vmatmul.mubr.msk.bf16.gmra.mxu1 %vm35_vm0, %v359_v28 }
 0x206   :  { %v245_v32 = vpop.f32.mrf.mxu1 }
 0x207   :  { %v246_v33 = vadd.f32 %v245_v32, %v167_v31 }
 0x208   :  { %v343_v34 = vpop.f32.mrf.mxu1 }
 0x209   :  { %v316_v35 = vpack.c.bf16 %v246_v33, %v246_v33 }
 0x20a   :  { %v237_v36 = vpop.f32.mrf.mxu0  ;;  %v248_v37 = vpop.f32.mrf.mxu1 }
 0x20b   :  { %283 = vst.msk [vmem:[%s502_s5 + $0x8] sm:$0xf] %vm280_vm5, %v316_v35  ;;  %v238_v38 = vadd.f32 %v237_v36, %v167_v31  ;;  %v249_v39 = vadd.f32 %v248_v37, %v167_v31 }
 0x20c   :  { %v339_v40 = vpop.f32.mrf.mxu0  ;;  %v344_v41 = vpop.f32.mrf.mxu1 }
 0x20d   :  { %v314_v42 = vpack.c.bf16 %v238_v38, %v238_v38  ;;  %v317_v43 = vpack.c.bf16 %v249_v39, %v249_v39 }
 0x20e   :  { %v240_v44 = vpop.f32.mrf.mxu0  ;;  %v253_v45 = vpop.f32.mrf.mxu1 }
 0x20f   :  { %281 = vst.msk [vmem:[%s502_s5] sm:$0xf] %vm280_vm5, %v314_v42  ;;  %284 = vst.msk [vmem:[%s502_s5 + $0xc] sm:$0xf] %vm280_vm5, %v317_v43  ;;  %v241_v46 = vadd.f32 %v240_v44, %v167_v31  ;;  %v254_v47 = vadd.f32 %v253_v45, %v167_v31 }
 0x210   :  { %v340_v48 = vpop.f32.mrf.mxu0  ;;  %v347_v49 = vpop.f32.mrf.mxu1 }
 0x211   :  { %v315_v50 = vpack.c.bf16 %v241_v46, %v241_v46  ;;  %v318_v51 = vpack.c.bf16 %v254_v47, %v254_v47 }
 0x212   :  { %v256_v52 = vpop.f32.mrf.mxu1 }
 0x213   :  { %282 = vst.msk [vmem:[%s502_s5 + $0x4] sm:$0xf] %vm280_vm5, %v315_v50 }
 0x214   :  { %286 = vst.msk [vmem:[%s502_s5 + $0x10] sm:$0x1] %vm285_vm6, %v318_v51  ;;  %v348_v53 = vpop.f32.mrf.mxu1 }

// kernel: _lambda_.41
= control target key start
LH: loop header
LB: loop body
LE: loop exit
PB: predicated region body
PF: predicated region fallthrough
CT: control target
= control target key end

     0   :  { %v310_v0 = vmov 0.0   ;;  %vm311_vm0 = vmmov 0   ;;  %v41_v12 = vlaneseq  ;;  %vm201_vm1 = vcmask 257024   ;;  %s404_s1 = inlined_call_operand.vmem [shape: bf16[128,32], index: 1, kind: input, shape index: {}]   ;;  %s405_s0 = inlined_call_operand.vmem [shape: bf16[34,128], index: 0, kind: input, shape index: {}]   ;;  %s406_s2 = inlined_call_operand.vmem [shape: bf16[1,32], index: 2, kind: input, shape index: {}]   ;;  %s407_s3 = inlined_call_operand.vmem [shape: bf16[34,32], index: 3, kind: input, shape index: {}]   ;;  %s408_s4 = inlined_call_operand.vmem [shape: bf16[34,32], index: 4, kind: output, shape index: {}]  }
   0x1   :  { %253 = vmatprep.subr.bf16.mxu0 %v310_v0  ;;  %281 = vmatprep.subr.bf16.mxu1 %v310_v0  ;;  %v299_v1 = vld [vmem:[%s404_s1 + $0x38] sm:$0xff]   ;;  %v300_v2 = vld [vmem:[%s404_s1 + $0x30] sm:$0xff]   ;;  %v301_v3 = vld [vmem:[%s404_s1 + $0x28] sm:$0xff]   ;;  %vm206_vm2 = vcmask 253952  }
   0x2   :  { %269 = vmatprep.mubr.msk.bf16.mxu0 %vm311_vm0, %v310_v0  ;;  %273 = vmatprep.mubr.msk.bf16.mxu1 %vm311_vm0, %v310_v0  ;;  %v302_v4 = vld [vmem:[%s404_s1 + $0x20] sm:$0xff]   ;;  %v303_v5 = vld [vmem:[%s404_s1 + $0x18] sm:$0xff]   ;;  %v304_v6 = vld [vmem:[%s404_s1 + $0x10] sm:$0xff]   ;;  %v42_v13 = vshrl.u32 %v41_v12, 7 }
   0x3   :  { %254 = vmatpush3.bf16.msra.mxu0 %v299_v1  ;;  %289 = vmatpush3.bf16.msra.mxu1 %v299_v1  ;;  %v305_v7 = vld [vmem:[%s404_s1 + $0x8] sm:$0xff]   ;;  %v306_v8 = vld [vmem:[%s404_s1] sm:$0xff]   ;;  %v309_v11 = vld [vmem:[%s405_s0 + $0x10] ss:$0 sps:$4 sm:$0x11]  }
   0x4   :  { %255 = vmatprep.subr.bf16.mxu0 %v310_v0  ;;  %282 = vmatprep.subr.bf16.mxu1 %v310_v0  ;;  %v307_v9 = vld [vmem:[%s405_s0] sm:$0xff]   ;;  %v308_v10 = vld [vmem:[%s405_s0 + $0x8] sm:$0xff]   ;;  %v43_v16 = vsub.s32 0, %v42_v13  ;;  %v169_v34 = vld [vmem:[%s407_s3 + $0x10] sm:$0x1] }
   0x5   :  { %v39_v14 = vld [vmem:[%s406_s2] sm:$0x1]  ;;  %v241_v18 = vld [vmem:[%s407_s3 + $0x8] sm:$0xff]   ;;  %v174_v43 = vunpack.c.l.bf16 %v169_v34 }
   0x6   :  { %v40_v15 = vunpack.c.l.bf16 %v39_v14  ;;  %v234_v17 = vld [vmem:[%s407_s3] sm:$0xff]   ;;  %v239_v21 = vunpack.c.l.bf16 %v241_v18  ;;  %v240_v31 = vunpack.c.h.bf16 %v241_v18 }
   0x7   :  { %256 = vmatpush3.bf16.msra.mxu0 %v300_v2  ;;  %290 = vmatpush3.bf16.msra.mxu1 %v300_v2  ;;  %v235_v20 = vunpack.c.l.bf16 %v234_v17  ;;  %v236_v30 = vunpack.c.h.bf16 %v234_v17 }
   0x8   :  { %257 = vmatprep.subr.bf16.mxu0 %v310_v0  ;;  %283 = vmatprep.subr.bf16.mxu1 %v310_v0  ;;  %v44_v19 = vrot.slane %v40_v15, %v43_v16 }
   0xb   :  { %258 = vmatpush3.bf16.msra.mxu0 %v301_v3  ;;  %291 = vmatpush3.bf16.msra.mxu1 %v301_v3 }
   0xc   :  { %259 = vmatprep.subr.bf16.mxu0 %v310_v0  ;;  %284 = vmatprep.subr.bf16.mxu1 %v310_v0 }
   0xf   :  { %260 = vmatpush3.bf16.msra.mxu0 %v302_v4  ;;  %292 = vmatpush3.bf16.msra.mxu1 %v302_v4 }
  0x10   :  { %261 = vmatprep.subr.bf16.mxu0 %v310_v0  ;;  %285 = vmatprep.subr.bf16.mxu1 %v310_v0 }
  0x13   :  { %262 = vmatpush3.bf16.msra.mxu0 %v303_v5  ;;  %293 = vmatpush3.bf16.msra.mxu1 %v303_v5 }
  0x14   :  { %263 = vmatprep.subr.bf16.mxu0 %v310_v0  ;;  %286 = vmatprep.subr.bf16.mxu1 %v310_v0 }
  0x17   :  { %264 = vmatpush3.bf16.msra.mxu0 %v304_v6  ;;  %294 = vmatpush3.bf16.msra.mxu1 %v304_v6 }
  0x18   :  { %265 = vmatprep.subr.bf16.mxu0 %v310_v0  ;;  %287 = vmatprep.subr.bf16.mxu1 %v310_v0 }
  0x1b   :  { %266 = vmatpush3.bf16.msra.mxu0 %v305_v7  ;;  %295 = vmatpush3.bf16.msra.mxu1 %v305_v7 }
  0x1c   :  { %267 = vmatprep.subr.bf16.mxu0 %v310_v0  ;;  %288 = vmatprep.subr.bf16.mxu1 %v310_v0 }
  0x1f   :  { %268 = vmatpush3.bf16.msra.mxu0 %v306_v8  ;;  %296 = vmatpush3.bf16.msra.mxu1 %v306_v8 }
  0x22   :  { %270 = vmatmul.mubr.bf16.vlgmr.msra.gmra.mxu0 %v307_v9  ;;  %274 = vmatmul.mubr.bf16.vlgmr.msra.gmra.mxu1 %v308_v10 }
  0x23   :  { %277 = vmatprep.mubr.msk.bf16.mxu1 %vm311_vm0, %v310_v0 }
  0x2a   :  { %278 = vmatmul.mubr.bf16.gmra.mxu1 %v309_v11 }
  0xe2   :  { %v143_v22 = vpop.f32.mrf.mxu0  ;;  %v151_v23 = vpop.f32.mrf.mxu1 }
  0xe3   :  { %v144_v24 = vadd.f32 %v143_v22, %v44_v19  ;;  %v152_v25 = vadd.f32 %v151_v23, %v44_v19 }
  0xe4   :  { %v271_v26 = vpop.f32.mrf.mxu0  ;;  %v275_v27 = vpop.f32.mrf.mxu1 }
  0xe5   :  { %v175_v28 = vadd.f32 %v235_v20, %v144_v24  ;;  %v177_v29 = vadd.f32 %v239_v21, %v152_v25 }
  0xe6   :  { %v146_v32 = vpop.f32.mrf.mxu0  ;;  %v154_v33 = vpop.f32.mrf.mxu1 }
  0xe7   :  { %v228_v35 = vpack.c.bf16 %v175_v28, %v175_v28  ;;  %v230_v36 = vpack.c.bf16 %v177_v29, %v177_v29  ;;  %v147_v37 = vadd.f32 %v146_v32, %v44_v19  ;;  %v155_v38 = vadd.f32 %v154_v33, %v44_v19 }
  0xe8   :  { %v272_v39 = vpop.f32.mrf.mxu0  ;;  %v276_v40 = vpop.f32.mrf.mxu1 }
  0xe9   :  { %202 = vst.msk [vmem:[%s408_s4] sm:$0xf] %vm201_vm1, %v228_v35  ;;  %204 = vst.msk [vmem:[%s408_s4 + $0x8] sm:$0xf] %vm201_vm1, %v230_v36  ;;  %v176_v41 = vadd.f32 %v236_v30, %v147_v37  ;;  %v178_v42 = vadd.f32 %v240_v31, %v155_v38 }
  0xea   :  { %v159_v44 = vpop.f32.mrf.mxu1 }
  0xeb   :  { %v229_v45 = vpack.c.bf16 %v176_v41, %v176_v41  ;;  %v231_v46 = vpack.c.bf16 %v178_v42, %v178_v42  ;;  %v160_v47 = vadd.f32 %v159_v44, %v44_v19 }
  0xec   :  { %v279_v48 = vpop.f32.mrf.mxu1 }
  0xed   :  { %203 = vst.msk [vmem:[%s408_s4 + $0x4] sm:$0xf] %vm201_vm1, %v229_v45  ;;  %205 = vst.msk [vmem:[%s408_s4 + $0xc] sm:$0xf] %vm201_vm1, %v231_v46  ;;  %v179_v49 = vadd.f32 %v174_v43, %v160_v47 }
  0xee   :  { %v162_v50 = vpop.f32.mrf.mxu1 }
  0xef   :  { %v232_v51 = vpack.c.bf16 %v179_v49, %v179_v49 }
  0xf0   :  { %v280_v52 = vpop.f32.mrf.mxu1 }
  0xf1   :  { %207 = vst.msk [vmem:[%s408_s4 + $0x10] sm:$0x1] %vm206_vm2, %v232_v51 }

// kernel: _lambda_.40
= control target key start
LH: loop header
LB: loop body
LE: loop exit
PB: predicated region body
PF: predicated region fallthrough
CT: control target
= control target key end

     0   :  { %vm35_vm0 = vcmask 261120   ;;  %vm48_vm1 = vcmask 254976   ;;  %v444_v39 = vmov 0.0   ;;  %vm445_vm2 = vmmov 0   ;;  %s561_s0 = inlined_call_operand.vmem [shape: bf16[34,32], index: 0, kind: input, shape index: {}]   ;;  %s562_s3 = inlined_call_operand.vmem [shape: bf16[32,128], index: 3, kind: input, shape index: {}]   ;;  %s563_s1 = inlined_call_operand.vmem [shape: bf16[1,32], index: 1, kind: input, shape index: {}]   ;;  %s564_s2 = inlined_call_operand.vmem [shape: bf16[1,32], index: 2, kind: input, shape index: {}]   ;;  %s565_s4 = inlined_call_operand.vmem [shape: bf16[1,128], index: 4, kind: input, shape index: {}]   ;;  %s566_s5 = inlined_call_operand.vmem [shape: bf16[34,128], index: 5, kind: output, shape index: {}]  }
   0x1   :  { %v380_v0 = vld [vmem:[%s561_s0 + $0x8] sm:$0xff]   ;;  %v363_v1 = vld [vmem:[%s561_s0] sm:$0xff]   ;;  %v29_v5 = vld [vmem:[%s561_s0 + $0x10] sm:$0x1]  ;;  %403 = vmatprep.subr.bf16.mxu1 %v444_v39  ;;  %387 = vmatprep.subr.bf16.mxu0 %v444_v39  ;;  %v105_v46 = vlaneseq  ;;  %vm146_vm3 = vcmask 257024   ;;  %vm151_vm4 = vcmask 253952  }
   0x2   :  { %v368_v2 = vunpack.c.l.bf16 %v380_v0  ;;  %v369_v3 = vunpack.c.h.bf16 %v380_v0  ;;  %v364_v4 = vunpack.c.l.bf16 %v363_v1  ;;  %v365_v6 = vunpack.c.h.bf16 %v363_v1  ;;  %v409_v38 = vld [vmem:[%s562_s3 + $0x8] sm:$0xff]   ;;  %v410_v40 = vld [vmem:[%s562_s3] sm:$0xff]   ;;  %395 = vmatprep.mubr.msk.bf16.mxu1 %vm445_vm2, %v444_v39  ;;  %391 = vmatprep.mubr.msk.bf16.mxu0 %vm445_vm2, %v444_v39 }
   0x3   :  { %v34_v10 = vunpack.c.l.bf16 %v29_v5  ;;  %405 = vmatpush3.bf16.msra.mxu1 %v409_v38  ;;  %388 = vmatpush3.bf16.msra.mxu0 %v409_v38  ;;  %v106_v53 = vshrl.u32 %v105_v46, 7  ;;  %v103_v56 = vld [vmem:[%s563_s1] sm:$0x1] }
   0x4   :  { %v42_v7 = vsel %vm35_vm0, %v368_v2, 0.0  ;;  %v36_v8 = vsel %vm35_vm0, %v364_v4, 0.0  ;;  %v45_v9 = vsel %vm35_vm0, %v369_v3, 0.0  ;;  %v39_v11 = vsel %vm35_vm0, %v365_v6, 0.0  ;;  %404 = vmatprep.subr.bf16.mxu1 %v444_v39  ;;  %389 = vmatprep.subr.bf16.mxu0 %v444_v39  ;;  %v114_v59 = vld [vmem:[%s564_s2] sm:$0x1] }
   0x5   :  { %43 = vadd.xlane.f32.xlu0 %v42_v7  ;;  %37 = vadd.xlane.f32.xlu1 %v36_v8  ;;  %v49_v12 = vsel %vm48_vm1, %v34_v10, 0.0  ;;  %v104_v60 = vunpack.c.l.bf16 %v103_v56  ;;  %v107_v61 = vsub.s32 0, %v106_v53  ;;  %v115_v62 = vunpack.c.l.bf16 %v114_v59 }
   0x7   :  { %406 = vmatpush3.bf16.msra.mxu1 %v410_v40  ;;  %390 = vmatpush3.bf16.msra.mxu0 %v410_v40  ;;  %v108_v63 = vrot.slane %v104_v60, %v107_v61  ;;  %v119_v1 = vrot.slane %v115_v62, %v107_v61 }
   0x9   :  { %46 = vadd.xlane.f32.xlu0 %v45_v9  ;;  %40 = vadd.xlane.f32.xlu1 %v39_v11 }
   0xd   :  { %50 = vadd.xlane.f32.xlu0 %v49_v12 }
  0x8e   :  { %v44_v13 = vpop.xlane.xlu0 %43  ;;  %v38_v14 = vpop.xlane.xlu1 %37 }
  0x8f   :  { %v55_v15 = vmul.f32 0.03125, %v44_v13  ;;  %v53_v16 = vmul.f32 0.03125, %v38_v14 }
  0x91   :  { %v490_v17 = vsub.f32 %v368_v2, %v55_v15  ;;  %v492_v18 = vsub.f32 %v364_v4, %v53_v16 }
  0x92   :  { %v47_v19 = vpop.xlane.xlu0 %46  ;;  %v41_v20 = vpop.xlane.xlu1 %40 }
  0x93   :  { %v56_v21 = vmul.f32 0.03125, %v47_v19  ;;  %v65_v22 = vmul.f32 %v490_v17, %v490_v17  ;;  %v54_v23 = vmul.f32 0.03125, %v41_v20  ;;  %v63_v24 = vmul.f32 %v492_v18, %v492_v18 }
  0x95   :  { %v498_v25 = vsub.f32 %v369_v3, %v56_v21  ;;  %v74_v26 = vsel %vm35_vm0, %v65_v22, 0.0  ;;  %v501_v27 = vsub.f32 %v365_v6, %v54_v23  ;;  %v68_v31 = vsel %vm35_vm0, %v63_v24, 0.0 }
  0x96   :  { %v51_v28 = vpop.xlane.xlu0 %50  ;;  %75 = vadd.xlane.f32.xlu1 %v74_v26 }
  0x97   :  { %v57_v29 = vmul.f32 0.03125, %v51_v28  ;;  %v66_v30 = vmul.f32 %v498_v25, %v498_v25  ;;  %v64_v32 = vmul.f32 %v501_v27, %v501_v27 }
  0x99   :  { %v508_v33 = vsub.f32 %v34_v10, %v57_v29  ;;  %v77_v34 = vsel %vm35_vm0, %v66_v30, 0.0  ;;  %v71_v36 = vsel %vm35_vm0, %v64_v32, 0.0  ;;  %v162_v29 = vld [vmem:[%s565_s4] sm:$0x1] }
  0x9a   :  { %78 = vadd.xlane.f32.xlu0 %v77_v34  ;;  %69 = vadd.xlane.f32.xlu1 %v68_v31  ;;  %v163_v30 = vunpack.c.l.bf16 %v162_v29 }
  0x9b   :  { %v67_v35 = vmul.f32 %v508_v33, %v508_v33 }
  0x9c   :  { %v167_v31 = vrot.slane %v163_v30, %v107_v61 }
  0x9d   :  { %v80_v37 = vsel %vm48_vm1, %v67_v35, 0.0 }
  0x9e   :  { %81 = vadd.xlane.f32.xlu1 %v80_v37  ;;  %72 = vadd.xlane.f32.xlu0 %v71_v36 }
 0x11f   :  { %v76_v41 = vpop.xlane.xlu1 %75 }
 0x120   :  { %v85_v42 = vmul.f32 0.03125, %v76_v41 }
 0x122   :  { %v90_v43 = vadd.f32 1e-05, %v85_v42 }
 0x123   :  { %v79_v44 = vpop.xlane.xlu0 %78  ;;  %v70_v45 = vpop.xlane.xlu1 %69 }
 0x124   :  { %414 = vrsqrt.f32 %v90_v43  ;;  %v86_v47 = vmul.f32 0.03125, %v79_v44  ;;  %v83_v48 = vmul.f32 0.03125, %v70_v45 }
 0x126   :  { %v91_v49 = vadd.f32 1e-05, %v86_v47  ;;  %v88_v50 = vadd.f32 1e-05, %v83_v48 }
 0x127   :  { %v73_v51 = vpop.xlane.xlu0 %72  ;;  %v82_v52 = vpop.xlane.xlu1 %81 }
 0x128   :  { %416 = vrsqrt.f32 %v91_v49  ;;  %v84_v54 = vmul.f32 0.03125, %v73_v51  ;;  %v87_v55 = vmul.f32 0.03125, %v82_v52 }
 0x129   :  { %418 = vrsqrt.f32 %v88_v50 }
 0x12a   :  { %v89_v57 = vadd.f32 1e-05, %v84_v54  ;;  %v92_v58 = vadd.f32 1e-05, %v87_v55 }
 0x12c   :  { %420 = vrsqrt.f32 %v89_v57 }
 0x12d   :  { %422 = vrsqrt.f32 %v92_v58 }
 0x131   :  { %v415_v0 = vpop.eup %414 }
 0x132   :  { %v100_v2 = vmul.f32 %v415_v0, %v490_v17 }
 0x134   :  { %v111_v3 = vmul.f32 %v108_v63, %v100_v2 }
 0x135   :  { %v417_v4 = vpop.eup %416 }
 0x136   :  { %v419_v5 = vpop.eup %418  ;;  %v122_v6 = vadd.f32 %v119_v1, %v111_v3  ;;  %v101_v7 = vmul.f32 %v417_v4, %v498_v25 }
 0x137   :  { %v98_v8 = vmul.f32 %v419_v5, %v492_v18 }
 0x138   :  { %v354_v9 = vpack.c.bf16 %v122_v6, %v122_v6  ;;  %v112_v10 = vmul.f32 %v108_v63, %v101_v7 }
 0x139   :  { %v421_v11 = vpop.eup %420  ;;  %v109_v12 = vmul.f32 %v108_v63, %v98_v8 }
 0x13a   :  { %v423_v13 = vpop.eup %422  ;;  %149 = vst.msk [vmem:[#allocation2 + $0x8] sm:$0xf] %vm146_vm3, %v354_v9  ;;  %v123_v14 = vadd.f32 %v119_v1, %v112_v10  ;;  %v99_v15 = vmul.f32 %v421_v11, %v501_v27 }
 0x13b   :  { %v120_v16 = vadd.f32 %v119_v1, %v109_v12  ;;  %v102_v17 = vmul.f32 %v423_v13, %v508_v33 }
 0x13c   :  { %v355_v19 = vpack.c.bf16 %v123_v14, %v123_v14  ;;  %v110_v20 = vmul.f32 %v108_v63, %v99_v15 }
 0x13d   :  { %v352_v21 = vpack.c.bf16 %v120_v16, %v120_v16  ;;  %v113_v22 = vmul.f32 %v108_v63, %v102_v17 }
 0x13e   :  { %150 = vst.msk [vmem:[#allocation2 + $0xc] sm:$0xf] %vm146_vm3, %v355_v19  ;;  %v121_v18 = vadd.f32 %v119_v1, %v110_v20 }
 0x13f   :  { %147 = vst.msk [vmem:[#allocation2] sm:$0xf] %vm146_vm3, %v352_v21  ;;  %v124_v23 = vadd.f32 %v119_v1, %v113_v22 }
 0x140   :  { %v353_v24 = vpack.c.bf16 %v121_v18, %v121_v18 }
 0x141   :  { %v356_v25 = vpack.c.bf16 %v124_v23, %v124_v23 }
 0x142   :  { %148 = vst.msk [vmem:[#allocation2 + $0x4] sm:$0xf] %vm146_vm3, %v353_v24 }
 0x143   :  { %152 = vst.msk [vmem:[#allocation2 + $0x10] sm:$0x1] %vm151_vm4, %v356_v25 }
 0x145   :  { %v411_v26 = vld [vmem:[#allocation2 + $0x8] sm:$0xff]  }
 0x146   :  { %396 = vmatmul.mubr.msk.bf16.vlgmr.msra.gmra.mxu1 %vm35_vm0, %v411_v26 }
 0x147   :  { %399 = vmatprep.mubr.msk.bf16.mxu1 %vm445_vm2, %v444_v39 }
 0x149   :  { %v412_v27 = vld [vmem:[#allocation2] sm:$0xff]  }
 0x14a   :  { %392 = vmatmul.mubr.msk.bf16.vlgmr.msra.gmra.mxu0 %vm35_vm0, %v412_v27  ;;  %v413_v28 = vld [vmem:[#allocation2 + $0x10] ss:$0 sps:$4 sm:$0x11]  }
 0x14e   :  { %400 = vmatmul.mubr.msk.bf16.gmra.mxu1 %vm35_vm0, %v413_v28 }
 0x206   :  { %v245_v32 = vpop.f32.mrf.mxu1 }
 0x207   :  { %v246_v33 = vadd.f32 %v245_v32, %v167_v31 }
 0x208   :  { %v397_v34 = vpop.f32.mrf.mxu1 }
 0x209   :  { %v344_v35 = vmul.f32 -1.702, %v246_v33 }
 0x20a   :  { %v237_v36 = vpop.f32.mrf.mxu0  ;;  %v248_v37 = vpop.f32.mrf.mxu1 }
 0x20b   :  { %v273_v38 = vmul.f32 1.442695, %v344_v35  ;;  %v238_v39 = vadd.f32 %v237_v36, %v167_v31  ;;  %v249_v40 = vadd.f32 %v248_v37, %v167_v31 }
 0x20c   :  { %v393_v41 = vpop.f32.mrf.mxu0  ;;  %v398_v42 = vpop.f32.mrf.mxu1 }
 0x20d   :  { %424 = vpow2.f32 %v273_v38  ;;  %v342_v43 = vmul.f32 -1.702, %v238_v39  ;;  %v345_v44 = vmul.f32 -1.702, %v249_v40 }
 0x20e   :  { %v240_v45 = vpop.f32.mrf.mxu0  ;;  %v253_v46 = vpop.f32.mrf.mxu1 }
 0x20f   :  { %v269_v47 = vmul.f32 1.442695, %v342_v43  ;;  %v275_v48 = vmul.f32 1.442695, %v345_v44  ;;  %v241_v49 = vadd.f32 %v240_v45, %v167_v31  ;;  %v254_v50 = vadd.f32 %v253_v46, %v167_v31 }
 0x210   :  { %v394_v51 = vpop.f32.mrf.mxu0  ;;  %v401_v52 = vpop.f32.mrf.mxu1 }
 0x211   :  { %426 = vpow2.f32 %v269_v47  ;;  %v343_v53 = vmul.f32 -1.702, %v241_v49  ;;  %v346_v54 = vmul.f32 -1.702, %v254_v50 }
 0x212   :  { %428 = vpow2.f32 %v275_v48  ;;  %v256_v55 = vpop.f32.mrf.mxu1 }
 0x213   :  { %v271_v56 = vmul.f32 1.442695, %v343_v53  ;;  %v277_v57 = vmul.f32 1.442695, %v346_v54 }
 0x214   :  { %v402_v58 = vpop.f32.mrf.mxu1 }
 0x215   :  { %430 = vpow2.f32 %v271_v56 }
 0x216   :  { %432 = vpow2.f32 %v277_v57 }
 0x21a   :  { %v425_v59 = vpop.eup %424 }
 0x21b   :  { %v281_v60 = vadd.f32 1.0, %v425_v59 }
 0x21d   :  { %434 = vrcp.f32 %v281_v60 }
 0x21e   :  { %v427_v61 = vpop.eup %426 }
 0x21f   :  { %v429_v62 = vpop.eup %428  ;;  %v279_v63 = vadd.f32 1.0, %v427_v61 }
 0x220   :  { %v282_v0 = vadd.f32 1.0, %v429_v62 }
 0x222   :  { %v431_v1 = vpop.eup %430  ;;  %436 = vrcp.f32 %v282_v0 }
 0x223   :  { %v433_v2 = vpop.eup %432  ;;  %438 = vrcp.f32 %v279_v63  ;;  %v280_v3 = vadd.f32 1.0, %v431_v1 }
 0x224   :  { %v283_v4 = vadd.f32 1.0, %v433_v2 }
 0x225   :  { %440 = vrcp.f32 %v280_v3 }
 0x226   :  { %442 = vrcp.f32 %v283_v4 }
 0x22a   :  { %v435_v5 = vpop.eup %434 }
 0x22b   :  { %v296_v8 = vmul.f32 %v435_v5, %v246_v33 }
 0x22f   :  { %v437_v6 = vpop.eup %436 }
 0x230   :  { %v439_v7 = vpop.eup %438  ;;  %v297_v9 = vmul.f32 %v437_v6, %v249_v40 }
 0x231   :  { %v294_v13 = vmul.f32 %v439_v7, %v238_v39 }
 0x232   :  { %v441_v10 = vpop.eup %440  ;;  %v378_v11 = vpack.c.bf16 %v297_v9, %v296_v8 }
 0x233   :  { %v443_v12 = vpop.eup %442  ;;  %v295_v14 = vmul.f32 %v441_v10, %v241_v49 }
 0x234   :  { %381 = vst [vmem:[%s566_s5 + $0x8] sm:$0xff] %v378_v11   ;;  %v298_v15 = vmul.f32 %v443_v12, %v254_v50 }
 0x235   :  { %v373_v16 = vpack.c.bf16 %v295_v14, %v294_v13 }
 0x236   :  { %v361_v17 = vpack.c.bf16 %v298_v15, %v298_v15 }
 0x237   :  { %374 = vst [vmem:[%s566_s5] sm:$0xff] %v373_v16  }
 0x238   :  { %324 = vst [vmem:[%s566_s5 + $0x10] sm:$0x1] %v361_v17 }

// kernel: _lambda_.39
= control target key start
LH: loop header
LB: loop body
LE: loop exit
PB: predicated region body
PF: predicated region fallthrough
CT: control target
= control target key end

     0   :  { %s1673_s15 = smov 0   ;;  %s1675_s16 = smov 0   ;;  %s1858_s0 = inlined_call_operand.vmem [shape: bf16[2,17,96], index: 0, kind: input, shape index: {}]   ;;  %s1859_s1 = inlined_call_operand.vmem [shape: bf16[2,17,32], index: 1, kind: input, shape index: {}]   ;;  %s1860_s2 = inlined_call_operand.vmem [shape: bf16[32,32], index: 2, kind: input, shape index: {}]   ;;  %s1861_s3 = inlined_call_operand.vmem [shape: bf16[1,32], index: 3, kind: input, shape index: {}]   ;;  %s1862_s4 = inlined_call_operand.vmem [shape: bf16[2,17,32], index: 4, kind: output, shape index: {}]  }
   0x1   :  { %s1677_s17 = smov 0  }
   0x2 LB: > { %s26_s18 = sadd.s32 1, %s1626_s16  ;;  %p1321_p0 = scmp.ge.s32.totalorder %s1630_s17, 1  ;;  %s1630_s17 = sphi %s1677_s17, %s14_s17   ;;  %s1626_s16 = sphi %s1675_s16, %s1864_s16   ;;  %s1622_s15 = sphi %s1673_s15, %s1863_s15  }
   0x3   : > { %p28_p1 = scmp.ge.s32.totalorder %s26_s18, 2  ;;  %p200_p2 = scmp.lt.s32.totalorder %s1630_s17, 3 }
   0x5   : > { %s1866_s18 = smov (%p28_p1, %s26_s18), 0  ;;  %p201_p3 = pnand %p1321_p0, %p200_p2 }
   0x6   : > { %p239_p4 = scmp.lt.s32.totalorder (!%p201_p3), %s1622_s15, 1  ;;  %s1632_s23 = smov (!%p201_p3), 96  }
   0x7   : > { %204 = sbr.rel (%p201_p3) target bundleno = 2807 (0xaf7), region = 36  ;;  %s1633_s24 = smov (!%p201_p3), 64  }
   0x8   : > { %s1634_s25 = smov (!%p201_p3), 88   ;;  %s1636_s26 = smov (!%p201_p3), 120  }
   0x9   : > { %s1637_s27 = smov (!%p201_p3), 56   ;;  %s1638_s28 = smov (!%p201_p3), 80  }
   0xa   : > { %s1639_s29 = smov (!%p201_p3), 112   ;;  %s1640_s30 = smov (!%p201_p3), 48  }
   0xb   : > { %s1641_s5 = smov (!%p201_p3), 72   ;;  %s1642_s6 = smov (!%p201_p3), 104  }
   0xc   : > { %s1868_s15 = smov (!%p239_p4, %s1622_s15), 1  ;;  %vm288_vm0 = vcmask 64512   ;;  %vm356_vm1 = vcmask 131072   ;;  %vm349_vm2 = vcmask 138240   ;;  %vm397_vm3 = vcmask 1040384   ;;  %s1643_s7 = smov 40  }
   0xd   : > { %s1691_s19 = smul.u32 12, %s1868_s15  ;;  %v1635_v22 = vmov 0   ;;  %vm467_vm4 = vcmask 57344   ;;  %vm468_vm5 = vsmask.f32 256  ;;  %vm464_vm7 = vcmask 60416  }
   0xe   : > { %v1716_v23 = vsel %vm397_vm3, 65535, %v1635_v22  ;;  %vm469_vm6 = vmand %vm467_vm4, %vm468_vm5  ;;  %v470_v53 = vld [vmem:[#allocation3 + $0x8] sm:$0x1]  ;;  %s1644_s8 = smov 8   ;;  %s1645_s9 = smov 16   ;;  %vm671_vm8 = vcmask 122944  }
   0xf   : > { %s1697_s22 = scalar_lea.vmem %s1858_s0, %s1691_s19  ;;  %vm672_vm9 = vmand %vm671_vm8, %vm468_vm5  ;;  %vm668_vm10 = vcmask 126016   ;;  %vm874_vm11 = vcmask 188544   ;;  %vm871_vm12 = vcmask 191616   ;;  %s1646_s14 = smov 24   ;;  %vm268_vm14 = vcmask 261120  }
  0x10   : > { %v1548_v0 = vld [vmem:[%s1697_s22 + $0x8] ss:$0 sps:$4 sm:$0x11]   ;;  %v1549_v1 = vld [vmem:[%s1697_s22] sm:$0xff]   ;;  %vm875_vm13 = vmand %vm874_vm11, %vm468_vm5  ;;  %vm271_vm15 = vcmask 253952   ;;  %vm1211_vm4 = vcmask 257024  }
  0x11   : > { %286 = vrot.lane.b32.xlu0 %v1548_v0, %s1632_s23  ;;  %1431 = vmatprep.mubr.msk.bf16.mxu0 %vm288_vm0, %v1549_v1  ;;  %v1712_v13 = vld [vmem:[%s1697_s22 + $0x8] ss:$0 sps:$4 sm:$0x11]   ;;  %v1724_v33 = vld [vmem:[%s1697_s22] sm:$0xff]   ;;  %vm1215_vm3 = vmand %vm271_vm15, %vm468_vm5 }
  0x12   : > { %v1750_v22 = vld [vmem:[%s1697_s22] sm:$0xff]  }
  0x15   : > { %284 = vrot.lane.b32.xlu0 %v1549_v1, %s1632_s23  ;;  %s251_s23 = scalar_lea.vmem %s1859_s1, %s1691_s19 }
  0x83   : > { %v287_v2 = vpop.permute.xlu0 %286 }
  0x84   : > { %1499 = vmatprep.subr.msk.bf16.mxu0 %vm288_vm0, %v287_v2  ;;  %v299_v3 = vsel %vm288_vm0, %v287_v2, 0 }
  0x85   : > { %1428 = vmatpush3.bf16.xpose.msra.mxu0 %v299_v3 }
  0x87   : > { %v285_v4 = vpop.permute.xlu0 %284 }
  0x88   : > { %1500 = vmatprep.subr.msk.bf16.mxu0 %vm288_vm0, %v285_v4  ;;  %v296_v5 = vsel %vm288_vm0, %v285_v4, 0 }
  0x8d   : > { %1430 = vmatpush3.bf16.xpose.msra.mxu0 %v296_v5 }
  0x94   : > { %1432 = vmatmul.mubr.msk.bf16.vlgmr.msra.gmra.mxu0 %vm288_vm0, %v1548_v0 }
 0x154   : > { %v1433_v6 = vpop.f32.mrf.mxu0 }
 0x155   : > { %v357_v7 = vsel %vm356_vm1, %v1433_v6, -inf }
 0x156   : > { %358 = vmax.xlane.f32.xlu0 %v357_v7  ;;  %v335_v8 = vpop.f32.mrf.mxu0 }
 0x157   : > { %v350_v9 = vsel %vm349_vm2, %v335_v8, -inf }
 0x158   : > { %351 = vmax.xlane.f32.xlu1 %v350_v9  ;;  %v1434_v10 = vpop.f32.mrf.mxu0 }
 0x15a   : > { %v338_v11 = vpop.f32.mrf.mxu0 }
 0x15b   : > { %v353_v12 = vsel %vm349_vm2, %v338_v11, -inf }
 0x15c   : > { %354 = vmax.xlane.f32.xlu1 %v353_v12 }
 0x16c   : > { %490 = vrot.lane.b32.xlu0 %v1712_v13, %s1634_s25 }
 0x16d   : > { %388 = vrot.lane.b32.xlu1 %v1548_v0, %s1633_s24 }
 0x1df   : > { %v359_v14 = vpop.xlane.xlu0 %358 }
 0x1e0   : > { %v362_v15 = vsub.f32 %v1433_v6, %v359_v14 }
 0x1e1   : > { %v352_v16 = vpop.xlane.xlu1 %351 }
 0x1e2   : > { %v367_v17 = vmul.f32 1.442695, %v362_v15  ;;  %v360_v18 = vsub.f32 %v335_v8, %v352_v16 }
 0x1e3   : > { %v491_v38 = vpop.permute.xlu0 %490 }
 0x1e4   : > { %1560 = vpow2.f32 %v367_v17  ;;  %v363_v19 = vmul.f32 1.442695, %v360_v18  ;;  %v502_v47 = vsel %vm288_vm0, %v491_v38, 0 }
 0x1e5   : > { %v355_v20 = vpop.xlane.xlu1 %354 }
 0x1e6   : > { %1562 = vpow2.f32 %v363_v19  ;;  %v361_v21 = vsub.f32 %v338_v11, %v355_v20 }
 0x1e8   : > { %v365_v24 = vmul.f32 1.442695, %v361_v21  ;;  %v1552_v21 = vld [vmem:[%s1697_s22 + $0x8] ss:$0 sps:$4 sm:$0x11]  }
 0x1e9   : > { %v389_v25 = vpop.permute.xlu1 %388 }
 0x1ea   : > { %1564 = vpow2.f32 %v365_v24  ;;  %v401_v26 = vand.u32 %v1716_v23, %v389_v25 }
 0x1ec   : > { %1435 = vmatprep.subr.bf16.mxu1 %v401_v26 }
 0x1ed   : > { %1436 = vmatpush3.bf16.msra.mxu1 %v401_v26 }
 0x1f1   : > { %v1561_v27 = vpop.eup %1560 }
 0x1f2   : > { %v375_v28 = vsel %vm356_vm1, %v1561_v27, 0.0 }
 0x1f3   : > { %v1563_v29 = vpop.eup %1562  ;;  %376 = vadd.xlane.f32.xlu1 %v375_v28 }
 0x1f4   : > { %v369_v30 = vsel %vm349_vm2, %v1563_v29, 0.0 }
 0x1f7   : > { %v1565_v31 = vpop.eup %1564  ;;  %370 = vadd.xlane.f32.xlu1 %v369_v30 }
 0x1f8   : > { %v372_v32 = vsel %vm349_vm2, %v1565_v31, 0.0 }
 0x1fb   : > { %373 = vadd.xlane.f32.xlu1 %v372_v32 }
 0x20c   : > { %386 = vrot.lane.b32.xlu1 %v1549_v1, %s1633_s24 }
 0x210   : > { %488 = vrot.lane.b32.xlu1 %v1724_v33, %s1634_s25 }
 0x214   : > { %484 = vrot.lane.b32.xlu1 %v1724_v33, %s1636_s26 }
 0x218   : > { %486 = vrot.lane.b32.xlu1 %v1712_v13, %s1636_s26  ;;  %s262_s26 = scalar_lea.vmem %s1862_s4, %s1691_s19 }
 0x27c   : > { %v377_v34 = vpop.xlane.xlu1 %376 }
 0x27d   : > { %1566 = vrcp.f32 %v377_v34 }
 0x280   : > { %v371_v35 = vpop.xlane.xlu1 %370 }
 0x281   : > { %1568 = vrcp.f32 %v371_v35 }
 0x284   : > { %v374_v36 = vpop.xlane.xlu1 %373 }
 0x285   : > { %1570 = vrcp.f32 %v374_v36 }
 0x288   : > { %v387_v37 = vpop.permute.xlu1 %386 }
 0x289   : > { %1437 = vmatprep.subr.bf16.mxu1 %v387_v37 }
 0x28a   : > { %1438 = vmatpush3.bf16.msra.mxu1 %v387_v37  ;;  %v1567_v39 = vpop.eup %1566 }
 0x28b   : > { %1501 = vmatprep.subr.msk.bf16.mxu1 %vm288_vm0, %v491_v38  ;;  %v383_v43 = vmul.f32 %v1567_v39, %v1561_v27 }
 0x28c   : > { %v489_v41 = vpop.permute.xlu1 %488 }
 0x28d   : > { %v385_v48 = vpack.c.bf16 %v383_v43, %v383_v43  ;;  %v499_v50 = vsel %vm288_vm0, %v489_v41, 0 }
 0x28e   : > { %v1569_v40 = vpop.eup %1568 }
 0x28f   : > { %v381_v44 = vmul.f32 %v1569_v40, %v1563_v29 }
 0x290   : > { %v485_v49 = vpop.permute.xlu1 %484 }
 0x292   : > { %v1571_v42 = vpop.eup %1570 }
 0x293   : > { %v382_v45 = vmul.f32 %v1571_v42, %v1565_v31 }
 0x294   : > { %v487_v51 = vpop.permute.xlu1 %486 }
 0x295   : > { %v384_v46 = vpack.c.bf16 %v382_v45, %v381_v44 }
 0x297   : > { %1439 = vmatprep.mubr.msk.bf16.mxu1 %vm349_vm2, %v384_v46 }
 0x298   : > { %1440 = vmatmul.mubr.msk.bf16.vlgmr.msra.gmra.mxu1 %vm349_vm2, %v385_v48 }
 0x299   : > { %1444 = vmatpush3.bf16.xpose.msra.mxu1 %v502_v47  ;;  %1447 = vmatprep.mubr.msk.bf16.mxu1 %vm288_vm0, %v485_v49 }
 0x29a   : > { %1502 = vmatprep.subr.msk.bf16.mxu1 %vm288_vm0, %v489_v41 }
 0x2a1   : > { %1446 = vmatpush3.bf16.xpose.msra.mxu1 %v499_v50 }
 0x2a8   : > { %1448 = vmatmul.mubr.msk.bf16.vlgmr.msra.gmra.mxu1 %vm288_vm0, %v487_v51 }
 0x358   : > { %v1441_v52 = vpop.f32.mrf.mxu1 }
 0x359   : > { %v1374_v54 = vpack.c.bf16 %v1441_v52, %v1441_v52 }
 0x35a   : > { %v437_v55 = vpop.f32.mrf.mxu1 }
 0x35b   : > { %v471_v56 = vsel %vm469_vm6, %v1374_v54, %v470_v53  ;;  %v1372_v57 = vpack.c.bf16 %v437_v55, %v437_v55 }
 0x35c   : > { %472 = vst [vmem:[#allocation3 + $0x8] sm:$0x1] %v471_v56  ;;  %v1442_v58 = vpop.f32.mrf.mxu1 }
 0x35d   : > { %465 = vst.msk [vmem:[#allocation3] sm:$0xf] %vm464_vm7, %v1372_v57 }
 0x35e   : > { %v440_v59 = vpop.f32.mrf.mxu1 }
 0x35f   : > { %v1373_v60 = vpack.c.bf16 %v440_v59, %v440_v59 }
 0x361   : > { %466 = vst.msk [vmem:[#allocation3 + $0x4] sm:$0xf] %vm464_vm7, %v1373_v60 }
 0x368   : > { %v1449_v61 = vpop.f32.mrf.mxu1 }
 0x369   : > { %v558_v2 = vsel %vm356_vm1, %v1449_v61, -inf }
 0x36a   : > { %v538_v62 = vpop.f32.mrf.mxu1 }
 0x36b   : > { %v552_v63 = vsel %vm349_vm2, %v538_v62, -inf }
 0x36c   : > { %553 = vmax.xlane.f32.xlu1 %v552_v63  ;;  %v1450_v0 = vpop.f32.mrf.mxu1 }
 0x36e   : > { %v541_v1 = vpop.f32.mrf.mxu1 }
 0x36f   : > { %v555_v3 = vsel %vm349_vm2, %v541_v1, -inf }
 0x370   : > { %559 = vmax.xlane.f32.xlu1 %v558_v2  ;;  %556 = vmax.xlane.f32.xlu0 %v555_v3 }
 0x381   : > { %589 = vrot.lane.b32.xlu1 %v1712_v13, %s1637_s27 }
 0x3f5   : > { %v554_v4 = vpop.xlane.xlu1 %553 }
 0x3f6   : > { %v561_v5 = vsub.f32 %v538_v62, %v554_v4 }
 0x3f8   : > { %v564_v10 = vmul.f32 1.442695, %v561_v5 }
 0x3f9   : > { %v560_v6 = vpop.xlane.xlu1 %559  ;;  %v557_v7 = vpop.xlane.xlu0 %556 }
 0x3fa   : > { %v563_v8 = vsub.f32 %v1449_v61, %v560_v6  ;;  %v562_v9 = vsub.f32 %v541_v1, %v557_v7  ;;  %v1779_v6 = vld [vmem:[%s1697_s22 + $0x8] ss:$0 sps:$4 sm:$0x11]   ;;  %v1783_v7 = vld [vmem:[%s1697_s22] sm:$0xff]  }
 0x3fc   : > { %v568_v11 = vmul.f32 1.442695, %v563_v8  ;;  %v566_v12 = vmul.f32 1.442695, %v562_v9 }
 0x3fd   : > { %v590_v14 = vpop.permute.xlu1 %589 }
 0x3fe   : > { %1572 = vpow2.f32 %v568_v11  ;;  %v599_v15 = vand.u32 %v590_v14, %v1716_v23 }
 0x3ff   : > { %1574 = vpow2.f32 %v566_v12 }
 0x400   : > { %1576 = vpow2.f32 %v564_v10  ;;  %1451 = vmatprep.subr.bf16.mxu0 %v599_v15 }
 0x401   : > { %1452 = vmatpush3.bf16.msra.mxu0 %v599_v15 }
 0x40b   : > { %v1573_v13 = vpop.eup %1572 }
 0x40c   : > { %v1575_v16 = vpop.eup %1574  ;;  %v576_v17 = vsel %vm356_vm1, %v1573_v13, 0.0 }
 0x40d   : > { %v1577_v18 = vpop.eup %1576  ;;  %577 = vadd.xlane.f32.xlu0 %v576_v17  ;;  %v573_v19 = vsel %vm349_vm2, %v1575_v16, 0.0 }
 0x40e   : > { %574 = vadd.xlane.f32.xlu1 %v573_v19  ;;  %v570_v20 = vsel %vm349_vm2, %v1577_v18, 0.0 }
 0x411   : > { %571 = vadd.xlane.f32.xlu0 %v570_v20 }
 0x41f   : > { %693 = vrot.lane.b32.xlu1 %v1552_v21, %s1638_s28 }
 0x423   : > { %691 = vrot.lane.b32.xlu1 %v1750_v22, %s1638_s28 }
 0x427   : > { %587 = vrot.lane.b32.xlu0 %v1724_v33, %s1637_s27  ;;  %689 = vrot.lane.b32.xlu1 %v1552_v21, %s1639_s29 }
 0x42b   : > { %687 = vrot.lane.b32.xlu0 %v1750_v22, %s1639_s29 }
 0x496   : > { %v578_v24 = vpop.xlane.xlu0 %577 }
 0x497   : > { %v575_v25 = vpop.xlane.xlu1 %574  ;;  %1578 = vrcp.f32 %v578_v24 }
 0x498   : > { %1580 = vrcp.f32 %v575_v25 }
 0x49a   : > { %v572_v26 = vpop.xlane.xlu0 %571 }
 0x49b   : > { %1582 = vrcp.f32 %v572_v26  ;;  %v694_v28 = vpop.permute.xlu1 %693 }
 0x49c   : > { %v705_v36 = vsel %vm288_vm0, %v694_v28, 0 }
 0x49e   : > { %v588_v27 = vpop.permute.xlu0 %587 }
 0x49f   : > { %1453 = vmatprep.subr.bf16.mxu0 %v588_v27  ;;  %v692_v39 = vpop.permute.xlu1 %691 }
 0x4a0   : > { %1454 = vmatpush3.bf16.msra.mxu0 %v588_v27  ;;  %v702_v40 = vsel %vm288_vm0, %v692_v39, 0 }
 0x4a1   : > { %1503 = vmatprep.subr.msk.bf16.mxu0 %vm288_vm0, %v694_v28 }
 0x4a2   : > { %v688_v38 = vpop.permute.xlu0 %687 }
 0x4a3   : > { %v690_v41 = vpop.permute.xlu1 %689 }
 0x4a4   : > { %v1579_v29 = vpop.eup %1578 }
 0x4a5   : > { %v1581_v30 = vpop.eup %1580  ;;  %v584_v32 = vmul.f32 %v1579_v29, %v1573_v13 }
 0x4a6   : > { %v583_v34 = vmul.f32 %v1581_v30, %v1575_v16 }
 0x4a7   : > { %v586_v37 = vpack.c.bf16 %v584_v32, %v584_v32 }
 0x4a8   : > { %v1583_v31 = vpop.eup %1582 }
 0x4a9   : > { %v582_v33 = vmul.f32 %v1583_v31, %v1577_v18 }
 0x4ab   : > { %v585_v35 = vpack.c.bf16 %v583_v34, %v582_v33 }
 0x4ad   : > { %1455 = vmatprep.mubr.msk.bf16.mxu0 %vm349_vm2, %v585_v35 }
 0x4ae   : > { %1456 = vmatmul.mubr.msk.bf16.vlgmr.msra.gmra.mxu0 %vm349_vm2, %v586_v37 }
 0x4af   : > { %1460 = vmatpush3.bf16.xpose.msra.mxu0 %v705_v36  ;;  %1463 = vmatprep.mubr.msk.bf16.mxu0 %vm288_vm0, %v688_v38 }
 0x4b0   : > { %1504 = vmatprep.subr.msk.bf16.mxu0 %vm288_vm0, %v692_v39 }
 0x4b7   : > { %1462 = vmatpush3.bf16.xpose.msra.mxu0 %v702_v40 }
 0x4be   : > { %1464 = vmatmul.mubr.msk.bf16.vlgmr.msra.gmra.mxu0 %vm288_vm0, %v690_v41 }
 0x56e   : > { %v1764_v42 = vpop.f32.mrf.mxu0 }
 0x570   : > { %v1766_v43 = vpop.f32.mrf.mxu0 }
 0x572   : > { %v1458_v44 = vpop.f32.mrf.mxu0 }
 0x574   : > { %v1768_v45 = vpop.f32.mrf.mxu0 }
 0x57e   : > { %v1465_v46 = vpop.f32.mrf.mxu0 }
 0x57f   : > { %v761_v51 = vsel %vm356_vm1, %v1465_v46, -inf }
 0x580   : > { %v741_v47 = vpop.f32.mrf.mxu0 }
 0x581   : > { %v755_v48 = vsel %vm349_vm2, %v741_v47, -inf }
 0x582   : > { %756 = vmax.xlane.f32.xlu0 %v755_v48  ;;  %v1466_v49 = vpop.f32.mrf.mxu0 }
 0x584   : > { %v744_v50 = vpop.f32.mrf.mxu0 }
 0x585   : > { %v758_v52 = vsel %vm349_vm2, %v744_v50, -inf }
 0x586   : > { %762 = vmax.xlane.f32.xlu0 %v761_v51  ;;  %759 = vmax.xlane.f32.xlu1 %v758_v52 }
 0x597   : > { %792 = vrot.lane.b32.xlu1 %v1552_v21, %s1640_s30 }
 0x60b   : > { %v757_v53 = vpop.xlane.xlu0 %756 }
 0x60c   : > { %v764_v54 = vsub.f32 %v741_v47, %v757_v53 }
 0x60e   : > { %v767_v59 = vmul.f32 1.442695, %v764_v54 }
 0x60f   : > { %v763_v55 = vpop.xlane.xlu0 %762  ;;  %v760_v56 = vpop.xlane.xlu1 %759 }
 0x610   : > { %v766_v57 = vsub.f32 %v1465_v46, %v763_v55  ;;  %v765_v58 = vsub.f32 %v744_v50, %v760_v56  ;;  %v1377_v56 = vpack.c.bf16 %v1764_v42, %v1764_v42 }
 0x612   : > { %v771_v60 = vmul.f32 1.442695, %v766_v57  ;;  %v769_v61 = vmul.f32 1.442695, %v765_v58  ;;  %v1375_v58 = vpack.c.bf16 %v1766_v43, %v1766_v43 }
 0x613   : > { %v793_v62 = vpop.permute.xlu1 %792 }
 0x614   : > { %1584 = vpow2.f32 %v771_v60  ;;  %v802_v63 = vand.u32 %v793_v62, %v1716_v23 }
 0x615   : > { %1586 = vpow2.f32 %v769_v61 }
 0x616   : > { %1588 = vpow2.f32 %v767_v59  ;;  %1467 = vmatprep.subr.bf16.mxu1 %v802_v63  ;;  %v1376_v59 = vpack.c.bf16 %v1768_v45, %v1768_v45  ;;  %v673_v45 = vld [vmem:[#allocation3 + $0x8] sm:$0x1] }
 0x617   : > { %1468 = vmatpush3.bf16.msra.mxu1 %v802_v63 }
 0x621   : > { %v1585_v0 = vpop.eup %1584 }
 0x622   : > { %v1587_v1 = vpop.eup %1586  ;;  %v779_v2 = vsel %vm356_vm1, %v1585_v0, 0.0 }
 0x623   : > { %v1589_v3 = vpop.eup %1588  ;;  %780 = vadd.xlane.f32.xlu0 %v779_v2  ;;  %v776_v4 = vsel %vm349_vm2, %v1587_v1, 0.0 }
 0x624   : > { %777 = vadd.xlane.f32.xlu1 %v776_v4  ;;  %v773_v5 = vsel %vm349_vm2, %v1589_v3, 0.0 }
 0x627   : > { %774 = vadd.xlane.f32.xlu0 %v773_v5 }
 0x635   : > { %896 = vrot.lane.b32.xlu1 %v1779_v6, %s1641_s5 }
 0x639   : > { %894 = vrot.lane.b32.xlu1 %v1783_v7, %s1641_s5 }
 0x63d   : > { %790 = vrot.lane.b32.xlu0 %v1750_v22, %s1640_s30  ;;  %892 = vrot.lane.b32.xlu1 %v1779_v6, %s1642_s6 }
 0x641   : > { %890 = vrot.lane.b32.xlu0 %v1783_v7, %s1642_s6 }
 0x6ac   : > { %v781_v8 = vpop.xlane.xlu0 %780 }
 0x6ad   : > { %v778_v9 = vpop.xlane.xlu1 %777  ;;  %1590 = vrcp.f32 %v781_v8 }
 0x6ae   : > { %1592 = vrcp.f32 %v778_v9 }
 0x6b0   : > { %v775_v10 = vpop.xlane.xlu0 %774 }
 0x6b1   : > { %1594 = vrcp.f32 %v775_v10  ;;  %v897_v12 = vpop.permute.xlu1 %896 }
 0x6b2   : > { %v908_v20 = vsel %vm288_vm0, %v897_v12, 0 }
 0x6b4   : > { %v791_v11 = vpop.permute.xlu0 %790 }
 0x6b5   : > { %1469 = vmatprep.subr.bf16.mxu1 %v791_v11  ;;  %v895_v24 = vpop.permute.xlu1 %894 }
 0x6b6   : > { %1470 = vmatpush3.bf16.msra.mxu1 %v791_v11  ;;  %v905_v25 = vsel %vm288_vm0, %v895_v24, 0 }
 0x6b7   : > { %1505 = vmatprep.subr.msk.bf16.mxu1 %vm288_vm0, %v897_v12 }
 0x6b8   : > { %v891_v22 = vpop.permute.xlu0 %890 }
 0x6b9   : > { %v893_v26 = vpop.permute.xlu1 %892 }
 0x6ba   : > { %v1591_v14 = vpop.eup %1590 }
 0x6bb   : > { %v1593_v15 = vpop.eup %1592  ;;  %v787_v16 = vmul.f32 %v1591_v14, %v1585_v0 }
 0x6bc   : > { %v786_v18 = vmul.f32 %v1593_v15, %v1587_v1 }
 0x6bd   : > { %v789_v21 = vpack.c.bf16 %v787_v16, %v787_v16 }
 0x6be   : > { %v1595_v13 = vpop.eup %1594 }
 0x6bf   : > { %v785_v17 = vmul.f32 %v1595_v13, %v1589_v3 }
 0x6c1   : > { %v788_v19 = vpack.c.bf16 %v786_v18, %v785_v17  ;;  %v1556_v18 = vld [vmem:[%s1860_s2 + $0x8] sm:$0xff]  }
 0x6c3   : > { %1471 = vmatprep.mubr.msk.bf16.mxu1 %vm349_vm2, %v788_v19  ;;  %v1557_v19 = vld [vmem:[%s1860_s2] sm:$0xff]  }
 0x6c4   : > { %1472 = vmatmul.mubr.msk.bf16.vlgmr.msra.gmra.mxu1 %vm349_vm2, %v789_v21 }
 0x6c5   : > { %1476 = vmatpush3.bf16.xpose.msra.mxu1 %v908_v20  ;;  %1479 = vmatprep.mubr.msk.bf16.mxu1 %vm288_vm0, %v891_v22 }
 0x6c6   : > { %1506 = vmatprep.subr.msk.bf16.mxu1 %vm288_vm0, %v895_v24 }
 0x6cd   : > { %1478 = vmatpush3.bf16.xpose.msra.mxu1 %v905_v25 }
 0x6d4   : > { %1480 = vmatmul.mubr.msk.bf16.vlgmr.msra.gmra.mxu1 %vm288_vm0, %v893_v26  ;;  %vm1074_vm0 = vcmask 257216  }
 0x784   : > { %v1473_v27 = vpop.f32.mrf.mxu1 }
 0x785   : > { %v1380_v57 = vpack.c.bf16 %v1473_v27, %v1473_v27 }
 0x786   : > { %v838_v28 = vpop.f32.mrf.mxu1 }
 0x787   : > { %v1378_v60 = vpack.c.bf16 %v838_v28, %v838_v28  ;;  %v1647_v28 = vmov 0.0  }
 0x788   : > { %v1474_v29 = vpop.f32.mrf.mxu1  ;;  %272 = vst.msk [vmem:[#allocation2 + $0x10] sm:$0x1] %vm271_vm15, %v1647_v28 }
 0x789   : > { %269 = vst.msk [vmem:[#allocation2] sm:$0xff] %vm268_vm14, %v1647_v28  ;;  %270 = vst.msk [vmem:[#allocation2 + $0x8] sm:$0xff] %vm268_vm14, %v1647_v28 }
 0x78a   : > { %v841_v30 = vpop.f32.mrf.mxu1 }
 0x78b   : > { %v1379_v61 = vpack.c.bf16 %v841_v30, %v841_v30 }
 0x794   : > { %v1481_v31 = vpop.f32.mrf.mxu1 }
 0x795   : > { %v964_v36 = vsel %vm356_vm1, %v1481_v31, -inf }
 0x796   : > { %v944_v32 = vpop.f32.mrf.mxu1 }
 0x797   : > { %v958_v33 = vsel %vm349_vm2, %v944_v32, -inf }
 0x798   : > { %959 = vmax.xlane.f32.xlu0 %v958_v33  ;;  %v1482_v34 = vpop.f32.mrf.mxu1 }
 0x79a   : > { %v947_v35 = vpop.f32.mrf.mxu1 }
 0x79b   : > { %v961_v37 = vsel %vm349_vm2, %v947_v35, -inf }
 0x79c   : > { %965 = vmax.xlane.f32.xlu0 %v964_v36  ;;  %962 = vmax.xlane.f32.xlu1 %v961_v37  ;;  %v1182_v36 = vlaneseq  ;;  %v1084_v37 = vld [vmem:[#allocation2 + $0x10] sm:$0x1] }
 0x821   : > { %v960_v38 = vpop.xlane.xlu0 %959 }
 0x822   : > { %v967_v39 = vsub.f32 %v944_v32, %v960_v38  ;;  %v1183_v38 = vshrl.u32 %v1182_v36, 7 }
 0x824   : > { %v970_v47 = vmul.f32 1.442695, %v967_v39 }
 0x825   : > { %v966_v40 = vpop.xlane.xlu0 %965  ;;  %v963_v41 = vpop.xlane.xlu1 %962 }
 0x826   : > { %v969_v44 = vsub.f32 %v1481_v31, %v966_v40  ;;  %v968_v46 = vsub.f32 %v947_v35, %v963_v41  ;;  %v1180_v40 = vld [vmem:[%s1861_s3] sm:$0x1] }
 0x827   : > { %v1082_v41 = vld [vmem:[#allocation2] sm:$0xff] }
 0x828   : > { %v974_v48 = vmul.f32 1.442695, %v969_v44  ;;  %v972_v49 = vmul.f32 1.442695, %v968_v46 }
 0x82a   : > { %1596 = vpow2.f32 %v974_v48  ;;  %v1184_v48 = vsub.s32 0, %v1183_v38 }
 0x82b   : > { %1598 = vpow2.f32 %v972_v49 }
 0x82c   : > { %1600 = vpow2.f32 %v970_v47  ;;  %v1181_v47 = vunpack.c.l.bf16 %v1180_v40 }
 0x837   : > { %v1597_v50 = vpop.eup %1596 }
 0x838   : > { %v1599_v51 = vpop.eup %1598  ;;  %v982_v52 = vsel %vm356_vm1, %v1597_v50, 0.0  ;;  %vm1077_vm1 = vcmask 254144  }
 0x839   : > { %v1601_v53 = vpop.eup %1600  ;;  %983 = vadd.xlane.f32.xlu0 %v982_v52  ;;  %v979_v54 = vsel %vm349_vm2, %v1599_v51, 0.0  ;;  %v1191_v52 = vld [vmem:[%s251_s23 + $0x8] sm:$0x1] }
 0x83a   : > { %980 = vadd.xlane.f32.xlu1 %v979_v54  ;;  %v976_v55 = vsel %vm349_vm2, %v1601_v53, 0.0  ;;  %v1185_v54 = vrot.slane %v1181_v47, %v1184_v48 }
 0x83d   : > { %977 = vadd.xlane.f32.xlu0 %v976_v55 }
 0x84b   : > { %995 = vrot.lane.b32.xlu1 %v1779_v6, %s1643_s7 }
 0x84f   : > { %663 = vrot.lane.b32.xlu1 %v1377_v56, %s1644_s8  ;;  %v1388_v56 = vld [vmem:[%s251_s23] sm:$0xff]  }
 0x853   : > { %866 = vrot.lane.b32.xlu1 %v1380_v57, %s1645_s9  ;;  %993 = vrot.lane.b32.xlu0 %v1783_v7, %s1643_s7  ;;  %v1194_v57 = vunpack.c.l.bf16 %v1191_v52 }
 0x857   : > { %661 = vrot.lane.b32.xlu1 %v1376_v59, %s1644_s8  ;;  %659 = vrot.lane.b32.xlu0 %v1375_v58, %s1644_s8 }
 0x85b   : > { %864 = vrot.lane.b32.xlu1 %v1379_v61, %s1645_s9  ;;  %862 = vrot.lane.b32.xlu0 %v1378_v60, %s1645_s9  ;;  %v1389_v60 = vunpack.c.l.bf16 %v1388_v56 }
 0x8c2   : > { %v984_v42 = vpop.xlane.xlu0 %983 }
 0x8c3   : > { %v981_v62 = vpop.xlane.xlu1 %980  ;;  %1602 = vrcp.f32 %v984_v42 }
 0x8c4   : > { %1604 = vrcp.f32 %v981_v62 }
 0x8c6   : > { %v978_v63 = vpop.xlane.xlu0 %977 }
 0x8c7   : > { %1606 = vrcp.f32 %v978_v63  ;;  %v996_v0 = vpop.permute.xlu1 %995  ;;  %v1216_v63 = vld [vmem:[%s262_s26 + $0x8] sm:$0x1] }
 0x8c8   : > { %v1005_v1 = vand.u32 %v996_v0, %v1716_v23  ;;  %v1390_v0 = vunpack.c.h.bf16 %v1388_v56 }
 0x8ca   : > { %v994_v43 = vpop.permute.xlu0 %993  ;;  %1483 = vmatprep.subr.bf16.mxu0 %v1005_v1 }
 0x8cb   : > { %v664_v2 = vpop.permute.xlu1 %663  ;;  %1484 = vmatpush3.bf16.msra.mxu0 %v1005_v1 }
 0x8cc   : > { %v674_v3 = vsel %vm672_vm9, %v664_v2, %v673_v45  ;;  %1485 = vmatprep.subr.bf16.mxu0 %v994_v43 }
 0x8cd   : > { %675 = vst [vmem:[#allocation3 + $0x8] sm:$0x1] %v674_v3 }
 0x8ce   : > { %v660_v4 = vpop.permute.xlu0 %659 }
 0x8cf   : > { %669 = vst.msk [vmem:[#allocation3] sm:$0xf] %vm668_vm10, %v660_v4  ;;  %v867_v5 = vpop.permute.xlu1 %866  ;;  %1486 = vmatpush3.bf16.msra.mxu0 %v994_v43 }
 0x8d0   : > { %v1603_v6 = vpop.eup %1602  ;;  %1491 = vmatprep.subr.bf16.mxu0 %v1556_v18 }
 0x8d1   : > { %v1605_v23 = vpop.eup %1604  ;;  %v990_v11 = vmul.f32 %v1603_v6, %v1597_v50 }
 0x8d2   : > { %v863_v7 = vpop.permute.xlu0 %862  ;;  %v989_v15 = vmul.f32 %v1605_v23, %v1599_v51  ;;  %v1083_v51 = vld [vmem:[#allocation2 + $0x8] sm:$0xff] }
 0x8d3   : > { %872 = vst.msk [vmem:[#allocation3] sm:$0xf] %vm871_vm12, %v863_v7  ;;  %v662_v8 = vpop.permute.xlu1 %661  ;;  %v992_v17 = vpack.c.bf16 %v990_v11, %v990_v11 }
 0x8d4   : > { %v1607_v9 = vpop.eup %1606  ;;  %v876_v10 = vld [vmem:[#allocation3 + $0x8] sm:$0x1]  ;;  %670 = vst.msk [vmem:[#allocation3 + $0x4] sm:$0xf] %vm668_vm10, %v662_v8 }
 0x8d5   : > { %v877_v12 = vsel %vm875_vm13, %v867_v5, %v876_v10  ;;  %v988_v14 = vmul.f32 %v1607_v9, %v1601_v53 }
 0x8d6   : > { %878 = vst [vmem:[#allocation3 + $0x8] sm:$0x1] %v877_v12 }
 0x8d7   : > { %v865_v13 = vpop.permute.xlu1 %864  ;;  %v991_v16 = vpack.c.bf16 %v989_v15, %v988_v14 }
 0x8d8   : > { %873 = vst.msk [vmem:[#allocation3 + $0x4] sm:$0xf] %vm871_vm12, %v865_v13 }
 0x8d9   : > { %1487 = vmatprep.mubr.msk.bf16.mxu0 %vm349_vm2, %v991_v16 }
 0x8da   : > { %1488 = vmatmul.mubr.msk.bf16.vlgmr.msra.gmra.mxu0 %vm349_vm2, %v992_v17  ;;  %vm1078_vm2 = vmand %vm1077_vm1, %vm468_vm5 }
 0x8db   : > { %1492 = vmatpush3.bf16.msra.mxu0 %v1556_v18 }
 0x8dc   : > { %1493 = vmatprep.subr.bf16.mxu0 %v1557_v19 }
 0x8dd   : > { %v1079_v31 = vld [vmem:[#allocation3 + $0x8] sm:$0x1] }
 0x8df   : > { %1494 = vmatpush3.bf16.msra.mxu0 %v1557_v19 }
 0x99a   : > { %v1489_v20 = vpop.f32.mrf.mxu0 }
 0x99b   : > { %v1383_v26 = vpack.c.bf16 %v1489_v20, %v1489_v20 }
 0x99c   : > { %v1041_v21 = vpop.f32.mrf.mxu0 }
 0x99d   : > { %v1381_v22 = vpack.c.bf16 %v1041_v21, %v1041_v21 }
 0x99e   : > { %v1490_v24 = vpop.f32.mrf.mxu0 }
 0x99f   : > { %1065 = vrot.lane.b32.xlu0 %v1381_v22, %s1646_s14 }
 0x9a0   : > { %v1044_v25 = vpop.f32.mrf.mxu0 }
 0x9a1   : > { %v1382_v27 = vpack.c.bf16 %v1044_v25, %v1044_v25 }
 0x9a3   : > { %1069 = vrot.lane.b32.xlu0 %v1383_v26, %s1646_s14  ;;  %1067 = vrot.lane.b32.xlu1 %v1382_v27, %s1646_s14 }
 0xa11   : > { %v1066_v29 = vpop.permute.xlu0 %1065 }
 0xa12   : > { %1075 = vst.msk [vmem:[#allocation3] sm:$0xf] %vm1074_vm0, %v1066_v29 }
 0xa15   : > { %v1070_v30 = vpop.permute.xlu0 %1069  ;;  %v1068_v32 = vpop.permute.xlu1 %1067 }
 0xa16   : > { %v1080_v33 = vsel %vm1078_vm2, %v1070_v30, %v1079_v31  ;;  %1076 = vst.msk [vmem:[#allocation3 + $0x4] sm:$0xf] %vm1074_vm0, %v1068_v32 }
 0xa17   : > { %1081 = vst [vmem:[#allocation3 + $0x8] sm:$0x1] %v1080_v33 }
 0xa1d   : > { %v1558_v34 = vld [vmem:[#allocation3] sm:$0xff]  }
 0xa1e   : > { %v1559_v35 = vld [vmem:[#allocation3 + $0x8] ss:$0 sps:$4 sm:$0x11]   ;;  %1495 = vmatprep.mubr.msk.bf16.mxu0 %vm268_vm14, %v1558_v34 }
 0xa1f   : > { %1496 = vmatmul.mubr.msk.bf16.vlgmr.msra.gmra.mxu0 %vm268_vm14, %v1559_v35 }
 0xadf   : > { %v1497_v39 = vpop.f32.mrf.mxu0 }
 0xae0   : > { %v1169_v44 = vadd.f32 %v1497_v39, %v1084_v37 }
 0xae1   : > { %v1153_v46 = vpop.f32.mrf.mxu0 }
 0xae2   : > { %1173 = vst.msk [vmem:[#allocation2 + $0x10] sm:$0x1] %vm271_vm15, %v1169_v44  ;;  %v1167_v49 = vadd.f32 %v1153_v46, %v1082_v41 }
 0xae3   : > { %v1498_v50 = vpop.f32.mrf.mxu0 }
 0xae4   : > { %1170 = vst.msk [vmem:[#allocation2] sm:$0xff] %vm268_vm14, %v1167_v49 }
 0xae5   : > { %v1156_v53 = vpop.f32.mrf.mxu0 }
 0xae6   : > { %v1168_v55 = vadd.f32 %v1156_v53, %v1083_v51 }
 0xae8   : > { %1171 = vst.msk [vmem:[#allocation2 + $0x8] sm:$0xff] %vm268_vm14, %v1168_v55 }
 0xae9   : > { %v1179_v58 = vld [vmem:[#allocation2 + $0x10] sm:$0x1] }
 0xaea   : > { %v1188_v59 = vadd.f32 %v1185_v54, %v1179_v58 }
 0xaeb   : > { %v1177_v61 = vld [vmem:[#allocation2] sm:$0xff] }
 0xaec   : > { %v1197_v42 = vadd.f32 %v1194_v57, %v1188_v59  ;;  %v1186_v62 = vadd.f32 %v1185_v54, %v1177_v61 }
 0xaee   : > { %v1386_v1 = vpack.c.bf16 %v1197_v42, %v1197_v42  ;;  %v1195_v43 = vadd.f32 %v1389_v60, %v1186_v62 }
 0xaef   : > { %v1178_v45 = vld [vmem:[#allocation2 + $0x8] sm:$0xff] }
 0xaf0   : > { %v1217_v2 = vsel %vm1215_vm3, %v1386_v1, %v1216_v63  ;;  %v1384_v3 = vpack.c.bf16 %v1195_v43, %v1195_v43  ;;  %v1187_v4 = vadd.f32 %v1185_v54, %v1178_v45 }
 0xaf1   : > { %1218 = vst [vmem:[%s262_s26 + $0x8] sm:$0x1] %v1217_v2 }
 0xaf2   : > { %1212 = vst.msk [vmem:[%s262_s26] sm:$0xf] %vm1211_vm4, %v1384_v3  ;;  %v1196_v5 = vadd.f32 %v1390_v0, %v1187_v4 }
 0xaf4   : > { %v1385_v6 = vpack.c.bf16 %v1196_v5, %v1196_v5 }
 0xaf6   : > { %1213 = vst.msk [vmem:[%s262_s26 + $0x4] sm:$0xf] %vm1211_vm4, %v1385_v6 }
 0xaf7 PF: > { %s14_s17 = sadd.s32 1, %s1630_s17   ;;  %s1863_s15 = smov %s1626_s16 }
 0xaf8   : > { %p11_p5 = scmp.ge.s32.totalorder %s14_s17, 4   ;;  %s1864_s16 = smov %s1866_s18 }
 0xafa   :  { %13 = sbr.rel (!%p11_p5) target bundleno = 2 (0x2), region = 80 }

// kernel: _lambda_.42
= control target key start
LH: loop header
LB: loop body
LE: loop exit
PB: predicated region body
PF: predicated region fallthrough
CT: control target
= control target key end

     0   :  { %vm24_vm0 = vcmask 261120   ;;  %vm37_vm1 = vcmask 254976   ;;  %v94_v43 = vlaneseq  ;;  %vm135_vm2 = vcmask 257024   ;;  %s244_s0 = inlined_call_operand.vmem [shape: bf16[34,32], index: 0, kind: input, shape index: {}]   ;;  %s245_s1 = inlined_call_operand.vmem [shape: bf16[1,32], index: 1, kind: input, shape index: {}]   ;;  %s246_s2 = inlined_call_operand.vmem [shape: bf16[1,32], index: 2, kind: input, shape index: {}]   ;;  %s247_s3 = inlined_call_operand.vmem [shape: bf16[34,32], index: 3, kind: output, shape index: {}]  }
   0x1   :  { %v157_v0 = vld [vmem:[%s244_s0] sm:$0xff]   ;;  %v164_v1 = vld [vmem:[%s244_s0 + $0x8] sm:$0xff]   ;;  %v18_v6 = vld [vmem:[%s244_s0 + $0x10] sm:$0x1]  ;;  %vm140_vm3 = vcmask 253952  }
   0x2   :  { %v158_v2 = vunpack.c.l.bf16 %v157_v0  ;;  %v162_v3 = vunpack.c.l.bf16 %v164_v1  ;;  %v159_v4 = vunpack.c.h.bf16 %v157_v0  ;;  %v163_v5 = vunpack.c.h.bf16 %v164_v1  ;;  %v92_v53 = vld [vmem:[%s245_s1] sm:$0x1] }
   0x3   :  { %v23_v11 = vunpack.c.l.bf16 %v18_v6  ;;  %v95_v50 = vshrl.u32 %v94_v43, 7  ;;  %v103_v56 = vld [vmem:[%s246_s2] sm:$0x1]  ;;  %v93_v57 = vunpack.c.l.bf16 %v92_v53 }
   0x4   :  { %v25_v7 = vsel %vm24_vm0, %v158_v2, 0.0  ;;  %v31_v8 = vsel %vm24_vm0, %v162_v3, 0.0  ;;  %v28_v9 = vsel %vm24_vm0, %v159_v4, 0.0  ;;  %v34_v10 = vsel %vm24_vm0, %v163_v5, 0.0 }
   0x5   :  { %26 = vadd.xlane.f32.xlu0 %v25_v7  ;;  %32 = vadd.xlane.f32.xlu1 %v31_v8  ;;  %v38_v12 = vsel %vm37_vm1, %v23_v11, 0.0  ;;  %v96_v58 = vsub.s32 0, %v95_v50  ;;  %v104_v59 = vunpack.c.l.bf16 %v103_v56 }
   0x7   :  { %v97_v60 = vrot.slane %v93_v57, %v96_v58  ;;  %v108_v62 = vrot.slane %v104_v59, %v96_v58 }
   0x9   :  { %29 = vadd.xlane.f32.xlu0 %v28_v9  ;;  %35 = vadd.xlane.f32.xlu1 %v34_v10 }
   0xd   :  { %39 = vadd.xlane.f32.xlu0 %v38_v12 }
  0x8e   :  { %v27_v13 = vpop.xlane.xlu0 %26  ;;  %v33_v14 = vpop.xlane.xlu1 %32 }
  0x8f   :  { %v42_v15 = vmul.f32 0.03125, %v27_v13  ;;  %v44_v16 = vmul.f32 0.03125, %v33_v14 }
  0x91   :  { %v47_v17 = vsub.f32 %v158_v2, %v42_v15  ;;  %v49_v18 = vsub.f32 %v162_v3, %v44_v16 }
  0x92   :  { %v30_v19 = vpop.xlane.xlu0 %29  ;;  %v36_v20 = vpop.xlane.xlu1 %35 }
  0x93   :  { %v43_v21 = vmul.f32 0.03125, %v30_v19  ;;  %v45_v22 = vmul.f32 0.03125, %v36_v20  ;;  %v52_v23 = vmul.f32 %v47_v17, %v47_v17  ;;  %v54_v24 = vmul.f32 %v49_v18, %v49_v18 }
  0x95   :  { %v48_v25 = vsub.f32 %v159_v4, %v43_v21  ;;  %v209_v26 = vsub.f32 %v163_v5, %v45_v22  ;;  %v57_v27 = vsel %vm24_vm0, %v52_v23, 0.0  ;;  %v63_v30 = vsel %vm24_vm0, %v54_v24, 0.0 }
  0x96   :  { %58 = vadd.xlane.f32.xlu1 %v57_v27  ;;  %v40_v28 = vpop.xlane.xlu0 %39 }
  0x97   :  { %v46_v29 = vmul.f32 0.03125, %v40_v28  ;;  %v53_v31 = vmul.f32 %v48_v25, %v48_v25  ;;  %v55_v32 = vmul.f32 %v209_v26, %v209_v26 }
  0x99   :  { %v51_v33 = vsub.f32 %v23_v11, %v46_v29  ;;  %v60_v34 = vsel %vm24_vm0, %v53_v31, 0.0  ;;  %v66_v35 = vsel %vm24_vm0, %v55_v32, 0.0 }
  0x9a   :  { %64 = vadd.xlane.f32.xlu1 %v63_v30  ;;  %61 = vadd.xlane.f32.xlu0 %v60_v34 }
  0x9b   :  { %v56_v36 = vmul.f32 %v51_v33, %v51_v33 }
  0x9d   :  { %v69_v37 = vsel %vm37_vm1, %v56_v36, 0.0 }
  0x9e   :  { %67 = vadd.xlane.f32.xlu0 %v66_v35  ;;  %70 = vadd.xlane.f32.xlu1 %v69_v37 }
 0x11f   :  { %v59_v38 = vpop.xlane.xlu1 %58 }
 0x120   :  { %v72_v39 = vmul.f32 0.03125, %v59_v38 }
 0x122   :  { %v77_v40 = vadd.f32 1e-06, %v72_v39 }
 0x123   :  { %v65_v41 = vpop.xlane.xlu1 %64  ;;  %v62_v42 = vpop.xlane.xlu0 %61 }
 0x124   :  { %165 = vrsqrt.f32 %v77_v40  ;;  %v74_v44 = vmul.f32 0.03125, %v65_v41  ;;  %v73_v45 = vmul.f32 0.03125, %v62_v42 }
 0x126   :  { %v79_v46 = vadd.f32 1e-06, %v74_v44  ;;  %v78_v47 = vadd.f32 1e-06, %v73_v45 }
 0x127   :  { %v71_v48 = vpop.xlane.xlu1 %70  ;;  %v68_v49 = vpop.xlane.xlu0 %67 }
 0x128   :  { %167 = vrsqrt.f32 %v79_v46  ;;  %v76_v51 = vmul.f32 0.03125, %v71_v48  ;;  %v75_v52 = vmul.f32 0.03125, %v68_v49 }
 0x129   :  { %169 = vrsqrt.f32 %v78_v47 }
 0x12a   :  { %v81_v54 = vadd.f32 1e-06, %v76_v51  ;;  %v80_v55 = vadd.f32 1e-06, %v75_v52 }
 0x12c   :  { %171 = vrsqrt.f32 %v81_v54 }
 0x12d   :  { %173 = vrsqrt.f32 %v80_v55 }
 0x131   :  { %v166_v61 = vpop.eup %165 }
 0x132   :  { %v87_v63 = vmul.f32 %v166_v61, %v47_v17 }
 0x134   :  { %v98_v0 = vmul.f32 %v97_v60, %v87_v63 }
 0x135   :  { %v168_v1 = vpop.eup %167 }
 0x136   :  { %v170_v2 = vpop.eup %169  ;;  %v109_v3 = vadd.f32 %v108_v62, %v98_v0  ;;  %v89_v4 = vmul.f32 %v168_v1, %v49_v18 }
 0x137   :  { %v88_v5 = vmul.f32 %v170_v2, %v48_v25 }
 0x138   :  { %v151_v6 = vpack.c.bf16 %v109_v3, %v109_v3  ;;  %v100_v7 = vmul.f32 %v97_v60, %v89_v4 }
 0x139   :  { %v172_v8 = vpop.eup %171  ;;  %v99_v9 = vmul.f32 %v97_v60, %v88_v5 }
 0x13a   :  { %v174_v10 = vpop.eup %173  ;;  %136 = vst.msk [vmem:[%s247_s3] sm:$0xf] %vm135_vm2, %v151_v6  ;;  %v111_v11 = vadd.f32 %v108_v62, %v100_v7  ;;  %v91_v12 = vmul.f32 %v172_v8, %v51_v33 }
 0x13b   :  { %v110_v13 = vadd.f32 %v108_v62, %v99_v9  ;;  %v90_v14 = vmul.f32 %v174_v10, %v209_v26 }
 0x13c   :  { %v153_v15 = vpack.c.bf16 %v111_v11, %v111_v11  ;;  %v102_v16 = vmul.f32 %v97_v60, %v91_v12 }
 0x13d   :  { %v152_v17 = vpack.c.bf16 %v110_v13, %v110_v13  ;;  %v101_v18 = vmul.f32 %v97_v60, %v90_v14 }
 0x13e   :  { %138 = vst.msk [vmem:[%s247_s3 + $0x8] sm:$0xf] %vm135_vm2, %v153_v15  ;;  %v113_v19 = vadd.f32 %v108_v62, %v102_v16 }
 0x13f   :  { %137 = vst.msk [vmem:[%s247_s3 + $0x4] sm:$0xf] %vm135_vm2, %v152_v17  ;;  %v112_v20 = vadd.f32 %v108_v62, %v101_v18 }
 0x140   :  { %v155_v21 = vpack.c.bf16 %v113_v19, %v113_v19 }
 0x141   :  { %v154_v22 = vpack.c.bf16 %v112_v20, %v112_v20 }
 0x142   :  { %141 = vst.msk [vmem:[%s247_s3 + $0x10] sm:$0x1] %vm140_vm3, %v155_v21 }
 0x143   :  { %139 = vst.msk [vmem:[%s247_s3 + $0xc] sm:$0xf] %vm135_vm2, %v154_v22 }

// kernel: _lambda_.43
= control target key start
LH: loop header
LB: loop body
LE: loop exit
PB: predicated region body
PF: predicated region fallthrough
CT: control target
= control target key end

     0   :  { %vm32_vm0 = vcmask 261120   ;;  %vm45_vm1 = vcmask 254976   ;;  %v361_v39 = vmov 0.0   ;;  %vm362_vm2 = vmmov 0   ;;  %s480_s0 = inlined_call_operand.vmem [shape: bf16[34,32], index: 0, kind: input, shape index: {}]   ;;  %s481_s3 = inlined_call_operand.vmem [shape: bf16[32,16], index: 3, kind: input, shape index: {}]   ;;  %s482_s1 = inlined_call_operand.vmem [shape: bf16[1,32], index: 1, kind: input, shape index: {}]   ;;  %s483_s2 = inlined_call_operand.vmem [shape: bf16[1,32], index: 2, kind: input, shape index: {}]   ;;  %s484_s4 = inlined_call_operand.vmem [shape: bf16[34,16], index: 4, kind: output, shape index: {}]  }
   0x1   :  { %v318_v0 = vld [vmem:[%s480_s0 + $0x8] sm:$0xff]   ;;  %v311_v1 = vld [vmem:[%s480_s0] sm:$0xff]   ;;  %v26_v5 = vld [vmem:[%s480_s0 + $0x10] sm:$0x1]  ;;  %340 = vmatprep.subr.bf16.mxu1 %v361_v39  ;;  %324 = vmatprep.subr.bf16.mxu0 %v361_v39  ;;  %v102_v46 = vlaneseq  ;;  %vm143_vm3 = vcmask 257024   ;;  %vm148_vm4 = vcmask 253952  }
   0x2   :  { %v316_v2 = vunpack.c.l.bf16 %v318_v0  ;;  %v317_v3 = vunpack.c.h.bf16 %v318_v0  ;;  %v312_v4 = vunpack.c.l.bf16 %v311_v1  ;;  %v313_v6 = vunpack.c.h.bf16 %v311_v1  ;;  %v346_v38 = vld [vmem:[%s481_s3 + $0x8] sm:$0xff]   ;;  %v347_v40 = vld [vmem:[%s481_s3] sm:$0xff]   ;;  %332 = vmatprep.mubr.msk.bf16.mxu1 %vm362_vm2, %v361_v39  ;;  %328 = vmatprep.mubr.msk.bf16.mxu0 %vm362_vm2, %v361_v39 }
   0x3   :  { %v31_v10 = vunpack.c.l.bf16 %v26_v5  ;;  %342 = vmatpush3.bf16.msra.mxu1 %v346_v38  ;;  %325 = vmatpush3.bf16.msra.mxu0 %v346_v38  ;;  %v103_v53 = vshrl.u32 %v102_v46, 7  ;;  %v100_v56 = vld [vmem:[%s482_s1] sm:$0x1]  ;;  %vm271_vm5 = vcmask 125952   ;;  %vm276_vm6 = vcmask 122880  }
   0x4   :  { %v39_v7 = vsel %vm32_vm0, %v316_v2, 0.0  ;;  %v33_v8 = vsel %vm32_vm0, %v312_v4, 0.0  ;;  %v42_v9 = vsel %vm32_vm0, %v317_v3, 0.0  ;;  %v36_v11 = vsel %vm32_vm0, %v313_v6, 0.0  ;;  %341 = vmatprep.subr.bf16.mxu1 %v361_v39  ;;  %326 = vmatprep.subr.bf16.mxu0 %v361_v39  ;;  %v111_v59 = vld [vmem:[%s483_s2] sm:$0x1] }
   0x5   :  { %40 = vadd.xlane.f32.xlu0 %v39_v7  ;;  %34 = vadd.xlane.f32.xlu1 %v33_v8  ;;  %v46_v12 = vsel %vm45_vm1, %v31_v10, 0.0  ;;  %v101_v60 = vunpack.c.l.bf16 %v100_v56  ;;  %v104_v61 = vsub.s32 0, %v103_v53  ;;  %v112_v62 = vunpack.c.l.bf16 %v111_v59 }
   0x7   :  { %343 = vmatpush3.bf16.msra.mxu1 %v347_v40  ;;  %327 = vmatpush3.bf16.msra.mxu0 %v347_v40  ;;  %v105_v63 = vrot.slane %v101_v60, %v104_v61  ;;  %v116_v1 = vrot.slane %v112_v62, %v104_v61 }
   0x9   :  { %43 = vadd.xlane.f32.xlu0 %v42_v9  ;;  %37 = vadd.xlane.f32.xlu1 %v36_v11 }
   0xd   :  { %47 = vadd.xlane.f32.xlu0 %v46_v12 }
  0x8e   :  { %v41_v13 = vpop.xlane.xlu0 %40  ;;  %v35_v14 = vpop.xlane.xlu1 %34 }
  0x8f   :  { %v52_v15 = vmul.f32 0.03125, %v41_v13  ;;  %v50_v16 = vmul.f32 0.03125, %v35_v14 }
  0x91   :  { %v402_v17 = vsub.f32 %v316_v2, %v52_v15  ;;  %v404_v18 = vsub.f32 %v312_v4, %v50_v16 }
  0x92   :  { %v44_v19 = vpop.xlane.xlu0 %43  ;;  %v38_v20 = vpop.xlane.xlu1 %37 }
  0x93   :  { %v53_v21 = vmul.f32 0.03125, %v44_v19  ;;  %v62_v22 = vmul.f32 %v402_v17, %v402_v17  ;;  %v51_v23 = vmul.f32 0.03125, %v38_v20  ;;  %v60_v24 = vmul.f32 %v404_v18, %v404_v18 }
  0x95   :  { %v410_v25 = vsub.f32 %v317_v3, %v53_v21  ;;  %v71_v26 = vsel %vm32_vm0, %v62_v22, 0.0  ;;  %v413_v27 = vsub.f32 %v313_v6, %v51_v23  ;;  %v65_v31 = vsel %vm32_vm0, %v60_v24, 0.0 }
  0x96   :  { %v48_v28 = vpop.xlane.xlu0 %47  ;;  %72 = vadd.xlane.f32.xlu1 %v71_v26 }
  0x97   :  { %v54_v29 = vmul.f32 0.03125, %v48_v28  ;;  %v63_v30 = vmul.f32 %v410_v25, %v410_v25  ;;  %v61_v32 = vmul.f32 %v413_v27, %v413_v27 }
  0x99   :  { %v420_v33 = vsub.f32 %v31_v10, %v54_v29  ;;  %v74_v34 = vsel %vm32_vm0, %v63_v30, 0.0  ;;  %v68_v36 = vsel %vm32_vm0, %v61_v32, 0.0 }
  0x9a   :  { %75 = vadd.xlane.f32.xlu0 %v74_v34  ;;  %66 = vadd.xlane.f32.xlu1 %v65_v31 }
  0x9b   :  { %v64_v35 = vmul.f32 %v420_v33, %v420_v33 }
  0x9d   :  { %v77_v37 = vsel %vm45_vm1, %v64_v35, 0.0 }
  0x9e   :  { %78 = vadd.xlane.f32.xlu1 %v77_v37  ;;  %69 = vadd.xlane.f32.xlu0 %v68_v36 }
 0x11f   :  { %v73_v41 = vpop.xlane.xlu1 %72 }
 0x120   :  { %v82_v42 = vmul.f32 0.03125, %v73_v41 }
 0x122   :  { %v87_v43 = vadd.f32 1e-05, %v82_v42 }
 0x123   :  { %v76_v44 = vpop.xlane.xlu0 %75  ;;  %v67_v45 = vpop.xlane.xlu1 %66 }
 0x124   :  { %351 = vrsqrt.f32 %v87_v43  ;;  %v83_v47 = vmul.f32 0.03125, %v76_v44  ;;  %v80_v48 = vmul.f32 0.03125, %v67_v45 }
 0x126   :  { %v88_v49 = vadd.f32 1e-05, %v83_v47  ;;  %v85_v50 = vadd.f32 1e-05, %v80_v48 }
 0x127   :  { %v70_v51 = vpop.xlane.xlu0 %69  ;;  %v79_v52 = vpop.xlane.xlu1 %78 }
 0x128   :  { %353 = vrsqrt.f32 %v88_v49  ;;  %v81_v54 = vmul.f32 0.03125, %v70_v51  ;;  %v84_v55 = vmul.f32 0.03125, %v79_v52 }
 0x129   :  { %355 = vrsqrt.f32 %v85_v50 }
 0x12a   :  { %v86_v57 = vadd.f32 1e-05, %v81_v54  ;;  %v89_v58 = vadd.f32 1e-05, %v84_v55 }
 0x12c   :  { %357 = vrsqrt.f32 %v86_v57 }
 0x12d   :  { %359 = vrsqrt.f32 %v89_v58 }
 0x131   :  { %v352_v0 = vpop.eup %351 }
 0x132   :  { %v97_v2 = vmul.f32 %v352_v0, %v402_v17 }
 0x134   :  { %v108_v3 = vmul.f32 %v105_v63, %v97_v2 }
 0x135   :  { %v354_v4 = vpop.eup %353 }
 0x136   :  { %v356_v5 = vpop.eup %355  ;;  %v119_v6 = vadd.f32 %v116_v1, %v108_v3  ;;  %v98_v7 = vmul.f32 %v354_v4, %v410_v25 }
 0x137   :  { %v95_v8 = vmul.f32 %v356_v5, %v404_v18 }
 0x138   :  { %v302_v9 = vpack.c.bf16 %v119_v6, %v119_v6  ;;  %v109_v10 = vmul.f32 %v105_v63, %v98_v7 }
 0x139   :  { %v358_v11 = vpop.eup %357  ;;  %v106_v12 = vmul.f32 %v105_v63, %v95_v8 }
 0x13a   :  { %v360_v13 = vpop.eup %359  ;;  %146 = vst.msk [vmem:[#allocation2 + $0x8] sm:$0xf] %vm143_vm3, %v302_v9  ;;  %v120_v14 = vadd.f32 %v116_v1, %v109_v10  ;;  %v96_v15 = vmul.f32 %v358_v11, %v413_v27 }
 0x13b   :  { %v117_v16 = vadd.f32 %v116_v1, %v106_v12  ;;  %v99_v17 = vmul.f32 %v360_v13, %v420_v33 }
 0x13c   :  { %v303_v19 = vpack.c.bf16 %v120_v14, %v120_v14  ;;  %v107_v20 = vmul.f32 %v105_v63, %v96_v15 }
 0x13d   :  { %v300_v21 = vpack.c.bf16 %v117_v16, %v117_v16  ;;  %v110_v22 = vmul.f32 %v105_v63, %v99_v17 }
 0x13e   :  { %147 = vst.msk [vmem:[#allocation2 + $0xc] sm:$0xf] %vm143_vm3, %v303_v19  ;;  %v118_v18 = vadd.f32 %v116_v1, %v107_v20 }
 0x13f   :  { %144 = vst.msk [vmem:[#allocation2] sm:$0xf] %vm143_vm3, %v300_v21  ;;  %v121_v23 = vadd.f32 %v116_v1, %v110_v22 }
 0x140   :  { %v301_v24 = vpack.c.bf16 %v118_v18, %v118_v18 }
 0x141   :  { %v304_v25 = vpack.c.bf16 %v121_v23, %v121_v23 }
 0x142   :  { %145 = vst.msk [vmem:[#allocation2 + $0x4] sm:$0xf] %vm143_vm3, %v301_v24 }
 0x143   :  { %149 = vst.msk [vmem:[#allocation2 + $0x10] sm:$0x1] %vm148_vm4, %v304_v25 }
 0x145   :  { %v348_v26 = vld [vmem:[#allocation2 + $0x8] sm:$0xff]  }
 0x146   :  { %333 = vmatmul.mubr.msk.bf16.vlgmr.msra.gmra.mxu1 %vm32_vm0, %v348_v26 }
 0x147   :  { %336 = vmatprep.mubr.msk.bf16.mxu1 %vm362_vm2, %v361_v39 }
 0x149   :  { %v349_v27 = vld [vmem:[#allocation2] sm:$0xff]  }
 0x14a   :  { %329 = vmatmul.mubr.msk.bf16.vlgmr.msra.gmra.mxu0 %vm32_vm0, %v349_v27  ;;  %v350_v28 = vld [vmem:[#allocation2 + $0x10] ss:$0 sps:$4 sm:$0x11]  }
 0x14e   :  { %337 = vmatmul.mubr.msk.bf16.gmra.mxu1 %vm32_vm0, %v350_v28 }
 0x206   :  { %v236_v29 = vpop.f32.mrf.mxu1 }
 0x207   :  { %v307_v30 = vpack.c.bf16 %v236_v29, %v236_v29 }
 0x208   :  { %v334_v31 = vpop.f32.mrf.mxu1 }
 0x209   :  { %274 = vst.msk [vmem:[%s484_s4 + $0x8] sm:$0xf] %vm271_vm5, %v307_v30 }
 0x20a   :  { %v228_v32 = vpop.f32.mrf.mxu0  ;;  %v239_v33 = vpop.f32.mrf.mxu1 }
 0x20b   :  { %v305_v34 = vpack.c.bf16 %v228_v32, %v228_v32  ;;  %v308_v35 = vpack.c.bf16 %v239_v33, %v239_v33 }
 0x20c   :  { %v330_v36 = vpop.f32.mrf.mxu0  ;;  %v335_v37 = vpop.f32.mrf.mxu1 }
 0x20d   :  { %272 = vst.msk [vmem:[%s484_s4] sm:$0xf] %vm271_vm5, %v305_v34  ;;  %275 = vst.msk [vmem:[%s484_s4 + $0xc] sm:$0xf] %vm271_vm5, %v308_v35 }
 0x20e   :  { %v231_v38 = vpop.f32.mrf.mxu0  ;;  %v244_v39 = vpop.f32.mrf.mxu1 }
 0x20f   :  { %v306_v40 = vpack.c.bf16 %v231_v38, %v231_v38  ;;  %v309_v41 = vpack.c.bf16 %v244_v39, %v244_v39 }
 0x210   :  { %v331_v42 = vpop.f32.mrf.mxu0  ;;  %v338_v43 = vpop.f32.mrf.mxu1 }
 0x211   :  { %273 = vst.msk [vmem:[%s484_s4 + $0x4] sm:$0xf] %vm271_vm5, %v306_v40 }
 0x212   :  { %277 = vst.msk [vmem:[%s484_s4 + $0x10] sm:$0x1] %vm276_vm6, %v309_v41  ;;  %v247_v44 = vpop.f32.mrf.mxu1 }
 0x214   :  { %v339_v45 = vpop.f32.mrf.mxu1 }

</bundles_post_ra>
